<compile_context>
chip_gen: v5e
topology: v5e:2x2
jax: 0.10.0
libtpu: 0.0.40
codegen_flags: <defaults>
</compile_context>

<pallas_src>
import functools

import jax
import jax.numpy as jnp
from jax.experimental import pallas as pl
from jax.experimental.pallas import tpu as pltpu


def _deform_conv_kernel(xcol_ref, xrows_ref, basex_ref, basey_ref, woff_ref,
                        wbig_ref, rowq_ref, colq_ref, ssum_ref,
                        out_ref, wx_ref, *,
                        N, NP, O, Hp, Wp, LC):
    c = pl.program_id(1)

    # ---- once per sample (chunk 0): WX = block-diag(wconv) @ padded image ---
    # WX[(n*O+o)*Hp + qx, qy] = sum_c wconv[o,c,n] * xpad[c,qx,qy]
    @pl.when(c == 0)
    def _():
        xr = xrows_ref[0].astype(jnp.bfloat16)               # (C*Hp, Wp)
        wx = jnp.dot(wbig_ref[...], xr,
                     preferred_element_type=jnp.float32)     # (N*O*Hp, Wp)
        wx_ref[...] = wx.astype(jnp.bfloat16)

    # ---- offset conv for this lane chunk (kept f32: sampling-location math) -
    off = jnp.dot(woff_ref[...], xcol_ref[0],
                  preferred_element_type=jnp.float32)        # (2*NP, LC)
    base_x = basex_ref[...]                                  # (NP, LC) bias folded
    base_y = basey_ref[...]                                  # (NP, LC)

    rowq = rowq_ref[...]                                     # (O*Hp, 1) f32: qx per row
    colq = colq_ref[...]                                     # (Wp, 1)   f32: qy per row

    acc = jnp.zeros((O * Hp, LC), jnp.float32)
    for n in range(N):                                       # 9 taps, serialized by acc
        px = base_x[n:n + 1, :] + off[n:n + 1, :]            # (1, LC)
        py = base_y[n:n + 1, :] + off[NP + n:NP + n + 1, :]  # (1, LC)
        fx = jnp.floor(px)
        fy = jnp.floor(py)
        ltx = jnp.clip(fx, 0.0, Hp - 1.0)
        rbx = jnp.clip(fx + 1.0, 0.0, Hp - 1.0)
        lty = jnp.clip(fy, 0.0, Wp - 1.0)
        rby = jnp.clip(fy + 1.0, 0.0, Wp - 1.0)
        pxc = jnp.clip(px, 0.0, Hp - 1.0)
        pyc = jnp.clip(py, 0.0, Wp - 1.0)
        wxlt = 1.0 + (ltx - pxc)
        wxrb = 1.0 - (rbx - pxc)
        wylt = 1.0 + (lty - pyc)
        wyrb = 1.0 - (rby - pyc)

        # column (qy) factor, (Wp, LC) -- contracted on the MXU.
        # Duplicate clipped corners sum, exactly like the reference gathers.
        bm = (jnp.where(colq == lty, wylt, 0.0)
              + jnp.where(colq == rby, wyrb, 0.0))
        lhs = wx_ref[pl.ds(n * O * Hp, O * Hp), :]           # (O*Hp, Wp) bf16
        m = jnp.dot(lhs, bm.astype(jnp.bfloat16),
                    preferred_element_type=jnp.float32)      # (O*Hp, LC)

        # row (qx) factor, (O*Hp, LC) -- applied elementwise (f32, v5e-safe)
        at = (jnp.where(rowq == ltx, wxlt, 0.0)
              + jnp.where(rowq == rbx, wxrb, 0.0))
        acc = acc + m * at

    # ---- sum the qx groups with a constant 0/1 matmul: (O, O*Hp) @ acc ------
    out_ref[0] = jnp.dot(ssum_ref[...], acc,
                         preferred_element_type=jnp.float32).astype(out_ref.dtype)


def deformable_conv(x, w_off, b_off, w_conv, *, kernel_size=3, padding=1,
                    stride=1):
    """Pallas deformable convolution. x: (B, C, H, W) float32 (NCHW)."""
    B, C, H, W = x.shape
    ks = kernel_size
    N = ks * ks
    NP = ((N + 7) // 8) * 8                 # sublane-aligned tap-row padding
    O = w_conv.shape[0]
    HW = H * W
    Hp, Wp = H + 2 * padding, W + 2 * padding

    if stride != 1:
        # TODO(synk): stride != 1 changes the output grid; not implemented here.
        raise NotImplementedError("this Pallas deformable_conv assumes stride=1")

    LC = 128 if HW % 128 == 0 else HW       # lane chunk (keeps temps <= 18 vregs)
    n_chunks = HW // LC

    # ---------------- plain-JAX glue (reshapes / constant operands) ----------
    # im2col for the offset-predicting 3x3 conv (its own padding is fixed to 1)
    xp_off = jnp.pad(x, ((0, 0), (0, 0), (1, 1), (1, 1)))
    cols = [xp_off[:, :, i:i + H, j:j + W] for i in range(ks) for j in range(ks)]
    x_col = jnp.stack(cols, axis=2).reshape(B, C * N, HW)          # (B, C*N, HW)

    # zero-padded input used by the deformable sampling, rows=(c,qx), lanes=qy
    xp = jnp.pad(x, ((0, 0), (0, 0), (padding, padding), (padding, padding)))
    x_rows = xp.reshape(B, C * Hp, Wp)                             # (B, C*Hp, Wp)

    # constant base grid p_0 + p_n, with the offset-conv bias folded in
    r = (ks - 1) // 2
    d = jnp.arange(-r, r + 1, dtype=jnp.float32)
    pnx = jnp.repeat(d, ks)                                        # (N,)
    pny = jnp.tile(d, ks)                                          # (N,)
    p0x = (jnp.arange(H, dtype=jnp.float32) * stride + 1)[:, None] * jnp.ones((1, W), jnp.float32)
    p0y = jnp.ones((H, 1), jnp.float32) * (jnp.arange(W, dtype=jnp.float32) * stride + 1)[None, :]
    base_x = (pnx[:, None, None] + p0x[None]).reshape(N, HW) + b_off[:N, None]
    base_y = (pny[:, None, None] + p0y[None]).reshape(N, HW) + b_off[N:, None]
    base_x = jnp.pad(base_x, ((0, NP - N), (0, 0)))                # (NP, HW)
    base_y = jnp.pad(base_y, ((0, NP - N), (0, 0)))

    # offset-conv weight: x-half in rows [0, N), y-half in rows [NP, NP+N)
    woff_flat = w_off.reshape(2 * N, C * N)
    woff_pad = jnp.zeros((2 * NP, C * N), jnp.float32)
    woff_pad = woff_pad.at[:N].set(woff_flat[:N])
    woff_pad = woff_pad.at[NP:NP + N].set(woff_flat[N:])

    # block-diagonal conv weight for the once-per-sample WX matmul:
    # WBIG[(n*O+o)*Hp + qx, c*Hp + qx'] = wconv[o, c, n] * [qx == qx']
    w_ocn = w_conv.reshape(O, C, N)
    wbig = jnp.einsum('ocn,xz->noxcz', w_ocn, jnp.eye(Hp, dtype=jnp.float32))
    wbig = wbig.reshape(N * O * Hp, C * Hp).astype(jnp.bfloat16)

    # constant index columns (f32 compares are exact for small integers)
    rowq = jnp.tile(jnp.arange(Hp, dtype=jnp.float32), O)[:, None]       # (O*Hp, 1)
    colq = jnp.arange(Wp, dtype=jnp.float32)[:, None]                    # (Wp, 1)
    # 0/1 selection matrix summing each output row's Hp partial rows
    ssum = jnp.kron(jnp.eye(O, dtype=jnp.float32),
                    jnp.ones((1, Hp), jnp.float32))                      # (O, O*Hp)

    kern = functools.partial(_deform_conv_kernel,
                             N=N, NP=NP, O=O, Hp=Hp, Wp=Wp, LC=LC)

    out = pl.pallas_call(
        kern,
        out_shape=jax.ShapeDtypeStruct((B, O, HW), jnp.float32),
        grid=(B, n_chunks),
        in_specs=[
            pl.BlockSpec((1, C * N, LC), lambda b, c: (b, 0, c)),       # x_col
            pl.BlockSpec((1, C * Hp, Wp), lambda b, c: (b, 0, 0)),      # x_rows
            pl.BlockSpec((NP, LC), lambda b, c: (0, c)),                # base_x (+bias)
            pl.BlockSpec((NP, LC), lambda b, c: (0, c)),                # base_y (+bias)
            pl.BlockSpec((2 * NP, C * N), lambda b, c: (0, 0)),         # woff (padded)
            pl.BlockSpec((N * O * Hp, C * Hp), lambda b, c: (0, 0)),    # wbig (bf16)
            pl.BlockSpec((O * Hp, 1), lambda b, c: (0, 0)),             # rowq
            pl.BlockSpec((Wp, 1), lambda b, c: (0, 0)),                 # colq
            pl.BlockSpec((O, O * Hp), lambda b, c: (0, 0)),             # ssum
        ],
        out_specs=pl.BlockSpec((1, O, LC), lambda b, c: (b, 0, c)),
        scratch_shapes=[pltpu.VMEM((N * O * Hp, Wp), jnp.bfloat16)],    # WX, per sample
        compiler_params=pltpu.CompilerParams(
            dimension_semantics=("parallel", "arbitrary")),
    )(x_col, x_rows, base_x, base_y, woff_pad, wbig, rowq, colq, ssum)

    return out.reshape(B, O, H, W)


# ---------------- pure-JAX reference (mirrors the PyTorch forward) ----------
def deformable_conv_reference(x, w_off, b_off, w_conv, kernel_size=3, padding=1, stride=1):
    ks = kernel_size
    N = ks * ks
    B, C, H, W = x.shape
    O = w_conv.shape[0]
    offset = jax.lax.conv_general_dilated(
        x, w_off, window_strides=(stride, stride), padding=((1, 1), (1, 1)),
        dimension_numbers=('NCHW', 'OIHW', 'NCHW')) + b_off[None, :, None, None]
    xp = jnp.pad(x, ((0, 0), (0, 0), (padding, padding), (padding, padding)))
    Hp, Wp = xp.shape[2], xp.shape[3]
    h, w = offset.shape[2], offset.shape[3]
    r = (ks - 1) // 2
    d = jnp.arange(-r, r + 1).astype(jnp.float32)
    pnx, pny = jnp.repeat(d, ks), jnp.tile(d, ks)
    p0x = jnp.arange(1, h * stride + 1, stride).astype(jnp.float32)[:, None] * jnp.ones((1, w))
    p0y = jnp.ones((h, 1)) * jnp.arange(1, w * stride + 1, stride).astype(jnp.float32)[None, :]
    px = pnx[None, :, None, None] + p0x[None, None] + offset[:, :N]
    py = pny[None, :, None, None] + p0y[None, None] + offset[:, N:]
    px = jnp.transpose(px, (0, 2, 3, 1))
    py = jnp.transpose(py, (0, 2, 3, 1))                    # (B, h, w, N)
    qltx, qlty = jnp.floor(px), jnp.floor(py)
    qrbx, qrby = qltx + 1, qlty + 1
    qltx = jnp.clip(qltx, 0, Hp - 1)
    qlty = jnp.clip(qlty, 0, Wp - 1)
    qrbx = jnp.clip(qrbx, 0, Hp - 1)
    qrby = jnp.clip(qrby, 0, Wp - 1)
    pxc = jnp.clip(px, 0, Hp - 1)
    pyc = jnp.clip(py, 0, Wp - 1)
    g_lt = (1 + (qltx - pxc)) * (1 + (qlty - pyc))
    g_rb = (1 - (qrbx - pxc)) * (1 - (qrby - pyc))
    g_lb = (1 + (qltx - pxc)) * (1 - (qrby - pyc))
    g_rt = (1 - (qrbx - pxc)) * (1 + (qlty - pyc))
    x_flat = xp.reshape(B, C, Hp * Wp)

    def gather(ix, iy):
        idx = (ix.astype(jnp.int32) * Wp + iy.astype(jnp.int32)).reshape(B, -1)
        idx = jnp.broadcast_to(idx[:, None, :], (B, C, idx.shape[-1]))
        return jnp.take_along_axis(x_flat, idx, axis=2).reshape(B, C, h, w, N)

    x_lt, x_rb = gather(qltx, qlty), gather(qrbx, qrby)
    x_lb, x_rt = gather(qltx, qrby), gather(qrbx, qlty)
    x_offset = (g_lt[:, None] * x_lt + g_rb[:, None] * x_rb
                + g_lb[:, None] * x_lb + g_rt[:, None] * x_rt)   # (B, C, h, w, N)
    # reshape_x_offset + Conv2d(kernel=ks, stride=ks, bias=None) == contraction over (c, n)
    return jnp.einsum('bchwn,ocn->bohw', x_offset, w_conv.reshape(O, C, N))


if __name__ == "__main__":
    key = jax.random.PRNGKey(0)
    k1, k2, k3, k4 = jax.random.split(key, 4)

    B, C, O, H, W = 4, 4, 8, 16, 16
    ks = 3
    N = ks * ks

    # deterministic synthetic parameters (shapes match the PyTorch module)
    x = jax.random.normal(k1, (B, C, H, W), jnp.float32)
    w_off = 0.1 * jax.random.normal(k2, (2 * N, C, ks, ks), jnp.float32)   # offsets conv weight
    b_off = 0.1 * jax.random.normal(k3, (2 * N,), jnp.float32)             # offsets conv bias
    w_conv = jax.random.normal(k4, (O, C, ks, ks), jnp.float32) / (C * N)  # conv_kernel weight (bias=None)

    out = deformable_conv(x, w_off, b_off, w_conv, kernel_size=ks, padding=1, stride=1)
    out = jax.block_until_ready(out)

    ref = deformable_conv_reference(x, w_off, b_off, w_conv, kernel_size=ks, padding=1, stride=1)
    assert out.shape == (B, O, H, W), out.shape
    # tolerance accounts for bf16 MXU operands (WX and the column factor);
    # sampling-location math and accumulation stay in f32.
    if not jnp.allclose(out, ref, atol=1e-2, rtol=1e-2):
        raise AssertionError("Pallas result does not match reference, max err = "
                             f"{float(jnp.max(jnp.abs(out - ref)))}")
    print("KERNEL_OK")
</pallas_src>

<mosaic_0001>
module attributes {stable_mosaic.version = 11 : i64} {
  func.func @_deform_conv_kernel(%arg0: i32, %arg1: i32, %arg2: memref<1x36x128xf32, #tpu.memory_space<vmem>>, %arg3: memref<1x72x18xf32, #tpu.memory_space<vmem>>, %arg4: memref<16x128xf32, #tpu.memory_space<vmem>>, %arg5: memref<16x128xf32, #tpu.memory_space<vmem>>, %arg6: memref<32x36xf32, #tpu.memory_space<vmem>>, %arg7: memref<1296x72xbf16, #tpu.memory_space<vmem>>, %arg8: memref<144x1xf32, #tpu.memory_space<vmem>>, %arg9: memref<18x1xf32, #tpu.memory_space<vmem>>, %arg10: memref<8x144xf32, #tpu.memory_space<vmem>>, %arg11: memref<1x8x128xf32, #tpu.memory_space<vmem>>, %arg12: memref<1296x18xbf16, #tpu.memory_space<vmem>>) attributes {dimension_semantics = [#tpu.dimension_semantics<parallel>, #tpu.dimension_semantics<arbitrary>], iteration_bounds = array<i64: 4, 2>, scalar_prefetch = 0 : i64, scratch_operands = 1 : i64, tpu.core_type = #tpu.core_type<tc>, window_params = [{transform_indices = @transform_0, window_bounds = array<i64: 1, 36, 128>}, {transform_indices = @transform_1, window_bounds = array<i64: 1, 72, 18>}, {transform_indices = @transform_2, window_bounds = array<i64: 16, 128>}, {transform_indices = @transform_3, window_bounds = array<i64: 16, 128>}, {pipeline_mode = #tpu.pipeline_mode<synchronous>, transform_indices = @transform_4, window_bounds = array<i64: 32, 36>}, {pipeline_mode = #tpu.pipeline_mode<synchronous>, transform_indices = @transform_5, window_bounds = array<i64: 1296, 72>}, {pipeline_mode = #tpu.pipeline_mode<synchronous>, transform_indices = @transform_6, window_bounds = array<i64: 144, 1>}, {pipeline_mode = #tpu.pipeline_mode<synchronous>, transform_indices = @transform_7, window_bounds = array<i64: 18, 1>}, {pipeline_mode = #tpu.pipeline_mode<synchronous>, transform_indices = @transform_8, window_bounds = array<i64: 8, 144>}, {transform_indices = @transform_9, window_bounds = array<i64: 1, 8, 128>}]} {
    %c0_i32 = arith.constant 0 : i32
    %0 = arith.cmpi eq, %arg1, %c0_i32 : i32
    %1 = arith.extui %0 : i1 to i32
    %c0_i32_0 = arith.constant 0 : i32
    %2 = arith.cmpi ne, %1, %c0_i32_0 : i32
    scf.if %2 {
      %c0_237 = arith.constant 0 : index
      %c0_238 = arith.constant 0 : index
      %c0_239 = arith.constant 0 : index
      %764 = vector.load %arg3[%c0_237, %c0_238, %c0_239] : memref<1x72x18xf32, #tpu.memory_space<vmem>>, vector<1x72x18xf32>
      %765 = vector.shape_cast %764 : vector<1x72x18xf32> to vector<72x18xf32>
      %766 = arith.truncf %765 : vector<72x18xf32> to vector<72x18xbf16>
      %c0_240 = arith.constant 0 : index
      %c0_241 = arith.constant 0 : index
      %767 = vector.load %arg7[%c0_240, %c0_241] : memref<1296x72xbf16, #tpu.memory_space<vmem>>, vector<1296x72xbf16>
      %cst_242 = arith.constant dense<0.000000e+00> : vector<1296x18xf32>
      %768 = tpu.matmul %767, %766, %cst_242 {dimension_numbers = #tpu.dot_dimension_numbers<[1], [0], [0], [1], [0, 0, 1, 1], [], []>} : vector<1296x72xbf16>, vector<72x18xbf16>, vector<1296x18xf32> -> vector<1296x18xf32>
      %769 = arith.truncf %768 : vector<1296x18xf32> to vector<1296x18xbf16>
      %c0_243 = arith.constant 0 : index
      %c0_244 = arith.constant 0 : index
      %770 = vector.load %arg12[%c0_243, %c0_244] : memref<1296x18xbf16, #tpu.memory_space<vmem>>, vector<1296x18xbf16>
      tpu.vector_store %arg12[%c0_243, %c0_244], %769 {strides = array<i32>} : memref<1296x18xbf16, #tpu.memory_space<vmem>>, vector<1296x18xbf16>,
    } else {
    }
    %c0 = arith.constant 0 : index
    %c0_1 = arith.constant 0 : index
    %3 = vector.load %arg6[%c0, %c0_1] : memref<32x36xf32, #tpu.memory_space<vmem>>, vector<32x36xf32>
    %c0_2 = arith.constant 0 : index
    %c0_3 = arith.constant 0 : index
    %c0_4 = arith.constant 0 : index
    %4 = vector.load %arg2[%c0_2, %c0_3, %c0_4] : memref<1x36x128xf32, #tpu.memory_space<vmem>>, vector<1x36x128xf32>
    %5 = vector.shape_cast %4 : vector<1x36x128xf32> to vector<36x128xf32>
    %cst = arith.constant dense<0.000000e+00> : vector<32x128xf32>
    %6 = tpu.matmul %3, %5, %cst {dimension_numbers = #tpu.dot_dimension_numbers<[1], [0], [0], [1], [0, 0, 1, 1], [], []>} : vector<32x36xf32>, vector<36x128xf32>, vector<32x128xf32> -> vector<32x128xf32>
    %c0_5 = arith.constant 0 : index
    %c0_6 = arith.constant 0 : index
    %7 = vector.load %arg4[%c0_5, %c0_6] : memref<16x128xf32, #tpu.memory_space<vmem>>, vector<16x128xf32>
    %c0_7 = arith.constant 0 : index
    %c0_8 = arith.constant 0 : index
    %8 = vector.load %arg5[%c0_7, %c0_8] : memref<16x128xf32, #tpu.memory_space<vmem>>, vector<16x128xf32>
    %c0_9 = arith.constant 0 : index
    %c0_10 = arith.constant 0 : index
    %9 = vector.load %arg8[%c0_9, %c0_10] : memref<144x1xf32, #tpu.memory_space<vmem>>, vector<144x1xf32>
    %c0_11 = arith.constant 0 : index
    %c0_12 = arith.constant 0 : index
    %10 = vector.load %arg9[%c0_11, %c0_12] : memref<18x1xf32, #tpu.memory_space<vmem>>, vector<18x1xf32>
    %cst_13 = arith.constant 0.000000e+00 : f32
    %11 = vector.broadcast %cst_13 : f32 to vector<144x128xf32>
    %12 = vector.extract_strided_slice %7 {offsets = [0, 0], sizes = [1, 128], strides = [1, 1]} : vector<16x128xf32> to vector<1x128xf32>
    %13 = vector.extract_strided_slice %6 {offsets = [0, 0], sizes = [1, 128], strides = [1, 1]} : vector<32x128xf32> to vector<1x128xf32>
    %14 = arith.addf %12, %13 : vector<1x128xf32>
    %15 = vector.extract_strided_slice %8 {offsets = [0, 0], sizes = [1, 128], strides = [1, 1]} : vector<16x128xf32> to vector<1x128xf32>
    %16 = vector.extract_strided_slice %6 {offsets = [16, 0], sizes = [1, 128], strides = [1, 1]} : vector<32x128xf32> to vector<1x128xf32>
    %17 = arith.addf %15, %16 : vector<1x128xf32>
    %18 = math.floor %14 : vector<1x128xf32>
    %19 = math.floor %17 : vector<1x128xf32>
    %cst_14 = arith.constant 0.000000e+00 : f32
    %cst_15 = arith.constant 1.700000e+01 : f32
    %20 = vector.broadcast %cst_14 : f32 to vector<1x128xf32>
    %21 = arith.maximumf %20, %18 : vector<1x128xf32>
    %22 = vector.broadcast %cst_15 : f32 to vector<1x128xf32>
    %23 = arith.minimumf %22, %21 : vector<1x128xf32>
    %cst_16 = arith.constant 1.000000e+00 : f32
    %24 = vector.broadcast %cst_16 : f32 to vector<1x128xf32>
    %25 = arith.addf %18, %24 : vector<1x128xf32>
    %cst_17 = arith.constant 0.000000e+00 : f32
    %cst_18 = arith.constant 1.700000e+01 : f32
    %26 = vector.broadcast %cst_17 : f32 to vector<1x128xf32>
    %27 = arith.maximumf %26, %25 : vector<1x128xf32>
    %28 = vector.broadcast %cst_18 : f32 to vector<1x128xf32>
    %29 = arith.minimumf %28, %27 : vector<1x128xf32>
    %cst_19 = arith.constant 0.000000e+00 : f32
    %cst_20 = arith.constant 1.700000e+01 : f32
    %30 = vector.broadcast %cst_19 : f32 to vector<1x128xf32>
    %31 = arith.maximumf %30, %19 : vector<1x128xf32>
    %32 = vector.broadcast %cst_20 : f32 to vector<1x128xf32>
    %33 = arith.minimumf %32, %31 : vector<1x128xf32>
    %cst_21 = arith.constant 1.000000e+00 : f32
    %34 = vector.broadcast %cst_21 : f32 to vector<1x128xf32>
    %35 = arith.addf %19, %34 : vector<1x128xf32>
    %cst_22 = arith.constant 0.000000e+00 : f32
    %cst_23 = arith.constant 1.700000e+01 : f32
    %36 = vector.broadcast %cst_22 : f32 to vector<1x128xf32>
    %37 = arith.maximumf %36, %35 : vector<1x128xf32>
    %38 = vector.broadcast %cst_23 : f32 to vector<1x128xf32>
    %39 = arith.minimumf %38, %37 : vector<1x128xf32>
    %cst_24 = arith.constant 0.000000e+00 : f32
    %cst_25 = arith.constant 1.700000e+01 : f32
    %40 = vector.broadcast %cst_24 : f32 to vector<1x128xf32>
    %41 = arith.maximumf %40, %14 : vector<1x128xf32>
    %42 = vector.broadcast %cst_25 : f32 to vector<1x128xf32>
    %43 = arith.minimumf %42, %41 : vector<1x128xf32>
    %cst_26 = arith.constant 0.000000e+00 : f32
    %cst_27 = arith.constant 1.700000e+01 : f32
    %44 = vector.broadcast %cst_26 : f32 to vector<1x128xf32>
    %45 = arith.maximumf %44, %17 : vector<1x128xf32>
    %46 = vector.broadcast %cst_27 : f32 to vector<1x128xf32>
    %47 = arith.minimumf %46, %45 : vector<1x128xf32>
    %48 = arith.subf %23, %43 : vector<1x128xf32>
    %cst_28 = arith.constant 1.000000e+00 : f32
    %49 = vector.broadcast %cst_28 : f32 to vector<1x128xf32>
    %50 = arith.addf %49, %48 : vector<1x128xf32>
    %51 = arith.subf %29, %43 : vector<1x128xf32>
    %cst_29 = arith.constant 1.000000e+00 : f32
    %52 = vector.broadcast %cst_29 : f32 to vector<1x128xf32>
    %53 = arith.subf %52, %51 : vector<1x128xf32>
    %54 = arith.subf %33, %47 : vector<1x128xf32>
    %cst_30 = arith.constant 1.000000e+00 : f32
    %55 = vector.broadcast %cst_30 : f32 to vector<1x128xf32>
    %56 = arith.addf %55, %54 : vector<1x128xf32>
    %57 = arith.subf %39, %47 : vector<1x128xf32>
    %cst_31 = arith.constant 1.000000e+00 : f32
    %58 = vector.broadcast %cst_31 : f32 to vector<1x128xf32>
    %59 = arith.subf %58, %57 : vector<1x128xf32>
    %60 = vector.broadcast %10 : vector<18x1xf32> to vector<18x128xf32>
    %61 = vector.broadcast %33 : vector<1x128xf32> to vector<18x128xf32>
    %62 = arith.cmpf oeq, %60, %61 : vector<18x128xf32>
    %cst_32 = arith.constant 0.000000e+00 : f32
    %63 = vector.shape_cast %56 : vector<1x128xf32> to vector<1x128xf32>
    %64 = vector.broadcast %63 : vector<1x128xf32> to vector<18x128xf32>
    %65 = vector.broadcast %cst_32 : f32 to vector<18x128xf32>
    %66 = arith.select %62, %64, %65 : vector<18x128xi1>, vector<18x128xf32>
    %67 = vector.broadcast %10 : vector<18x1xf32> to vector<18x128xf32>
    %68 = vector.broadcast %39 : vector<1x128xf32> to vector<18x128xf32>
    %69 = arith.cmpf oeq, %67, %68 : vector<18x128xf32>
    %cst_33 = arith.constant 0.000000e+00 : f32
    %70 = vector.shape_cast %59 : vector<1x128xf32> to vector<1x128xf32>
    %71 = vector.broadcast %70 : vector<1x128xf32> to vector<18x128xf32>
    %72 = vector.broadcast %cst_33 : f32 to vector<18x128xf32>
    %73 = arith.select %69, %71, %72 : vector<18x128xi1>, vector<18x128xf32>
    %74 = arith.addf %66, %73 : vector<18x128xf32>
    %c0_34 = arith.constant 0 : index
    %c0_35 = arith.constant 0 : index
    %75 = vector.load %arg12[%c0_34, %c0_35] : memref<1296x18xbf16, #tpu.memory_space<vmem>>, vector<144x18xbf16>
    %76 = arith.truncf %74 : vector<18x128xf32> to vector<18x128xbf16>
    %cst_36 = arith.constant dense<0.000000e+00> : vector<144x128xf32>
    %77 = tpu.matmul %75, %76, %cst_36 {dimension_numbers = #tpu.dot_dimension_numbers<[1], [0], [0], [1], [0, 0, 1, 1], [], []>} : vector<144x18xbf16>, vector<18x128xbf16>, vector<144x128xf32> -> vector<144x128xf32>
    %78 = vector.broadcast %9 : vector<144x1xf32> to vector<144x128xf32>
    %79 = vector.broadcast %23 : vector<1x128xf32> to vector<144x128xf32>
    %80 = arith.cmpf oeq, %78, %79 : vector<144x128xf32>
    %cst_37 = arith.constant 0.000000e+00 : f32
    %81 = vector.shape_cast %50 : vector<1x128xf32> to vector<1x128xf32>
    %82 = vector.broadcast %81 : vector<1x128xf32> to vector<144x128xf32>
    %83 = vector.broadcast %cst_37 : f32 to vector<144x128xf32>
    %84 = arith.select %80, %82, %83 : vector<144x128xi1>, vector<144x128xf32>
    %85 = vector.broadcast %9 : vector<144x1xf32> to vector<144x128xf32>
    %86 = vector.broadcast %29 : vector<1x128xf32> to vector<144x128xf32>
    %87 = arith.cmpf oeq, %85, %86 : vector<144x128xf32>
    %cst_38 = arith.constant 0.000000e+00 : f32
    %88 = vector.shape_cast %53 : vector<1x128xf32> to vector<1x128xf32>
    %89 = vector.broadcast %88 : vector<1x128xf32> to vector<144x128xf32>
    %90 = vector.broadcast %cst_38 : f32 to vector<144x128xf32>
    %91 = arith.select %87, %89, %90 : vector<144x128xi1>, vector<144x128xf32>
    %92 = arith.addf %84, %91 : vector<144x128xf32>
    %93 = arith.mulf %77, %92 : vector<144x128xf32>
    %94 = arith.addf %11, %93 : vector<144x128xf32>
    %95 = vector.extract_strided_slice %7 {offsets = [1, 0], sizes = [1, 128], strides = [1, 1]} : vector<16x128xf32> to vector<1x128xf32>
    %96 = vector.extract_strided_slice %6 {offsets = [1, 0], sizes = [1, 128], strides = [1, 1]} : vector<32x128xf32> to vector<1x128xf32>
    %97 = arith.addf %95, %96 : vector<1x128xf32>
    %98 = vector.extract_strided_slice %8 {offsets = [1, 0], sizes = [1, 128], strides = [1, 1]} : vector<16x128xf32> to vector<1x128xf32>
    %99 = vector.extract_strided_slice %6 {offsets = [17, 0], sizes = [1, 128], strides = [1, 1]} : vector<32x128xf32> to vector<1x128xf32>
    %100 = arith.addf %98, %99 : vector<1x128xf32>
    %101 = math.floor %97 : vector<1x128xf32>
    %102 = math.floor %100 : vector<1x128xf32>
    %cst_39 = arith.constant 0.000000e+00 : f32
    %cst_40 = arith.constant 1.700000e+01 : f32
    %103 = vector.broadcast %cst_39 : f32 to vector<1x128xf32>
    %104 = arith.maximumf %103, %101 : vector<1x128xf32>
    %105 = vector.broadcast %cst_40 : f32 to vector<1x128xf32>
    %106 = arith.minimumf %105, %104 : vector<1x128xf32>
    %cst_41 = arith.constant 1.000000e+00 : f32
    %107 = vector.broadcast %cst_41 : f32 to vector<1x128xf32>
    %108 = arith.addf %101, %107 : vector<1x128xf32>
    %cst_42 = arith.constant 0.000000e+00 : f32
    %cst_43 = arith.constant 1.700000e+01 : f32
    %109 = vector.broadcast %cst_42 : f32 to vector<1x128xf32>
    %110 = arith.maximumf %109, %108 : vector<1x128xf32>
    %111 = vector.broadcast %cst_43 : f32 to vector<1x128xf32>
    %112 = arith.minimumf %111, %110 : vector<1x128xf32>
    %cst_44 = arith.constant 0.000000e+00 : f32
    %cst_45 = arith.constant 1.700000e+01 : f32
    %113 = vector.broadcast %cst_44 : f32 to vector<1x128xf32>
    %114 = arith.maximumf %113, %102 : vector<1x128xf32>
    %115 = vector.broadcast %cst_45 : f32 to vector<1x128xf32>
    %116 = arith.minimumf %115, %114 : vector<1x128xf32>
    %cst_46 = arith.constant 1.000000e+00 : f32
    %117 = vector.broadcast %cst_46 : f32 to vector<1x128xf32>
    %118 = arith.addf %102, %117 : vector<1x128xf32>
    %cst_47 = arith.constant 0.000000e+00 : f32
    %cst_48 = arith.constant 1.700000e+01 : f32
    %119 = vector.broadcast %cst_47 : f32 to vector<1x128xf32>
    %120 = arith.maximumf %119, %118 : vector<1x128xf32>
    %121 = vector.broadcast %cst_48 : f32 to vector<1x128xf32>
    %122 = arith.minimumf %121, %120 : vector<1x128xf32>
    %cst_49 = arith.constant 0.000000e+00 : f32
    %cst_50 = arith.constant 1.700000e+01 : f32
    %123 = vector.broadcast %cst_49 : f32 to vector<1x128xf32>
    %124 = arith.maximumf %123, %97 : vector<1x128xf32>
    %125 = vector.broadcast %cst_50 : f32 to vector<1x128xf32>
    %126 = arith.minimumf %125, %124 : vector<1x128xf32>
    %cst_51 = arith.constant 0.000000e+00 : f32
    %cst_52 = arith.constant 1.700000e+01 : f32
    %127 = vector.broadcast %cst_51 : f32 to vector<1x128xf32>
    %128 = arith.maximumf %127, %100 : vector<1x128xf32>
    %129 = vector.broadcast %cst_52 : f32 to vector<1x128xf32>
    %130 = arith.minimumf %129, %128 : vector<1x128xf32>
    %131 = arith.subf %106, %126 : vector<1x128xf32>
    %cst_53 = arith.constant 1.000000e+00 : f32
    %132 = vector.broadcast %cst_53 : f32 to vector<1x128xf32>
    %133 = arith.addf %132, %131 : vector<1x128xf32>
    %134 = arith.subf %112, %126 : vector<1x128xf32>
    %cst_54 = arith.constant 1.000000e+00 : f32
    %135 = vector.broadcast %cst_54 : f32 to vector<1x128xf32>
    %136 = arith.subf %135, %134 : vector<1x128xf32>
    %137 = arith.subf %116, %130 : vector<1x128xf32>
    %cst_55 = arith.constant 1.000000e+00 : f32
    %138 = vector.broadcast %cst_55 : f32 to vector<1x128xf32>
    %139 = arith.addf %138, %137 : vector<1x128xf32>
    %140 = arith.subf %122, %130 : vector<1x128xf32>
    %cst_56 = arith.constant 1.000000e+00 : f32
    %141 = vector.broadcast %cst_56 : f32 to vector<1x128xf32>
    %142 = arith.subf %141, %140 : vector<1x128xf32>
    %143 = vector.broadcast %10 : vector<18x1xf32> to vector<18x128xf32>
    %144 = vector.broadcast %116 : vector<1x128xf32> to vector<18x128xf32>
    %145 = arith.cmpf oeq, %143, %144 : vector<18x128xf32>
    %cst_57 = arith.constant 0.000000e+00 : f32
    %146 = vector.shape_cast %139 : vector<1x128xf32> to vector<1x128xf32>
    %147 = vector.broadcast %146 : vector<1x128xf32> to vector<18x128xf32>
    %148 = vector.broadcast %cst_57 : f32 to vector<18x128xf32>
    %149 = arith.select %145, %147, %148 : vector<18x128xi1>, vector<18x128xf32>
    %150 = vector.broadcast %10 : vector<18x1xf32> to vector<18x128xf32>
    %151 = vector.broadcast %122 : vector<1x128xf32> to vector<18x128xf32>
    %152 = arith.cmpf oeq, %150, %151 : vector<18x128xf32>
    %cst_58 = arith.constant 0.000000e+00 : f32
    %153 = vector.shape_cast %142 : vector<1x128xf32> to vector<1x128xf32>
    %154 = vector.broadcast %153 : vector<1x128xf32> to vector<18x128xf32>
    %155 = vector.broadcast %cst_58 : f32 to vector<18x128xf32>
    %156 = arith.select %152, %154, %155 : vector<18x128xi1>, vector<18x128xf32>
    %157 = arith.addf %149, %156 : vector<18x128xf32>
    %c144 = arith.constant 144 : index
    %c0_59 = arith.constant 0 : index
    %158 = vector.load %arg12[%c144, %c0_59] : memref<1296x18xbf16, #tpu.memory_space<vmem>>, vector<144x18xbf16>
    %159 = arith.truncf %157 : vector<18x128xf32> to vector<18x128xbf16>
    %cst_60 = arith.constant dense<0.000000e+00> : vector<144x128xf32>
    %160 = tpu.matmul %158, %159, %cst_60 {dimension_numbers = #tpu.dot_dimension_numbers<[1], [0], [0], [1], [0, 0, 1, 1], [], []>} : vector<144x18xbf16>, vector<18x128xbf16>, vector<144x128xf32> -> vector<144x128xf32>
    %161 = vector.broadcast %9 : vector<144x1xf32> to vector<144x128xf32>
    %162 = vector.broadcast %106 : vector<1x128xf32> to vector<144x128xf32>
    %163 = arith.cmpf oeq, %161, %162 : vector<144x128xf32>
    %cst_61 = arith.constant 0.000000e+00 : f32
    %164 = vector.shape_cast %133 : vector<1x128xf32> to vector<1x128xf32>
    %165 = vector.broadcast %164 : vector<1x128xf32> to vector<144x128xf32>
    %166 = vector.broadcast %cst_61 : f32 to vector<144x128xf32>
    %167 = arith.select %163, %165, %166 : vector<144x128xi1>, vector<144x128xf32>
    %168 = vector.broadcast %9 : vector<144x1xf32> to vector<144x128xf32>
    %169 = vector.broadcast %112 : vector<1x128xf32> to vector<144x128xf32>
    %170 = arith.cmpf oeq, %168, %169 : vector<144x128xf32>
    %cst_62 = arith.constant 0.000000e+00 : f32
    %171 = vector.shape_cast %136 : vector<1x128xf32> to vector<1x128xf32>
    %172 = vector.broadcast %171 : vector<1x128xf32> to vector<144x128xf32>
    %173 = vector.broadcast %cst_62 : f32 to vector<144x128xf32>
    %174 = arith.select %170, %172, %173 : vector<144x128xi1>, vector<144x128xf32>
    %175 = arith.addf %167, %174 : vector<144x128xf32>
    %176 = arith.mulf %160, %175 : vector<144x128xf32>
    %177 = arith.addf %94, %176 : vector<144x128xf32>
    %178 = vector.extract_strided_slice %7 {offsets = [2, 0], sizes = [1, 128], strides = [1, 1]} : vector<16x128xf32> to vector<1x128xf32>
    %179 = vector.extract_strided_slice %6 {offsets = [2, 0], sizes = [1, 128], strides = [1, 1]} : vector<32x128xf32> to vector<1x128xf32>
    %180 = arith.addf %178, %179 : vector<1x128xf32>
    %181 = vector.extract_strided_slice %8 {offsets = [2, 0], sizes = [1, 128], strides = [1, 1]} : vector<16x128xf32> to vector<1x128xf32>
    %182 = vector.extract_strided_slice %6 {offsets = [18, 0], sizes = [1, 128], strides = [1, 1]} : vector<32x128xf32> to vector<1x128xf32>
    %183 = arith.addf %181, %182 : vector<1x128xf32>
    %184 = math.floor %180 : vector<1x128xf32>
    %185 = math.floor %183 : vector<1x128xf32>
    %cst_63 = arith.constant 0.000000e+00 : f32
    %cst_64 = arith.constant 1.700000e+01 : f32
    %186 = vector.broadcast %cst_63 : f32 to vector<1x128xf32>
    %187 = arith.maximumf %186, %184 : vector<1x128xf32>
    %188 = vector.broadcast %cst_64 : f32 to vector<1x128xf32>
    %189 = arith.minimumf %188, %187 : vector<1x128xf32>
    %cst_65 = arith.constant 1.000000e+00 : f32
    %190 = vector.broadcast %cst_65 : f32 to vector<1x128xf32>
    %191 = arith.addf %184, %190 : vector<1x128xf32>
    %cst_66 = arith.constant 0.000000e+00 : f32
    %cst_67 = arith.constant 1.700000e+01 : f32
    %192 = vector.broadcast %cst_66 : f32 to vector<1x128xf32>
    %193 = arith.maximumf %192, %191 : vector<1x128xf32>
    %194 = vector.broadcast %cst_67 : f32 to vector<1x128xf32>
    %195 = arith.minimumf %194, %193 : vector<1x128xf32>
    %cst_68 = arith.constant 0.000000e+00 : f32
    %cst_69 = arith.constant 1.700000e+01 : f32
    %196 = vector.broadcast %cst_68 : f32 to vector<1x128xf32>
    %197 = arith.maximumf %196, %185 : vector<1x128xf32>
    %198 = vector.broadcast %cst_69 : f32 to vector<1x128xf32>
    %199 = arith.minimumf %198, %197 : vector<1x128xf32>
    %cst_70 = arith.constant 1.000000e+00 : f32
    %200 = vector.broadcast %cst_70 : f32 to vector<1x128xf32>
    %201 = arith.addf %185, %200 : vector<1x128xf32>
    %cst_71 = arith.constant 0.000000e+00 : f32
    %cst_72 = arith.constant 1.700000e+01 : f32
    %202 = vector.broadcast %cst_71 : f32 to vector<1x128xf32>
    %203 = arith.maximumf %202, %201 : vector<1x128xf32>
    %204 = vector.broadcast %cst_72 : f32 to vector<1x128xf32>
    %205 = arith.minimumf %204, %203 : vector<1x128xf32>
    %cst_73 = arith.constant 0.000000e+00 : f32
    %cst_74 = arith.constant 1.700000e+01 : f32
    %206 = vector.broadcast %cst_73 : f32 to vector<1x128xf32>
    %207 = arith.maximumf %206, %180 : vector<1x128xf32>
    %208 = vector.broadcast %cst_74 : f32 to vector<1x128xf32>
    %209 = arith.minimumf %208, %207 : vector<1x128xf32>
    %cst_75 = arith.constant 0.000000e+00 : f32
    %cst_76 = arith.constant 1.700000e+01 : f32
    %210 = vector.broadcast %cst_75 : f32 to vector<1x128xf32>
    %211 = arith.maximumf %210, %183 : vector<1x128xf32>
    %212 = vector.broadcast %cst_76 : f32 to vector<1x128xf32>
    %213 = arith.minimumf %212, %211 : vector<1x128xf32>
    %214 = arith.subf %189, %209 : vector<1x128xf32>
    %cst_77 = arith.constant 1.000000e+00 : f32
    %215 = vector.broadcast %cst_77 : f32 to vector<1x128xf32>
    %216 = arith.addf %215, %214 : vector<1x128xf32>
    %217 = arith.subf %195, %209 : vector<1x128xf32>
    %cst_78 = arith.constant 1.000000e+00 : f32
    %218 = vector.broadcast %cst_78 : f32 to vector<1x128xf32>
    %219 = arith.subf %218, %217 : vector<1x128xf32>
    %220 = arith.subf %199, %213 : vector<1x128xf32>
    %cst_79 = arith.constant 1.000000e+00 : f32
    %221 = vector.broadcast %cst_79 : f32 to vector<1x128xf32>
    %222 = arith.addf %221, %220 : vector<1x128xf32>
    %223 = arith.subf %205, %213 : vector<1x128xf32>
    %cst_80 = arith.constant 1.000000e+00 : f32
    %224 = vector.broadcast %cst_80 : f32 to vector<1x128xf32>
    %225 = arith.subf %224, %223 : vector<1x128xf32>
    %226 = vector.broadcast %10 : vector<18x1xf32> to vector<18x128xf32>
    %227 = vector.broadcast %199 : vector<1x128xf32> to vector<18x128xf32>
    %228 = arith.cmpf oeq, %226, %227 : vector<18x128xf32>
    %cst_81 = arith.constant 0.000000e+00 : f32
    %229 = vector.shape_cast %222 : vector<1x128xf32> to vector<1x128xf32>
    %230 = vector.broadcast %229 : vector<1x128xf32> to vector<18x128xf32>
    %231 = vector.broadcast %cst_81 : f32 to vector<18x128xf32>
    %232 = arith.select %228, %230, %231 : vector<18x128xi1>, vector<18x128xf32>
    %233 = vector.broadcast %10 : vector<18x1xf32> to vector<18x128xf32>
    %234 = vector.broadcast %205 : vector<1x128xf32> to vector<18x128xf32>
    %235 = arith.cmpf oeq, %233, %234 : vector<18x128xf32>
    %cst_82 = arith.constant 0.000000e+00 : f32
    %236 = vector.shape_cast %225 : vector<1x128xf32> to vector<1x128xf32>
    %237 = vector.broadcast %236 : vector<1x128xf32> to vector<18x128xf32>
    %238 = vector.broadcast %cst_82 : f32 to vector<18x128xf32>
    %239 = arith.select %235, %237, %238 : vector<18x128xi1>, vector<18x128xf32>
    %240 = arith.addf %232, %239 : vector<18x128xf32>
    %c288 = arith.constant 288 : index
    %c0_83 = arith.constant 0 : index
    %241 = vector.load %arg12[%c288, %c0_83] : memref<1296x18xbf16, #tpu.memory_space<vmem>>, vector<144x18xbf16>
    %242 = arith.truncf %240 : vector<18x128xf32> to vector<18x128xbf16>
    %cst_84 = arith.constant dense<0.000000e+00> : vector<144x128xf32>
    %243 = tpu.matmul %241, %242, %cst_84 {dimension_numbers = #tpu.dot_dimension_numbers<[1], [0], [0], [1], [0, 0, 1, 1], [], []>} : vector<144x18xbf16>, vector<18x128xbf16>, vector<144x128xf32> -> vector<144x128xf32>
    %244 = vector.broadcast %9 : vector<144x1xf32> to vector<144x128xf32>
    %245 = vector.broadcast %189 : vector<1x128xf32> to vector<144x128xf32>
    %246 = arith.cmpf oeq, %244, %245 : vector<144x128xf32>
    %cst_85 = arith.constant 0.000000e+00 : f32
    %247 = vector.shape_cast %216 : vector<1x128xf32> to vector<1x128xf32>
    %248 = vector.broadcast %247 : vector<1x128xf32> to vector<144x128xf32>
    %249 = vector.broadcast %cst_85 : f32 to vector<144x128xf32>
    %250 = arith.select %246, %248, %249 : vector<144x128xi1>, vector<144x128xf32>
    %251 = vector.broadcast %9 : vector<144x1xf32> to vector<144x128xf32>
    %252 = vector.broadcast %195 : vector<1x128xf32> to vector<144x128xf32>
    %253 = arith.cmpf oeq, %251, %252 : vector<144x128xf32>
    %cst_86 = arith.constant 0.000000e+00 : f32
    %254 = vector.shape_cast %219 : vector<1x128xf32> to vector<1x128xf32>
    %255 = vector.broadcast %254 : vector<1x128xf32> to vector<144x128xf32>
    %256 = vector.broadcast %cst_86 : f32 to vector<144x128xf32>
    %257 = arith.select %253, %255, %256 : vector<144x128xi1>, vector<144x128xf32>
    %258 = arith.addf %250, %257 : vector<144x128xf32>
    %259 = arith.mulf %243, %258 : vector<144x128xf32>
    %260 = arith.addf %177, %259 : vector<144x128xf32>
    %261 = vector.extract_strided_slice %7 {offsets = [3, 0], sizes = [1, 128], strides = [1, 1]} : vector<16x128xf32> to vector<1x128xf32>
    %262 = vector.extract_strided_slice %6 {offsets = [3, 0], sizes = [1, 128], strides = [1, 1]} : vector<32x128xf32> to vector<1x128xf32>
    %263 = arith.addf %261, %262 : vector<1x128xf32>
    %264 = vector.extract_strided_slice %8 {offsets = [3, 0], sizes = [1, 128], strides = [1, 1]} : vector<16x128xf32> to vector<1x128xf32>
    %265 = vector.extract_strided_slice %6 {offsets = [19, 0], sizes = [1, 128], strides = [1, 1]} : vector<32x128xf32> to vector<1x128xf32>
    %266 = arith.addf %264, %265 : vector<1x128xf32>
    %267 = math.floor %263 : vector<1x128xf32>
    %268 = math.floor %266 : vector<1x128xf32>
    %cst_87 = arith.constant 0.000000e+00 : f32
    %cst_88 = arith.constant 1.700000e+01 : f32
    %269 = vector.broadcast %cst_87 : f32 to vector<1x128xf32>
    %270 = arith.maximumf %269, %267 : vector<1x128xf32>
    %271 = vector.broadcast %cst_88 : f32 to vector<1x128xf32>
    %272 = arith.minimumf %271, %270 : vector<1x128xf32>
    %cst_89 = arith.constant 1.000000e+00 : f32
    %273 = vector.broadcast %cst_89 : f32 to vector<1x128xf32>
    %274 = arith.addf %267, %273 : vector<1x128xf32>
    %cst_90 = arith.constant 0.000000e+00 : f32
    %cst_91 = arith.constant 1.700000e+01 : f32
    %275 = vector.broadcast %cst_90 : f32 to vector<1x128xf32>
    %276 = arith.maximumf %275, %274 : vector<1x128xf32>
    %277 = vector.broadcast %cst_91 : f32 to vector<1x128xf32>
    %278 = arith.minimumf %277, %276 : vector<1x128xf32>
    %cst_92 = arith.constant 0.000000e+00 : f32
    %cst_93 = arith.constant 1.700000e+01 : f32
    %279 = vector.broadcast %cst_92 : f32 to vector<1x128xf32>
    %280 = arith.maximumf %279, %268 : vector<1x128xf32>
    %281 = vector.broadcast %cst_93 : f32 to vector<1x128xf32>
    %282 = arith.minimumf %281, %280 : vector<1x128xf32>
    %cst_94 = arith.constant 1.000000e+00 : f32
    %283 = vector.broadcast %cst_94 : f32 to vector<1x128xf32>
    %284 = arith.addf %268, %283 : vector<1x128xf32>
    %cst_95 = arith.constant 0.000000e+00 : f32
    %cst_96 = arith.constant 1.700000e+01 : f32
    %285 = vector.broadcast %cst_95 : f32 to vector<1x128xf32>
    %286 = arith.maximumf %285, %284 : vector<1x128xf32>
    %287 = vector.broadcast %cst_96 : f32 to vector<1x128xf32>
    %288 = arith.minimumf %287, %286 : vector<1x128xf32>
    %cst_97 = arith.constant 0.000000e+00 : f32
    %cst_98 = arith.constant 1.700000e+01 : f32
    %289 = vector.broadcast %cst_97 : f32 to vector<1x128xf32>
    %290 = arith.maximumf %289, %263 : vector<1x128xf32>
    %291 = vector.broadcast %cst_98 : f32 to vector<1x128xf32>
    %292 = arith.minimumf %291, %290 : vector<1x128xf32>
    %cst_99 = arith.constant 0.000000e+00 : f32
    %cst_100 = arith.constant 1.700000e+01 : f32
    %293 = vector.broadcast %cst_99 : f32 to vector<1x128xf32>
    %294 = arith.maximumf %293, %266 : vector<1x128xf32>
    %295 = vector.broadcast %cst_100 : f32 to vector<1x128xf32>
    %296 = arith.minimumf %295, %294 : vector<1x128xf32>
    %297 = arith.subf %272, %292 : vector<1x128xf32>
    %cst_101 = arith.constant 1.000000e+00 : f32
    %298 = vector.broadcast %cst_101 : f32 to vector<1x128xf32>
    %299 = arith.addf %298, %297 : vector<1x128xf32>
    %300 = arith.subf %278, %292 : vector<1x128xf32>
    %cst_102 = arith.constant 1.000000e+00 : f32
    %301 = vector.broadcast %cst_102 : f32 to vector<1x128xf32>
    %302 = arith.subf %301, %300 : vector<1x128xf32>
    %303 = arith.subf %282, %296 : vector<1x128xf32>
    %cst_103 = arith.constant 1.000000e+00 : f32
    %304 = vector.broadcast %cst_103 : f32 to vector<1x128xf32>
    %305 = arith.addf %304, %303 : vector<1x128xf32>
    %306 = arith.subf %288, %296 : vector<1x128xf32>
    %cst_104 = arith.constant 1.000000e+00 : f32
    %307 = vector.broadcast %cst_104 : f32 to vector<1x128xf32>
    %308 = arith.subf %307, %306 : vector<1x128xf32>
    %309 = vector.broadcast %10 : vector<18x1xf32> to vector<18x128xf32>
    %310 = vector.broadcast %282 : vector<1x128xf32> to vector<18x128xf32>
    %311 = arith.cmpf oeq, %309, %310 : vector<18x128xf32>
    %cst_105 = arith.constant 0.000000e+00 : f32
    %312 = vector.shape_cast %305 : vector<1x128xf32> to vector<1x128xf32>
    %313 = vector.broadcast %312 : vector<1x128xf32> to vector<18x128xf32>
    %314 = vector.broadcast %cst_105 : f32 to vector<18x128xf32>
    %315 = arith.select %311, %313, %314 : vector<18x128xi1>, vector<18x128xf32>
    %316 = vector.broadcast %10 : vector<18x1xf32> to vector<18x128xf32>
    %317 = vector.broadcast %288 : vector<1x128xf32> to vector<18x128xf32>
    %318 = arith.cmpf oeq, %316, %317 : vector<18x128xf32>
    %cst_106 = arith.constant 0.000000e+00 : f32
    %319 = vector.shape_cast %308 : vector<1x128xf32> to vector<1x128xf32>
    %320 = vector.broadcast %319 : vector<1x128xf32> to vector<18x128xf32>
    %321 = vector.broadcast %cst_106 : f32 to vector<18x128xf32>
    %322 = arith.select %318, %320, %321 : vector<18x128xi1>, vector<18x128xf32>
    %323 = arith.addf %315, %322 : vector<18x128xf32>
    %c432 = arith.constant 432 : index
    %c0_107 = arith.constant 0 : index
    %324 = vector.load %arg12[%c432, %c0_107] : memref<1296x18xbf16, #tpu.memory_space<vmem>>, vector<144x18xbf16>
    %325 = arith.truncf %323 : vector<18x128xf32> to vector<18x128xbf16>
    %cst_108 = arith.constant dense<0.000000e+00> : vector<144x128xf32>
    %326 = tpu.matmul %324, %325, %cst_108 {dimension_numbers = #tpu.dot_dimension_numbers<[1], [0], [0], [1], [0, 0, 1, 1], [], []>} : vector<144x18xbf16>, vector<18x128xbf16>, vector<144x128xf32> -> vector<144x128xf32>
    %327 = vector.broadcast %9 : vector<144x1xf32> to vector<144x128xf32>
    %328 = vector.broadcast %272 : vector<1x128xf32> to vector<144x128xf32>
    %329 = arith.cmpf oeq, %327, %328 : vector<144x128xf32>
    %cst_109 = arith.constant 0.000000e+00 : f32
    %330 = vector.shape_cast %299 : vector<1x128xf32> to vector<1x128xf32>
    %331 = vector.broadcast %330 : vector<1x128xf32> to vector<144x128xf32>
    %332 = vector.broadcast %cst_109 : f32 to vector<144x128xf32>
    %333 = arith.select %329, %331, %332 : vector<144x128xi1>, vector<144x128xf32>
    %334 = vector.broadcast %9 : vector<144x1xf32> to vector<144x128xf32>
    %335 = vector.broadcast %278 : vector<1x128xf32> to vector<144x128xf32>
    %336 = arith.cmpf oeq, %334, %335 : vector<144x128xf32>
    %cst_110 = arith.constant 0.000000e+00 : f32
    %337 = vector.shape_cast %302 : vector<1x128xf32> to vector<1x128xf32>
    %338 = vector.broadcast %337 : vector<1x128xf32> to vector<144x128xf32>
    %339 = vector.broadcast %cst_110 : f32 to vector<144x128xf32>
    %340 = arith.select %336, %338, %339 : vector<144x128xi1>, vector<144x128xf32>
    %341 = arith.addf %333, %340 : vector<144x128xf32>
    %342 = arith.mulf %326, %341 : vector<144x128xf32>
    %343 = arith.addf %260, %342 : vector<144x128xf32>
    %344 = vector.extract_strided_slice %7 {offsets = [4, 0], sizes = [1, 128], strides = [1, 1]} : vector<16x128xf32> to vector<1x128xf32>
    %345 = vector.extract_strided_slice %6 {offsets = [4, 0], sizes = [1, 128], strides = [1, 1]} : vector<32x128xf32> to vector<1x128xf32>
    %346 = arith.addf %344, %345 : vector<1x128xf32>
    %347 = vector.extract_strided_slice %8 {offsets = [4, 0], sizes = [1, 128], strides = [1, 1]} : vector<16x128xf32> to vector<1x128xf32>
    %348 = vector.extract_strided_slice %6 {offsets = [20, 0], sizes = [1, 128], strides = [1, 1]} : vector<32x128xf32> to vector<1x128xf32>
    %349 = arith.addf %347, %348 : vector<1x128xf32>
    %350 = math.floor %346 : vector<1x128xf32>
    %351 = math.floor %349 : vector<1x128xf32>
    %cst_111 = arith.constant 0.000000e+00 : f32
    %cst_112 = arith.constant 1.700000e+01 : f32
    %352 = vector.broadcast %cst_111 : f32 to vector<1x128xf32>
    %353 = arith.maximumf %352, %350 : vector<1x128xf32>
    %354 = vector.broadcast %cst_112 : f32 to vector<1x128xf32>
    %355 = arith.minimumf %354, %353 : vector<1x128xf32>
    %cst_113 = arith.constant 1.000000e+00 : f32
    %356 = vector.broadcast %cst_113 : f32 to vector<1x128xf32>
    %357 = arith.addf %350, %356 : vector<1x128xf32>
    %cst_114 = arith.constant 0.000000e+00 : f32
    %cst_115 = arith.constant 1.700000e+01 : f32
    %358 = vector.broadcast %cst_114 : f32 to vector<1x128xf32>
    %359 = arith.maximumf %358, %357 : vector<1x128xf32>
    %360 = vector.broadcast %cst_115 : f32 to vector<1x128xf32>
    %361 = arith.minimumf %360, %359 : vector<1x128xf32>
    %cst_116 = arith.constant 0.000000e+00 : f32
    %cst_117 = arith.constant 1.700000e+01 : f32
    %362 = vector.broadcast %cst_116 : f32 to vector<1x128xf32>
    %363 = arith.maximumf %362, %351 : vector<1x128xf32>
    %364 = vector.broadcast %cst_117 : f32 to vector<1x128xf32>
    %365 = arith.minimumf %364, %363 : vector<1x128xf32>
    %cst_118 = arith.constant 1.000000e+00 : f32
    %366 = vector.broadcast %cst_118 : f32 to vector<1x128xf32>
    %367 = arith.addf %351, %366 : vector<1x128xf32>
    %cst_119 = arith.constant 0.000000e+00 : f32
    %cst_120 = arith.constant 1.700000e+01 : f32
    %368 = vector.broadcast %cst_119 : f32 to vector<1x128xf32>
    %369 = arith.maximumf %368, %367 : vector<1x128xf32>
    %370 = vector.broadcast %cst_120 : f32 to vector<1x128xf32>
    %371 = arith.minimumf %370, %369 : vector<1x128xf32>
    %cst_121 = arith.constant 0.000000e+00 : f32
    %cst_122 = arith.constant 1.700000e+01 : f32
    %372 = vector.broadcast %cst_121 : f32 to vector<1x128xf32>
    %373 = arith.maximumf %372, %346 : vector<1x128xf32>
    %374 = vector.broadcast %cst_122 : f32 to vector<1x128xf32>
    %375 = arith.minimumf %374, %373 : vector<1x128xf32>
    %cst_123 = arith.constant 0.000000e+00 : f32
    %cst_124 = arith.constant 1.700000e+01 : f32
    %376 = vector.broadcast %cst_123 : f32 to vector<1x128xf32>
    %377 = arith.maximumf %376, %349 : vector<1x128xf32>
    %378 = vector.broadcast %cst_124 : f32 to vector<1x128xf32>
    %379 = arith.minimumf %378, %377 : vector<1x128xf32>
    %380 = arith.subf %355, %375 : vector<1x128xf32>
    %cst_125 = arith.constant 1.000000e+00 : f32
    %381 = vector.broadcast %cst_125 : f32 to vector<1x128xf32>
    %382 = arith.addf %381, %380 : vector<1x128xf32>
    %383 = arith.subf %361, %375 : vector<1x128xf32>
    %cst_126 = arith.constant 1.000000e+00 : f32
    %384 = vector.broadcast %cst_126 : f32 to vector<1x128xf32>
    %385 = arith.subf %384, %383 : vector<1x128xf32>
    %386 = arith.subf %365, %379 : vector<1x128xf32>
    %cst_127 = arith.constant 1.000000e+00 : f32
    %387 = vector.broadcast %cst_127 : f32 to vector<1x128xf32>
    %388 = arith.addf %387, %386 : vector<1x128xf32>
    %389 = arith.subf %371, %379 : vector<1x128xf32>
    %cst_128 = arith.constant 1.000000e+00 : f32
    %390 = vector.broadcast %cst_128 : f32 to vector<1x128xf32>
    %391 = arith.subf %390, %389 : vector<1x128xf32>
    %392 = vector.broadcast %10 : vector<18x1xf32> to vector<18x128xf32>
    %393 = vector.broadcast %365 : vector<1x128xf32> to vector<18x128xf32>
    %394 = arith.cmpf oeq, %392, %393 : vector<18x128xf32>
    %cst_129 = arith.constant 0.000000e+00 : f32
    %395 = vector.shape_cast %388 : vector<1x128xf32> to vector<1x128xf32>
    %396 = vector.broadcast %395 : vector<1x128xf32> to vector<18x128xf32>
    %397 = vector.broadcast %cst_129 : f32 to vector<18x128xf32>
    %398 = arith.select %394, %396, %397 : vector<18x128xi1>, vector<18x128xf32>
    %399 = vector.broadcast %10 : vector<18x1xf32> to vector<18x128xf32>
    %400 = vector.broadcast %371 : vector<1x128xf32> to vector<18x128xf32>
    %401 = arith.cmpf oeq, %399, %400 : vector<18x128xf32>
    %cst_130 = arith.constant 0.000000e+00 : f32
    %402 = vector.shape_cast %391 : vector<1x128xf32> to vector<1x128xf32>
    %403 = vector.broadcast %402 : vector<1x128xf32> to vector<18x128xf32>
    %404 = vector.broadcast %cst_130 : f32 to vector<18x128xf32>
    %405 = arith.select %401, %403, %404 : vector<18x128xi1>, vector<18x128xf32>
    %406 = arith.addf %398, %405 : vector<18x128xf32>
    %c576 = arith.constant 576 : index
    %c0_131 = arith.constant 0 : index
    %407 = vector.load %arg12[%c576, %c0_131] : memref<1296x18xbf16, #tpu.memory_space<vmem>>, vector<144x18xbf16>
    %408 = arith.truncf %406 : vector<18x128xf32> to vector<18x128xbf16>
    %cst_132 = arith.constant dense<0.000000e+00> : vector<144x128xf32>
    %409 = tpu.matmul %407, %408, %cst_132 {dimension_numbers = #tpu.dot_dimension_numbers<[1], [0], [0], [1], [0, 0, 1, 1], [], []>} : vector<144x18xbf16>, vector<18x128xbf16>, vector<144x128xf32> -> vector<144x128xf32>
    %410 = vector.broadcast %9 : vector<144x1xf32> to vector<144x128xf32>
    %411 = vector.broadcast %355 : vector<1x128xf32> to vector<144x128xf32>
    %412 = arith.cmpf oeq, %410, %411 : vector<144x128xf32>
    %cst_133 = arith.constant 0.000000e+00 : f32
    %413 = vector.shape_cast %382 : vector<1x128xf32> to vector<1x128xf32>
    %414 = vector.broadcast %413 : vector<1x128xf32> to vector<144x128xf32>
    %415 = vector.broadcast %cst_133 : f32 to vector<144x128xf32>
    %416 = arith.select %412, %414, %415 : vector<144x128xi1>, vector<144x128xf32>
    %417 = vector.broadcast %9 : vector<144x1xf32> to vector<144x128xf32>
    %418 = vector.broadcast %361 : vector<1x128xf32> to vector<144x128xf32>
    %419 = arith.cmpf oeq, %417, %418 : vector<144x128xf32>
    %cst_134 = arith.constant 0.000000e+00 : f32
    %420 = vector.shape_cast %385 : vector<1x128xf32> to vector<1x128xf32>
    %421 = vector.broadcast %420 : vector<1x128xf32> to vector<144x128xf32>
    %422 = vector.broadcast %cst_134 : f32 to vector<144x128xf32>
    %423 = arith.select %419, %421, %422 : vector<144x128xi1>, vector<144x128xf32>
    %424 = arith.addf %416, %423 : vector<144x128xf32>
    %425 = arith.mulf %409, %424 : vector<144x128xf32>
    %426 = arith.addf %343, %425 : vector<144x128xf32>
    %427 = vector.extract_strided_slice %7 {offsets = [5, 0], sizes = [1, 128], strides = [1, 1]} : vector<16x128xf32> to vector<1x128xf32>
    %428 = vector.extract_strided_slice %6 {offsets = [5, 0], sizes = [1, 128], strides = [1, 1]} : vector<32x128xf32> to vector<1x128xf32>
    %429 = arith.addf %427, %428 : vector<1x128xf32>
    %430 = vector.extract_strided_slice %8 {offsets = [5, 0], sizes = [1, 128], strides = [1, 1]} : vector<16x128xf32> to vector<1x128xf32>
    %431 = vector.extract_strided_slice %6 {offsets = [21, 0], sizes = [1, 128], strides = [1, 1]} : vector<32x128xf32> to vector<1x128xf32>
    %432 = arith.addf %430, %431 : vector<1x128xf32>
    %433 = math.floor %429 : vector<1x128xf32>
    %434 = math.floor %432 : vector<1x128xf32>
    %cst_135 = arith.constant 0.000000e+00 : f32
    %cst_136 = arith.constant 1.700000e+01 : f32
    %435 = vector.broadcast %cst_135 : f32 to vector<1x128xf32>
    %436 = arith.maximumf %435, %433 : vector<1x128xf32>
    %437 = vector.broadcast %cst_136 : f32 to vector<1x128xf32>
    %438 = arith.minimumf %437, %436 : vector<1x128xf32>
    %cst_137 = arith.constant 1.000000e+00 : f32
    %439 = vector.broadcast %cst_137 : f32 to vector<1x128xf32>
    %440 = arith.addf %433, %439 : vector<1x128xf32>
    %cst_138 = arith.constant 0.000000e+00 : f32
    %cst_139 = arith.constant 1.700000e+01 : f32
    %441 = vector.broadcast %cst_138 : f32 to vector<1x128xf32>
    %442 = arith.maximumf %441, %440 : vector<1x128xf32>
    %443 = vector.broadcast %cst_139 : f32 to vector<1x128xf32>
    %444 = arith.minimumf %443, %442 : vector<1x128xf32>
    %cst_140 = arith.constant 0.000000e+00 : f32
    %cst_141 = arith.constant 1.700000e+01 : f32
    %445 = vector.broadcast %cst_140 : f32 to vector<1x128xf32>
    %446 = arith.maximumf %445, %434 : vector<1x128xf32>
    %447 = vector.broadcast %cst_141 : f32 to vector<1x128xf32>
    %448 = arith.minimumf %447, %446 : vector<1x128xf32>
    %cst_142 = arith.constant 1.000000e+00 : f32
    %449 = vector.broadcast %cst_142 : f32 to vector<1x128xf32>
    %450 = arith.addf %434, %449 : vector<1x128xf32>
    %cst_143 = arith.constant 0.000000e+00 : f32
    %cst_144 = arith.constant 1.700000e+01 : f32
    %451 = vector.broadcast %cst_143 : f32 to vector<1x128xf32>
    %452 = arith.maximumf %451, %450 : vector<1x128xf32>
    %453 = vector.broadcast %cst_144 : f32 to vector<1x128xf32>
    %454 = arith.minimumf %453, %452 : vector<1x128xf32>
    %cst_145 = arith.constant 0.000000e+00 : f32
    %cst_146 = arith.constant 1.700000e+01 : f32
    %455 = vector.broadcast %cst_145 : f32 to vector<1x128xf32>
    %456 = arith.maximumf %455, %429 : vector<1x128xf32>
    %457 = vector.broadcast %cst_146 : f32 to vector<1x128xf32>
    %458 = arith.minimumf %457, %456 : vector<1x128xf32>
    %cst_147 = arith.constant 0.000000e+00 : f32
    %cst_148 = arith.constant 1.700000e+01 : f32
    %459 = vector.broadcast %cst_147 : f32 to vector<1x128xf32>
    %460 = arith.maximumf %459, %432 : vector<1x128xf32>
    %461 = vector.broadcast %cst_148 : f32 to vector<1x128xf32>
    %462 = arith.minimumf %461, %460 : vector<1x128xf32>
    %463 = arith.subf %438, %458 : vector<1x128xf32>
    %cst_149 = arith.constant 1.000000e+00 : f32
    %464 = vector.broadcast %cst_149 : f32 to vector<1x128xf32>
    %465 = arith.addf %464, %463 : vector<1x128xf32>
    %466 = arith.subf %444, %458 : vector<1x128xf32>
    %cst_150 = arith.constant 1.000000e+00 : f32
    %467 = vector.broadcast %cst_150 : f32 to vector<1x128xf32>
    %468 = arith.subf %467, %466 : vector<1x128xf32>
    %469 = arith.subf %448, %462 : vector<1x128xf32>
    %cst_151 = arith.constant 1.000000e+00 : f32
    %470 = vector.broadcast %cst_151 : f32 to vector<1x128xf32>
    %471 = arith.addf %470, %469 : vector<1x128xf32>
    %472 = arith.subf %454, %462 : vector<1x128xf32>
    %cst_152 = arith.constant 1.000000e+00 : f32
    %473 = vector.broadcast %cst_152 : f32 to vector<1x128xf32>
    %474 = arith.subf %473, %472 : vector<1x128xf32>
    %475 = vector.broadcast %10 : vector<18x1xf32> to vector<18x128xf32>
    %476 = vector.broadcast %448 : vector<1x128xf32> to vector<18x128xf32>
    %477 = arith.cmpf oeq, %475, %476 : vector<18x128xf32>
    %cst_153 = arith.constant 0.000000e+00 : f32
    %478 = vector.shape_cast %471 : vector<1x128xf32> to vector<1x128xf32>
    %479 = vector.broadcast %478 : vector<1x128xf32> to vector<18x128xf32>
    %480 = vector.broadcast %cst_153 : f32 to vector<18x128xf32>
    %481 = arith.select %477, %479, %480 : vector<18x128xi1>, vector<18x128xf32>
    %482 = vector.broadcast %10 : vector<18x1xf32> to vector<18x128xf32>
    %483 = vector.broadcast %454 : vector<1x128xf32> to vector<18x128xf32>
    %484 = arith.cmpf oeq, %482, %483 : vector<18x128xf32>
    %cst_154 = arith.constant 0.000000e+00 : f32
    %485 = vector.shape_cast %474 : vector<1x128xf32> to vector<1x128xf32>
    %486 = vector.broadcast %485 : vector<1x128xf32> to vector<18x128xf32>
    %487 = vector.broadcast %cst_154 : f32 to vector<18x128xf32>
    %488 = arith.select %484, %486, %487 : vector<18x128xi1>, vector<18x128xf32>
    %489 = arith.addf %481, %488 : vector<18x128xf32>
    %c720 = arith.constant 720 : index
    %c0_155 = arith.constant 0 : index
    %490 = vector.load %arg12[%c720, %c0_155] : memref<1296x18xbf16, #tpu.memory_space<vmem>>, vector<144x18xbf16>
    %491 = arith.truncf %489 : vector<18x128xf32> to vector<18x128xbf16>
    %cst_156 = arith.constant dense<0.000000e+00> : vector<144x128xf32>
    %492 = tpu.matmul %490, %491, %cst_156 {dimension_numbers = #tpu.dot_dimension_numbers<[1], [0], [0], [1], [0, 0, 1, 1], [], []>} : vector<144x18xbf16>, vector<18x128xbf16>, vector<144x128xf32> -> vector<144x128xf32>
    %493 = vector.broadcast %9 : vector<144x1xf32> to vector<144x128xf32>
    %494 = vector.broadcast %438 : vector<1x128xf32> to vector<144x128xf32>
    %495 = arith.cmpf oeq, %493, %494 : vector<144x128xf32>
    %cst_157 = arith.constant 0.000000e+00 : f32
    %496 = vector.shape_cast %465 : vector<1x128xf32> to vector<1x128xf32>
    %497 = vector.broadcast %496 : vector<1x128xf32> to vector<144x128xf32>
    %498 = vector.broadcast %cst_157 : f32 to vector<144x128xf32>
    %499 = arith.select %495, %497, %498 : vector<144x128xi1>, vector<144x128xf32>
    %500 = vector.broadcast %9 : vector<144x1xf32> to vector<144x128xf32>
    %501 = vector.broadcast %444 : vector<1x128xf32> to vector<144x128xf32>
    %502 = arith.cmpf oeq, %500, %501 : vector<144x128xf32>
    %cst_158 = arith.constant 0.000000e+00 : f32
    %503 = vector.shape_cast %468 : vector<1x128xf32> to vector<1x128xf32>
    %504 = vector.broadcast %503 : vector<1x128xf32> to vector<144x128xf32>
    %505 = vector.broadcast %cst_158 : f32 to vector<144x128xf32>
    %506 = arith.select %502, %504, %505 : vector<144x128xi1>, vector<144x128xf32>
    %507 = arith.addf %499, %506 : vector<144x128xf32>
    %508 = arith.mulf %492, %507 : vector<144x128xf32>
    %509 = arith.addf %426, %508 : vector<144x128xf32>
    %510 = vector.extract_strided_slice %7 {offsets = [6, 0], sizes = [1, 128], strides = [1, 1]} : vector<16x128xf32> to vector<1x128xf32>
    %511 = vector.extract_strided_slice %6 {offsets = [6, 0], sizes = [1, 128], strides = [1, 1]} : vector<32x128xf32> to vector<1x128xf32>
    %512 = arith.addf %510, %511 : vector<1x128xf32>
    %513 = vector.extract_strided_slice %8 {offsets = [6, 0], sizes = [1, 128], strides = [1, 1]} : vector<16x128xf32> to vector<1x128xf32>
    %514 = vector.extract_strided_slice %6 {offsets = [22, 0], sizes = [1, 128], strides = [1, 1]} : vector<32x128xf32> to vector<1x128xf32>
    %515 = arith.addf %513, %514 : vector<1x128xf32>
    %516 = math.floor %512 : vector<1x128xf32>
    %517 = math.floor %515 : vector<1x128xf32>
    %cst_159 = arith.constant 0.000000e+00 : f32
    %cst_160 = arith.constant 1.700000e+01 : f32
    %518 = vector.broadcast %cst_159 : f32 to vector<1x128xf32>
    %519 = arith.maximumf %518, %516 : vector<1x128xf32>
    %520 = vector.broadcast %cst_160 : f32 to vector<1x128xf32>
    %521 = arith.minimumf %520, %519 : vector<1x128xf32>
    %cst_161 = arith.constant 1.000000e+00 : f32
    %522 = vector.broadcast %cst_161 : f32 to vector<1x128xf32>
    %523 = arith.addf %516, %522 : vector<1x128xf32>
    %cst_162 = arith.constant 0.000000e+00 : f32
    %cst_163 = arith.constant 1.700000e+01 : f32
    %524 = vector.broadcast %cst_162 : f32 to vector<1x128xf32>
    %525 = arith.maximumf %524, %523 : vector<1x128xf32>
    %526 = vector.broadcast %cst_163 : f32 to vector<1x128xf32>
    %527 = arith.minimumf %526, %525 : vector<1x128xf32>
    %cst_164 = arith.constant 0.000000e+00 : f32
    %cst_165 = arith.constant 1.700000e+01 : f32
    %528 = vector.broadcast %cst_164 : f32 to vector<1x128xf32>
    %529 = arith.maximumf %528, %517 : vector<1x128xf32>
    %530 = vector.broadcast %cst_165 : f32 to vector<1x128xf32>
    %531 = arith.minimumf %530, %529 : vector<1x128xf32>
    %cst_166 = arith.constant 1.000000e+00 : f32
    %532 = vector.broadcast %cst_166 : f32 to vector<1x128xf32>
    %533 = arith.addf %517, %532 : vector<1x128xf32>
    %cst_167 = arith.constant 0.000000e+00 : f32
    %cst_168 = arith.constant 1.700000e+01 : f32
    %534 = vector.broadcast %cst_167 : f32 to vector<1x128xf32>
    %535 = arith.maximumf %534, %533 : vector<1x128xf32>
    %536 = vector.broadcast %cst_168 : f32 to vector<1x128xf32>
    %537 = arith.minimumf %536, %535 : vector<1x128xf32>
    %cst_169 = arith.constant 0.000000e+00 : f32
    %cst_170 = arith.constant 1.700000e+01 : f32
    %538 = vector.broadcast %cst_169 : f32 to vector<1x128xf32>
    %539 = arith.maximumf %538, %512 : vector<1x128xf32>
    %540 = vector.broadcast %cst_170 : f32 to vector<1x128xf32>
    %541 = arith.minimumf %540, %539 : vector<1x128xf32>
    %cst_171 = arith.constant 0.000000e+00 : f32
    %cst_172 = arith.constant 1.700000e+01 : f32
    %542 = vector.broadcast %cst_171 : f32 to vector<1x128xf32>
    %543 = arith.maximumf %542, %515 : vector<1x128xf32>
    %544 = vector.broadcast %cst_172 : f32 to vector<1x128xf32>
    %545 = arith.minimumf %544, %543 : vector<1x128xf32>
    %546 = arith.subf %521, %541 : vector<1x128xf32>
    %cst_173 = arith.constant 1.000000e+00 : f32
    %547 = vector.broadcast %cst_173 : f32 to vector<1x128xf32>
    %548 = arith.addf %547, %546 : vector<1x128xf32>
    %549 = arith.subf %527, %541 : vector<1x128xf32>
    %cst_174 = arith.constant 1.000000e+00 : f32
    %550 = vector.broadcast %cst_174 : f32 to vector<1x128xf32>
    %551 = arith.subf %550, %549 : vector<1x128xf32>
    %552 = arith.subf %531, %545 : vector<1x128xf32>
    %cst_175 = arith.constant 1.000000e+00 : f32
    %553 = vector.broadcast %cst_175 : f32 to vector<1x128xf32>
    %554 = arith.addf %553, %552 : vector<1x128xf32>
    %555 = arith.subf %537, %545 : vector<1x128xf32>
    %cst_176 = arith.constant 1.000000e+00 : f32
    %556 = vector.broadcast %cst_176 : f32 to vector<1x128xf32>
    %557 = arith.subf %556, %555 : vector<1x128xf32>
    %558 = vector.broadcast %10 : vector<18x1xf32> to vector<18x128xf32>
    %559 = vector.broadcast %531 : vector<1x128xf32> to vector<18x128xf32>
    %560 = arith.cmpf oeq, %558, %559 : vector<18x128xf32>
    %cst_177 = arith.constant 0.000000e+00 : f32
    %561 = vector.shape_cast %554 : vector<1x128xf32> to vector<1x128xf32>
    %562 = vector.broadcast %561 : vector<1x128xf32> to vector<18x128xf32>
    %563 = vector.broadcast %cst_177 : f32 to vector<18x128xf32>
    %564 = arith.select %560, %562, %563 : vector<18x128xi1>, vector<18x128xf32>
    %565 = vector.broadcast %10 : vector<18x1xf32> to vector<18x128xf32>
    %566 = vector.broadcast %537 : vector<1x128xf32> to vector<18x128xf32>
    %567 = arith.cmpf oeq, %565, %566 : vector<18x128xf32>
    %cst_178 = arith.constant 0.000000e+00 : f32
    %568 = vector.shape_cast %557 : vector<1x128xf32> to vector<1x128xf32>
    %569 = vector.broadcast %568 : vector<1x128xf32> to vector<18x128xf32>
    %570 = vector.broadcast %cst_178 : f32 to vector<18x128xf32>
    %571 = arith.select %567, %569, %570 : vector<18x128xi1>, vector<18x128xf32>
    %572 = arith.addf %564, %571 : vector<18x128xf32>
    %c864 = arith.constant 864 : index
    %c0_179 = arith.constant 0 : index
    %573 = vector.load %arg12[%c864, %c0_179] : memref<1296x18xbf16, #tpu.memory_space<vmem>>, vector<144x18xbf16>
    %574 = arith.truncf %572 : vector<18x128xf32> to vector<18x128xbf16>
    %cst_180 = arith.constant dense<0.000000e+00> : vector<144x128xf32>
    %575 = tpu.matmul %573, %574, %cst_180 {dimension_numbers = #tpu.dot_dimension_numbers<[1], [0], [0], [1], [0, 0, 1, 1], [], []>} : vector<144x18xbf16>, vector<18x128xbf16>, vector<144x128xf32> -> vector<144x128xf32>
    %576 = vector.broadcast %9 : vector<144x1xf32> to vector<144x128xf32>
    %577 = vector.broadcast %521 : vector<1x128xf32> to vector<144x128xf32>
    %578 = arith.cmpf oeq, %576, %577 : vector<144x128xf32>
    %cst_181 = arith.constant 0.000000e+00 : f32
    %579 = vector.shape_cast %548 : vector<1x128xf32> to vector<1x128xf32>
    %580 = vector.broadcast %579 : vector<1x128xf32> to vector<144x128xf32>
    %581 = vector.broadcast %cst_181 : f32 to vector<144x128xf32>
    %582 = arith.select %578, %580, %581 : vector<144x128xi1>, vector<144x128xf32>
    %583 = vector.broadcast %9 : vector<144x1xf32> to vector<144x128xf32>
    %584 = vector.broadcast %527 : vector<1x128xf32> to vector<144x128xf32>
    %585 = arith.cmpf oeq, %583, %584 : vector<144x128xf32>
    %cst_182 = arith.constant 0.000000e+00 : f32
    %586 = vector.shape_cast %551 : vector<1x128xf32> to vector<1x128xf32>
    %587 = vector.broadcast %586 : vector<1x128xf32> to vector<144x128xf32>
    %588 = vector.broadcast %cst_182 : f32 to vector<144x128xf32>
    %589 = arith.select %585, %587, %588 : vector<144x128xi1>, vector<144x128xf32>
    %590 = arith.addf %582, %589 : vector<144x128xf32>
    %591 = arith.mulf %575, %590 : vector<144x128xf32>
    %592 = arith.addf %509, %591 : vector<144x128xf32>
    %593 = vector.extract_strided_slice %7 {offsets = [7, 0], sizes = [1, 128], strides = [1, 1]} : vector<16x128xf32> to vector<1x128xf32>
    %594 = vector.extract_strided_slice %6 {offsets = [7, 0], sizes = [1, 128], strides = [1, 1]} : vector<32x128xf32> to vector<1x128xf32>
    %595 = arith.addf %593, %594 : vector<1x128xf32>
    %596 = vector.extract_strided_slice %8 {offsets = [7, 0], sizes = [1, 128], strides = [1, 1]} : vector<16x128xf32> to vector<1x128xf32>
    %597 = vector.extract_strided_slice %6 {offsets = [23, 0], sizes = [1, 128], strides = [1, 1]} : vector<32x128xf32> to vector<1x128xf32>
    %598 = arith.addf %596, %597 : vector<1x128xf32>
    %599 = math.floor %595 : vector<1x128xf32>
    %600 = math.floor %598 : vector<1x128xf32>
    %cst_183 = arith.constant 0.000000e+00 : f32
    %cst_184 = arith.constant 1.700000e+01 : f32
    %601 = vector.broadcast %cst_183 : f32 to vector<1x128xf32>
    %602 = arith.maximumf %601, %599 : vector<1x128xf32>
    %603 = vector.broadcast %cst_184 : f32 to vector<1x128xf32>
    %604 = arith.minimumf %603, %602 : vector<1x128xf32>
    %cst_185 = arith.constant 1.000000e+00 : f32
    %605 = vector.broadcast %cst_185 : f32 to vector<1x128xf32>
    %606 = arith.addf %599, %605 : vector<1x128xf32>
    %cst_186 = arith.constant 0.000000e+00 : f32
    %cst_187 = arith.constant 1.700000e+01 : f32
    %607 = vector.broadcast %cst_186 : f32 to vector<1x128xf32>
    %608 = arith.maximumf %607, %606 : vector<1x128xf32>
    %609 = vector.broadcast %cst_187 : f32 to vector<1x128xf32>
    %610 = arith.minimumf %609, %608 : vector<1x128xf32>
    %cst_188 = arith.constant 0.000000e+00 : f32
    %cst_189 = arith.constant 1.700000e+01 : f32
    %611 = vector.broadcast %cst_188 : f32 to vector<1x128xf32>
    %612 = arith.maximumf %611, %600 : vector<1x128xf32>
    %613 = vector.broadcast %cst_189 : f32 to vector<1x128xf32>
    %614 = arith.minimumf %613, %612 : vector<1x128xf32>
    %cst_190 = arith.constant 1.000000e+00 : f32
    %615 = vector.broadcast %cst_190 : f32 to vector<1x128xf32>
    %616 = arith.addf %600, %615 : vector<1x128xf32>
    %cst_191 = arith.constant 0.000000e+00 : f32
    %cst_192 = arith.constant 1.700000e+01 : f32
    %617 = vector.broadcast %cst_191 : f32 to vector<1x128xf32>
    %618 = arith.maximumf %617, %616 : vector<1x128xf32>
    %619 = vector.broadcast %cst_192 : f32 to vector<1x128xf32>
    %620 = arith.minimumf %619, %618 : vector<1x128xf32>
    %cst_193 = arith.constant 0.000000e+00 : f32
    %cst_194 = arith.constant 1.700000e+01 : f32
    %621 = vector.broadcast %cst_193 : f32 to vector<1x128xf32>
    %622 = arith.maximumf %621, %595 : vector<1x128xf32>
    %623 = vector.broadcast %cst_194 : f32 to vector<1x128xf32>
    %624 = arith.minimumf %623, %622 : vector<1x128xf32>
    %cst_195 = arith.constant 0.000000e+00 : f32
    %cst_196 = arith.constant 1.700000e+01 : f32
    %625 = vector.broadcast %cst_195 : f32 to vector<1x128xf32>
    %626 = arith.maximumf %625, %598 : vector<1x128xf32>
    %627 = vector.broadcast %cst_196 : f32 to vector<1x128xf32>
    %628 = arith.minimumf %627, %626 : vector<1x128xf32>
    %629 = arith.subf %604, %624 : vector<1x128xf32>
    %cst_197 = arith.constant 1.000000e+00 : f32
    %630 = vector.broadcast %cst_197 : f32 to vector<1x128xf32>
    %631 = arith.addf %630, %629 : vector<1x128xf32>
    %632 = arith.subf %610, %624 : vector<1x128xf32>
    %cst_198 = arith.constant 1.000000e+00 : f32
    %633 = vector.broadcast %cst_198 : f32 to vector<1x128xf32>
    %634 = arith.subf %633, %632 : vector<1x128xf32>
    %635 = arith.subf %614, %628 : vector<1x128xf32>
    %cst_199 = arith.constant 1.000000e+00 : f32
    %636 = vector.broadcast %cst_199 : f32 to vector<1x128xf32>
    %637 = arith.addf %636, %635 : vector<1x128xf32>
    %638 = arith.subf %620, %628 : vector<1x128xf32>
    %cst_200 = arith.constant 1.000000e+00 : f32
    %639 = vector.broadcast %cst_200 : f32 to vector<1x128xf32>
    %640 = arith.subf %639, %638 : vector<1x128xf32>
    %641 = vector.broadcast %10 : vector<18x1xf32> to vector<18x128xf32>
    %642 = vector.broadcast %614 : vector<1x128xf32> to vector<18x128xf32>
    %643 = arith.cmpf oeq, %641, %642 : vector<18x128xf32>
    %cst_201 = arith.constant 0.000000e+00 : f32
    %644 = vector.shape_cast %637 : vector<1x128xf32> to vector<1x128xf32>
    %645 = vector.broadcast %644 : vector<1x128xf32> to vector<18x128xf32>
    %646 = vector.broadcast %cst_201 : f32 to vector<18x128xf32>
    %647 = arith.select %643, %645, %646 : vector<18x128xi1>, vector<18x128xf32>
    %648 = vector.broadcast %10 : vector<18x1xf32> to vector<18x128xf32>
    %649 = vector.broadcast %620 : vector<1x128xf32> to vector<18x128xf32>
    %650 = arith.cmpf oeq, %648, %649 : vector<18x128xf32>
    %cst_202 = arith.constant 0.000000e+00 : f32
    %651 = vector.shape_cast %640 : vector<1x128xf32> to vector<1x128xf32>
    %652 = vector.broadcast %651 : vector<1x128xf32> to vector<18x128xf32>
    %653 = vector.broadcast %cst_202 : f32 to vector<18x128xf32>
    %654 = arith.select %650, %652, %653 : vector<18x128xi1>, vector<18x128xf32>
    %655 = arith.addf %647, %654 : vector<18x128xf32>
    %c1008 = arith.constant 1008 : index
    %c0_203 = arith.constant 0 : index
    %656 = vector.load %arg12[%c1008, %c0_203] : memref<1296x18xbf16, #tpu.memory_space<vmem>>, vector<144x18xbf16>
    %657 = arith.truncf %655 : vector<18x128xf32> to vector<18x128xbf16>
    %cst_204 = arith.constant dense<0.000000e+00> : vector<144x128xf32>
    %658 = tpu.matmul %656, %657, %cst_204 {dimension_numbers = #tpu.dot_dimension_numbers<[1], [0], [0], [1], [0, 0, 1, 1], [], []>} : vector<144x18xbf16>, vector<18x128xbf16>, vector<144x128xf32> -> vector<144x128xf32>
    %659 = vector.broadcast %9 : vector<144x1xf32> to vector<144x128xf32>
    %660 = vector.broadcast %604 : vector<1x128xf32> to vector<144x128xf32>
    %661 = arith.cmpf oeq, %659, %660 : vector<144x128xf32>
    %cst_205 = arith.constant 0.000000e+00 : f32
    %662 = vector.shape_cast %631 : vector<1x128xf32> to vector<1x128xf32>
    %663 = vector.broadcast %662 : vector<1x128xf32> to vector<144x128xf32>
    %664 = vector.broadcast %cst_205 : f32 to vector<144x128xf32>
    %665 = arith.select %661, %663, %664 : vector<144x128xi1>, vector<144x128xf32>
    %666 = vector.broadcast %9 : vector<144x1xf32> to vector<144x128xf32>
    %667 = vector.broadcast %610 : vector<1x128xf32> to vector<144x128xf32>
    %668 = arith.cmpf oeq, %666, %667 : vector<144x128xf32>
    %cst_206 = arith.constant 0.000000e+00 : f32
    %669 = vector.shape_cast %634 : vector<1x128xf32> to vector<1x128xf32>
    %670 = vector.broadcast %669 : vector<1x128xf32> to vector<144x128xf32>
    %671 = vector.broadcast %cst_206 : f32 to vector<144x128xf32>
    %672 = arith.select %668, %670, %671 : vector<144x128xi1>, vector<144x128xf32>
    %673 = arith.addf %665, %672 : vector<144x128xf32>
    %674 = arith.mulf %658, %673 : vector<144x128xf32>
    %675 = arith.addf %592, %674 : vector<144x128xf32>
    %676 = vector.extract_strided_slice %7 {offsets = [8, 0], sizes = [1, 128], strides = [1, 1]} : vector<16x128xf32> to vector<1x128xf32>
    %677 = vector.extract_strided_slice %6 {offsets = [8, 0], sizes = [1, 128], strides = [1, 1]} : vector<32x128xf32> to vector<1x128xf32>
    %678 = arith.addf %676, %677 : vector<1x128xf32>
    %679 = vector.extract_strided_slice %8 {offsets = [8, 0], sizes = [1, 128], strides = [1, 1]} : vector<16x128xf32> to vector<1x128xf32>
    %680 = vector.extract_strided_slice %6 {offsets = [24, 0], sizes = [1, 128], strides = [1, 1]} : vector<32x128xf32> to vector<1x128xf32>
    %681 = arith.addf %679, %680 : vector<1x128xf32>
    %682 = math.floor %678 : vector<1x128xf32>
    %683 = math.floor %681 : vector<1x128xf32>
    %cst_207 = arith.constant 0.000000e+00 : f32
    %cst_208 = arith.constant 1.700000e+01 : f32
    %684 = vector.broadcast %cst_207 : f32 to vector<1x128xf32>
    %685 = arith.maximumf %684, %682 : vector<1x128xf32>
    %686 = vector.broadcast %cst_208 : f32 to vector<1x128xf32>
    %687 = arith.minimumf %686, %685 : vector<1x128xf32>
    %cst_209 = arith.constant 1.000000e+00 : f32
    %688 = vector.broadcast %cst_209 : f32 to vector<1x128xf32>
    %689 = arith.addf %682, %688 : vector<1x128xf32>
    %cst_210 = arith.constant 0.000000e+00 : f32
    %cst_211 = arith.constant 1.700000e+01 : f32
    %690 = vector.broadcast %cst_210 : f32 to vector<1x128xf32>
    %691 = arith.maximumf %690, %689 : vector<1x128xf32>
    %692 = vector.broadcast %cst_211 : f32 to vector<1x128xf32>
    %693 = arith.minimumf %692, %691 : vector<1x128xf32>
    %cst_212 = arith.constant 0.000000e+00 : f32
    %cst_213 = arith.constant 1.700000e+01 : f32
    %694 = vector.broadcast %cst_212 : f32 to vector<1x128xf32>
    %695 = arith.maximumf %694, %683 : vector<1x128xf32>
    %696 = vector.broadcast %cst_213 : f32 to vector<1x128xf32>
    %697 = arith.minimumf %696, %695 : vector<1x128xf32>
    %cst_214 = arith.constant 1.000000e+00 : f32
    %698 = vector.broadcast %cst_214 : f32 to vector<1x128xf32>
    %699 = arith.addf %683, %698 : vector<1x128xf32>
    %cst_215 = arith.constant 0.000000e+00 : f32
    %cst_216 = arith.constant 1.700000e+01 : f32
    %700 = vector.broadcast %cst_215 : f32 to vector<1x128xf32>
    %701 = arith.maximumf %700, %699 : vector<1x128xf32>
    %702 = vector.broadcast %cst_216 : f32 to vector<1x128xf32>
    %703 = arith.minimumf %702, %701 : vector<1x128xf32>
    %cst_217 = arith.constant 0.000000e+00 : f32
    %cst_218 = arith.constant 1.700000e+01 : f32
    %704 = vector.broadcast %cst_217 : f32 to vector<1x128xf32>
    %705 = arith.maximumf %704, %678 : vector<1x128xf32>
    %706 = vector.broadcast %cst_218 : f32 to vector<1x128xf32>
    %707 = arith.minimumf %706, %705 : vector<1x128xf32>
    %cst_219 = arith.constant 0.000000e+00 : f32
    %cst_220 = arith.constant 1.700000e+01 : f32
    %708 = vector.broadcast %cst_219 : f32 to vector<1x128xf32>
    %709 = arith.maximumf %708, %681 : vector<1x128xf32>
    %710 = vector.broadcast %cst_220 : f32 to vector<1x128xf32>
    %711 = arith.minimumf %710, %709 : vector<1x128xf32>
    %712 = arith.subf %687, %707 : vector<1x128xf32>
    %cst_221 = arith.constant 1.000000e+00 : f32
    %713 = vector.broadcast %cst_221 : f32 to vector<1x128xf32>
    %714 = arith.addf %713, %712 : vector<1x128xf32>
    %715 = arith.subf %693, %707 : vector<1x128xf32>
    %cst_222 = arith.constant 1.000000e+00 : f32
    %716 = vector.broadcast %cst_222 : f32 to vector<1x128xf32>
    %717 = arith.subf %716, %715 : vector<1x128xf32>
    %718 = arith.subf %697, %711 : vector<1x128xf32>
    %cst_223 = arith.constant 1.000000e+00 : f32
    %719 = vector.broadcast %cst_223 : f32 to vector<1x128xf32>
    %720 = arith.addf %719, %718 : vector<1x128xf32>
    %721 = arith.subf %703, %711 : vector<1x128xf32>
    %cst_224 = arith.constant 1.000000e+00 : f32
    %722 = vector.broadcast %cst_224 : f32 to vector<1x128xf32>
    %723 = arith.subf %722, %721 : vector<1x128xf32>
    %724 = vector.broadcast %10 : vector<18x1xf32> to vector<18x128xf32>
    %725 = vector.broadcast %697 : vector<1x128xf32> to vector<18x128xf32>
    %726 = arith.cmpf oeq, %724, %725 : vector<18x128xf32>
    %cst_225 = arith.constant 0.000000e+00 : f32
    %727 = vector.shape_cast %720 : vector<1x128xf32> to vector<1x128xf32>
    %728 = vector.broadcast %727 : vector<1x128xf32> to vector<18x128xf32>
    %729 = vector.broadcast %cst_225 : f32 to vector<18x128xf32>
    %730 = arith.select %726, %728, %729 : vector<18x128xi1>, vector<18x128xf32>
    %731 = vector.broadcast %10 : vector<18x1xf32> to vector<18x128xf32>
    %732 = vector.broadcast %703 : vector<1x128xf32> to vector<18x128xf32>
    %733 = arith.cmpf oeq, %731, %732 : vector<18x128xf32>
    %cst_226 = arith.constant 0.000000e+00 : f32
    %734 = vector.shape_cast %723 : vector<1x128xf32> to vector<1x128xf32>
    %735 = vector.broadcast %734 : vector<1x128xf32> to vector<18x128xf32>
    %736 = vector.broadcast %cst_226 : f32 to vector<18x128xf32>
    %737 = arith.select %733, %735, %736 : vector<18x128xi1>, vector<18x128xf32>
    %738 = arith.addf %730, %737 : vector<18x128xf32>
    %c1152 = arith.constant 1152 : index
    %c0_227 = arith.constant 0 : index
    %739 = vector.load %arg12[%c1152, %c0_227] : memref<1296x18xbf16, #tpu.memory_space<vmem>>, vector<144x18xbf16>
    %740 = arith.truncf %738 : vector<18x128xf32> to vector<18x128xbf16>
    %cst_228 = arith.constant dense<0.000000e+00> : vector<144x128xf32>
    %741 = tpu.matmul %739, %740, %cst_228 {dimension_numbers = #tpu.dot_dimension_numbers<[1], [0], [0], [1], [0, 0, 1, 1], [], []>} : vector<144x18xbf16>, vector<18x128xbf16>, vector<144x128xf32> -> vector<144x128xf32>
    %742 = vector.broadcast %9 : vector<144x1xf32> to vector<144x128xf32>
    %743 = vector.broadcast %687 : vector<1x128xf32> to vector<144x128xf32>
    %744 = arith.cmpf oeq, %742, %743 : vector<144x128xf32>
    %cst_229 = arith.constant 0.000000e+00 : f32
    %745 = vector.shape_cast %714 : vector<1x128xf32> to vector<1x128xf32>
    %746 = vector.broadcast %745 : vector<1x128xf32> to vector<144x128xf32>
    %747 = vector.broadcast %cst_229 : f32 to vector<144x128xf32>
    %748 = arith.select %744, %746, %747 : vector<144x128xi1>, vector<144x128xf32>
    %749 = vector.broadcast %9 : vector<144x1xf32> to vector<144x128xf32>
    %750 = vector.broadcast %693 : vector<1x128xf32> to vector<144x128xf32>
    %751 = arith.cmpf oeq, %749, %750 : vector<144x128xf32>
    %cst_230 = arith.constant 0.000000e+00 : f32
    %752 = vector.shape_cast %717 : vector<1x128xf32> to vector<1x128xf32>
    %753 = vector.broadcast %752 : vector<1x128xf32> to vector<144x128xf32>
    %754 = vector.broadcast %cst_230 : f32 to vector<144x128xf32>
    %755 = arith.select %751, %753, %754 : vector<144x128xi1>, vector<144x128xf32>
    %756 = arith.addf %748, %755 : vector<144x128xf32>
    %757 = arith.mulf %741, %756 : vector<144x128xf32>
    %758 = arith.addf %675, %757 : vector<144x128xf32>
    %c0_231 = arith.constant 0 : index
    %c0_232 = arith.constant 0 : index
    %759 = vector.load %arg10[%c0_231, %c0_232] : memref<8x144xf32, #tpu.memory_space<vmem>>, vector<8x144xf32>
    %cst_233 = arith.constant dense<0.000000e+00> : vector<8x128xf32>
    %760 = tpu.matmul %759, %758, %cst_233 {dimension_numbers = #tpu.dot_dimension_numbers<[1], [0], [0], [1], [0, 0, 1, 1], [], []>} : vector<8x144xf32>, vector<144x128xf32>, vector<8x128xf32> -> vector<8x128xf32>
    %c0_234 = arith.constant 0 : index
    %c0_235 = arith.constant 0 : index
    %c0_236 = arith.constant 0 : index
    %761 = vector.load %arg11[%c0_234, %c0_235, %c0_236] : memref<1x8x128xf32, #tpu.memory_space<vmem>>, vector<1x8x128xf32>
    %762 = vector.shape_cast %761 : vector<1x8x128xf32> to vector<8x128xf32>
    %763 = vector.shape_cast %760 : vector<8x128xf32> to vector<1x8x128xf32>
    tpu.vector_store %arg11[%c0_234, %c0_235, %c0_236], %763 {strides = array<i32>} : memref<1x8x128xf32, #tpu.memory_space<vmem>>, vector<1x8x128xf32>,
    return
  }
  func.func @transform_0(%arg0: i32, %arg1: i32) -> (i32, i32, i32) {
    %c0_i32 = arith.constant 0 : i32
    %c0_i32_0 = arith.constant 0 : i32
    return %arg0, %c0_i32, %arg1 : i32, i32, i32
  }
  func.func @transform_1(%arg0: i32, %arg1: i32) -> (i32, i32, i32) {
    %c0_i32 = arith.constant 0 : i32
    %c0_i32_0 = arith.constant 0 : i32
    %c0_i32_1 = arith.constant 0 : i32
    return %arg0, %c0_i32, %c0_i32_0 : i32, i32, i32
  }
  func.func @transform_2(%arg0: i32, %arg1: i32) -> (i32, i32) {
    %c0_i32 = arith.constant 0 : i32
    %c0_i32_0 = arith.constant 0 : i32
    return %c0_i32, %arg1 : i32, i32
  }
  func.func @transform_3(%arg0: i32, %arg1: i32) -> (i32, i32) {
    %c0_i32 = arith.constant 0 : i32
    %c0_i32_0 = arith.constant 0 : i32
    return %c0_i32, %arg1 : i32, i32
  }
  func.func @transform_4(%arg0: i32, %arg1: i32) -> (i32, i32) {
    %c0_i32 = arith.constant 0 : i32
    %c0_i32_0 = arith.constant 0 : i32
    %c0_i32_1 = arith.constant 0 : i32
    return %c0_i32, %c0_i32_0 : i32, i32
  }
  func.func @transform_5(%arg0: i32, %arg1: i32) -> (i32, i32) {
    %c0_i32 = arith.constant 0 : i32
    %c0_i32_0 = arith.constant 0 : i32
    %c0_i32_1 = arith.constant 0 : i32
    return %c0_i32, %c0_i32_0 : i32, i32
  }
  func.func @transform_6(%arg0: i32, %arg1: i32) -> (i32, i32) {
    %c0_i32 = arith.constant 0 : i32
    %c0_i32_0 = arith.constant 0 : i32
    %c0_i32_1 = arith.constant 0 : i32
    return %c0_i32, %c0_i32_0 : i32, i32
  }
  func.func @transform_7(%arg0: i32, %arg1: i32) -> (i32, i32) {
    %c0_i32 = arith.constant 0 : i32
    %c0_i32_0 = arith.constant 0 : i32
    %c0_i32_1 = arith.constant 0 : i32
    return %c0_i32, %c0_i32_0 : i32, i32
  }
  func.func @transform_8(%arg0: i32, %arg1: i32) -> (i32, i32) {
    %c0_i32 = arith.constant 0 : i32
    %c0_i32_0 = arith.constant 0 : i32
    %c0_i32_1 = arith.constant 0 : i32
    return %c0_i32, %c0_i32_0 : i32, i32
  }
  func.func @transform_9(%arg0: i32, %arg1: i32) -> (i32, i32, i32) {
    %c0_i32 = arith.constant 0 : i32
    %c0_i32_0 = arith.constant 0 : i32
    return %arg0, %c0_i32, %arg1 : i32, i32, i32
  }
}

</mosaic_0001>

<bundles_post_ra>
// kernel: tpu_custom_call.1
= control target key start
LH: loop header
LB: loop body
LE: loop exit
PB: predicated region body
PF: predicated region fallthrough
CT: control target
= control target key end

     0   :  { %s9257_s0 = inlined_call_operand.vmem [shape: f32[4,36,256], index: 0, kind: input, shape index: {}]   ;;  %s9258_s1 = inlined_call_operand.vmem [shape: f32[4,72,18], index: 1, kind: input, shape index: {}]   ;;  %s9259_s2 = inlined_call_operand.vmem [shape: f32[16,256], index: 2, kind: input, shape index: {}]   ;;  %s9260_s3 = inlined_call_operand.vmem [shape: f32[16,256], index: 3, kind: input, shape index: {}]   ;;  %s9261_s4 = inlined_call_operand.vmem [shape: f32[32,36], index: 4, kind: input, shape index: {}]   ;;  %s9262_s5 = inlined_call_operand.vmem [shape: bf16[1296,72], index: 5, kind: input, shape index: {}]   ;;  %s9263_s6 = inlined_call_operand.vmem [shape: f32[144,1], index: 6, kind: input, shape index: {}]   ;;  %s9264_s7 = inlined_call_operand.vmem [shape: f32[18,1], index: 7, kind: input, shape index: {}]   ;;  %s9265_s8 = inlined_call_operand.vmem [shape: f32[8,144], index: 8, kind: input, shape index: {}]   ;;  %s9266_s9 = inlined_call_operand.hbm [shape: f32[4,8,256], index: 9, kind: output, shape index: {}]  }
   0x1   :  { %9310 = sst [smem:[#allocation59_spill]] %s9257_s0 }
   0x2   :  { %9311 = sst [smem:[#allocation60_spill]] %s9259_s2 }
   0x3   :  { %9312 = sst [smem:[#allocation61_spill]] %s9265_s8 }
   0x4   :  { %9313 = sst [smem:[#allocation62_spill]] %s9266_s9 }
   0x5   :  { %14 = vsyncpa [#allocation7], 0 }
   0x6   :  { %16 = vsyncpa [#allocation7 + $0x1], 0  ;;  %s6500_s30 = smov 0   ;;  %s6502_s10 = smov 0  }
   0x7   :  { %s6504_s11 = smov 0   ;;  %s6506_s12 = smov 0  }
   0x8   :  { %s6508_s13 = smov 0   ;;  %s6510_s14 = smov 0  }
   0x9   :  { %s6512_s15 = smov 0   ;;  %s6514_s16 = smov 0  }
   0xa   :  { %s6516_s17 = smov 0   ;;  %s6518_s18 = smov 0  }
   0xb LB: > { %9314 = sst [smem:[#allocation9_spill]] %s6443_s17  ;;  %s5225_s19 = sadd.s32 4294967295, %s6447_s18   ;;  %s6447_s18 = sphi %s6518_s18, %s22_s18   ;;  %s6443_s17 = sphi %s6516_s17, %s9492_s17   ;;  %s6439_s16 = sphi %s6514_s16, %s9499_s16   ;;  %s6435_s15 = sphi %s6512_s15, %s9490_s15   ;;  %s6431_s14 = sphi %s6510_s14, %s9498_s14   ;;  %s6427_s13 = sphi %s6508_s13, %s9497_s13   ;;  %s6423_s12 = sphi %s6506_s12, %s9496_s12   ;;  %s6419_s11 = sphi %s6504_s11, %s9495_s11   ;;  %s6415_s10 = sphi %s6502_s10, %s9494_s10   ;;  %s6411_s30 = sphi %s6500_s30, %s9493_s30  }
   0xc   : > { %s5226_s20 = sadd.s32 4294967294, %s6447_s18   ;;  %s31_s21 = sadd.s32 1, %s6439_s16 }
   0xd   : > { %s34_s22 = sadd.s32 1, %s6443_s17  ;;  %p32_p0 = scmp.ge.s32.totalorder %s31_s21, 2 }
   0xe   : > { %s43_s23 = sadd.s32 1, %s6427_s13  ;;  %p50_p1 = scmp.ne.s32.totalorder %s6427_s13, %s6423_s12 }
   0xf   : > { %p51_p2 = scmp.eq.s32.totalorder %s6447_s18, 0  ;;  %s9501_s21 = smov (%p32_p0, %s31_s21), 0 }
  0x10   : > { %9315 = sst [smem:[#allocation10_spill]] %s9501_s21  ;;  %s9503_s22 = smov (!%p32_p0, %s34_s22), %s6443_s17 }
  0x11   : > { %s39_s24 = ssub.s32 %s6439_s16, %s9501_s21  ;;  %p6566_p3 = por %p51_p2, %p50_p1 }
  0x12   : > { %p36_p4 = scmp.ge.s32.totalorder %s9503_s22, 4  ;;  %p93_p5 = scmp.eq.s32.totalorder %s39_s24, 0 }
  0x13   : > { %s95_s26 = sadd.s32 1, %s6419_s11  ;;  %p102_p6 = scmp.ne.s32.totalorder %s6419_s11, %s6415_s10 }
  0x14   : > { %s9505_s22 = smov (%p36_p4, %s9503_s22), 0  ;;  %p265_p8 = scmp.eq.s32.totalorder %s5225_s19, 7 }
  0x15   : > { %9317 = sst [smem:[#allocation11_spill]] %s9505_s22  ;;  %s38_s28 = ssub.s32 %s6443_s17, %s9505_s22 }
  0x16   : > { %s6576_s27 = scalar_select %p93_p5, %s6419_s11, %s95_s26  }
  0x17   : > { %p6580_p7 = por %p102_p6, %p51_p2  ;;  %s40_s21 = sor.u32 %s39_s24, %s38_s28 }
  0x18   : > { %9318 = sst [smem:[#allocation12_spill]] %s6576_s27  ;;  %p41_p9 = scmp.eq.s32.totalorder %s40_s21, 0 }
  0x19   : > { %p270_p10 = scmp.ne.s32.totalorder %s6423_s12, %s6411_s30  ;;  %p6589_p11 = por %p265_p8, %p50_p1 }
  0x1a   : > { %p271_p12 = scmp.eq.s32.totalorder %s5226_s20, 7  ;;  %p5228_p0 = scmp.ge.s32.totalorder %s6447_s18, 8 }
  0x1b   : > { %s6594_s8 = scalar_select %p41_p9, %s6427_s13, %s43_s23  }
  0x1c   : > { %p6596_p13 = por %p271_p12, %p270_p10  ;;  %302 = sbr.rel (%p5228_p0) target bundleno = 65 (0x41), region = 36 }
  0x1d   : > { %9321 = sst [smem:[#allocation13_spill]] %s6594_s8 }
  0x21   : > { %305 = sbr.rel (!%p6566_p3) target bundleno = 47 (0x2f), region = 40  ;;  %s307_s19 = sand.u32 (%p6566_p3), 1, %s6427_s13  }
  0x22   : > { %s6243_s21 = smul.u32 (%p6566_p3), 10, %s6443_s17  ;;  %s9323_s0 = sld [smem:[#allocation59_spill]] (%p6566_p3) }
  0x23   : > { %s6242_s24 = smul.u32 (%p6566_p3), 40, %s307_s19 }
  0x24   : > { %s311_s28 = sadd.s32 (%p6566_p3), %s6439_s16, %s6243_s21 }
  0x25   : > { %s5229_s20 = sshll.u32 (%p6566_p3), %s311_s28, 3  ;;  %s309_s27 = scalar_lea.vmem (%p6566_p3), [#allocation3], %s6242_s24 }
  0x28   : > { %s313_s8 = scalar_lea.vmem %s9323_s0, %s5229_s20 }
  0x29   : > { %v350_v0 = vld [vmem:[%s313_s8] sm:$0xff]  ;;  %v352_v1 = vld [vmem:[%s313_s8 + $0x10] sm:$0xff] }
  0x2a   : > { %v354_v2 = vld [vmem:[%s313_s8 + $0x20] sm:$0xff]  ;;  %351 = vst [vmem:[%s309_s27] sm:$0xff] %v350_v0  ;;  %v356_v3 = vld [vmem:[%s313_s8 + $0x30] sm:$0xff] }
  0x2b   : > { %353 = vst [vmem:[%s309_s27 + $0x8] sm:$0xff] %v352_v1  ;;  %v358_v4 = vld [vmem:[%s313_s8 + $0x40] sm:$0xff] }
  0x2c   : > { %355 = vst [vmem:[%s309_s27 + $0x10] sm:$0xff] %v354_v2 }
  0x2d   : > { %357 = vst [vmem:[%s309_s27 + $0x18] sm:$0xff] %v356_v3 }
  0x2e   : > { %359 = vst [vmem:[%s309_s27 + $0x20] sm:$0xff] %v358_v4 }
  0x2f PF: > { %373 = sbr.rel (!%p6580_p7) target bundleno = 59 (0x3b), region = 82  ;;  %s375_s25 = sand.u32 (%p6580_p7), 1, %s6419_s11  }
  0x30   : > { %s5231_s22 = sshll.u32 (%p6580_p7), %s6439_s16, 3  ;;  %s5230_s19 = sshll.u32 (%p6580_p7), %s375_s25, 4 }
  0x31   : > { %s9324_s2 = sld [smem:[#allocation60_spill]] (%p6580_p7)  ;;  %s377_s20 = scalar_lea.vmem (%p6580_p7), [#allocation4], %s5230_s19 }
  0x37   : > { %s379_s24 = scalar_lea.vmem %s9324_s2, %s5231_s22 }
  0x38   : > { %v410_v5 = vld [vmem:[%s379_s24] sm:$0xff]  ;;  %v412_v6 = vld [vmem:[%s379_s24 + $0x10] sm:$0xff] }
  0x39   : > { %411 = vst [vmem:[%s377_s20] sm:$0xff] %v410_v5 }
  0x3a   : > { %413 = vst [vmem:[%s377_s20 + $0x8] sm:$0xff] %v412_v6 }
  0x3b PF: > { %419 = sbr.rel (!%p6580_p7) target bundleno = 65 (0x41), region = 120  ;;  %s421_s8 = sand.u32 (%p6580_p7), 1, %s6419_s11  }
  0x3c   : > { %s5233_s27 = sshll.u32 (%p6580_p7), %s6439_s16, 3  ;;  %s5232_s23 = sshll.u32 (%p6580_p7), %s421_s8, 4 }
  0x3d   : > { %s425_s17 = scalar_lea.vmem (%p6580_p7), %s9260_s3, %s5233_s27  ;;  %s423_s22 = scalar_lea.vmem (%p6580_p7), [#allocation5], %s5232_s23 }
  0x3e   : > { %v456_v7 = vld [vmem:[%s425_s17] sm:$0xff] (%p6580_p7)  ;;  %v458_v8 = vld [vmem:[%s425_s17 + $0x10] sm:$0xff] (%p6580_p7) }
  0x3f   : > { %457 = vst [vmem:[%s423_s22] sm:$0xff] (%p6580_p7), %v456_v7 }
  0x40   : > { %459 = vst [vmem:[%s423_s22 + $0x8] sm:$0xff] %v458_v8 }
  0x41 PF: > { %p5234_p1 = scmp.ge.s32.totalorder %s6447_s18, 1  ;;  %p464_p2 = scmp.lt.s32.totalorder %s6447_s18, 9 }
  0x43   : > { %p465_p3 = pnand %p5234_p1, %p464_p2 }
  0x45   : > { %468 = sbr.rel (%p465_p3) target bundleno = 1384 (0x568), region = 158 }
  0x4a   : > { %s6626_s29 = sand.u32 1, %s6423_s12   ;;  %s478_s0 = sand.u32 1, %s6415_s10  }
  0x4b   : > { %s6244_s17 = smul.u32 40, %s6626_s29  ;;  %s6630_s19 = sshll.u32 %s478_s0, 4 }
  0x4c   : > { %s5237_s21 = sshll.u32 %s6626_s29, 3  ;;  %p533_p4 = scmp.lt.s32.totalorder %s6435_s15, 3 }
  0x4d   : > { %s6640_s23 = scalar_lea.vmem [#allocation3], %s6244_s17  ;;  %s480_s25 = scalar_lea.vmem [#allocation4], %s6630_s19 }
  0x4e   : > { %s534_s28 = scalar_select %p533_p4, %s6435_s15, 3 }
  0x4f   : > { %s487_s22 = scalar_lea.vmem [#allocation5], %s6630_s19  ;;  %s6644_s2 = scalar_lea.vmem [#allocation6], %s5237_s21 }
  0x50   : > { %s6245_s24 = smul.u32 72, %s534_s28  ;;  %p5239_p5 = scmp.ne.s32.totalorder %s6431_s14, 0 }
  0x52   : > { %s6638_s27 = scalar_lea.vmem %s9258_s1, %s6245_s24  ;;  %542 = sbr.rel (%p5239_p5) target bundleno = 573 (0x23d), region = 174 }
  0x57   : > { %v551_v9 = vld [vmem:[%s6638_s27 + $0x40] sm:$0xff]  ;;  %vm1368_vm0 = vcmask 1043456   ;;  %v549_v11 = vld [vmem:[%s6638_s27 + $0x30] sm:$0xff]  ;;  %v550_v12 = vld [vmem:[%s6638_s27 + $0x38] sm:$0xff]  ;;  %vm1124_vm1 = vcmask 588800   ;;  %vm1948_vm2 = vcmask 142336  }
  0x58   : > { %v556_v10 = vpack.c.bf16 %v551_v9, %v551_v9  ;;  %v555_v14 = vpack.c.bf16 %v550_v12, %v549_v11  ;;  %v547_v15 = vld [vmem:[%s6638_s27 + $0x20] sm:$0xff]  ;;  %v548_v16 = vld [vmem:[%s6638_s27 + $0x28] sm:$0xff]  ;;  %v545_v18 = vld [vmem:[%s6638_s27 + $0x10] sm:$0xff] }
  0x59   : > { %v554_v17 = vpack.c.bf16 %v548_v16, %v547_v15  ;;  %v546_v19 = vld [vmem:[%s6638_s27 + $0x18] sm:$0xff]  ;;  %v543_v21 = vld [vmem:[%s6638_s27] sm:$0xff]  ;;  %v544_v22 = vld [vmem:[%s6638_s27 + $0x8] sm:$0xff] }
  0x5a   : > { %v1370_v13 = vsel %vm1368_vm0, %v556_v10, 0  ;;  %v553_v20 = vpack.c.bf16 %v546_v19, %v545_v18  ;;  %v552_v23 = vpack.c.bf16 %v544_v22, %v543_v21  ;;  %v6101_v24 = vld [vmem:[%s9262_s5 + $0x140] sm:$0xff]  ;;  %v6122_v25 = vld [vmem:[%s9262_s5 + $0x1e8] sm:$0xff]  ;;  %v6123_v29 = vld [vmem:[%s9262_s5 + $0x1f0] sm:$0xff] }
  0x5b   : > { %6224 = vmatpush.bf16.msra.mxu2 %v1370_v13  ;;  %6225 = vmatpush.bf16.msra.mxu3 %v1370_v13  ;;  %v6061_v26 = vld [vmem:[%s9262_s5] sm:$0xff]  ;;  %v6102_v28 = vld [vmem:[%s9262_s5 + $0x148] sm:$0xff]  ;;  %v6103_v32 = vld [vmem:[%s9262_s5 + $0x150] sm:$0xff] }
  0x5c   : > { %1375 = vmatpush.bf16.msra.mxu0 %v1370_v13  ;;  %6223 = vmatpush.bf16.msra.mxu1 %v1370_v13  ;;  %v6081_v27 = vld [vmem:[%s9262_s5 + $0xa0] sm:$0xff]  ;;  %v6062_v30 = vld [vmem:[%s9262_s5 + $0x8] sm:$0xff]  ;;  %v6124_v33 = vld [vmem:[%s9262_s5 + $0x1f8] sm:$0xff] }
  0x5d   : > { %v6082_v31 = vld [vmem:[%s9262_s5 + $0xa8] sm:$0xff]  ;;  %v6063_v34 = vld [vmem:[%s9262_s5 + $0x10] sm:$0xff]  ;;  %v6104_v36 = vld [vmem:[%s9262_s5 + $0x158] sm:$0xff] }
  0x5e   : > { %v6083_v35 = vld [vmem:[%s9262_s5 + $0xb0] sm:$0xff]  ;;  %v6125_v37 = vld [vmem:[%s9262_s5 + $0x200] sm:$0xff]  ;;  %v6064_v38 = vld [vmem:[%s9262_s5 + $0x18] sm:$0xff] }
  0x5f   : > { %6227 = vmatpush.bf16.msra.mxu2 %v555_v14  ;;  %6228 = vmatpush.bf16.msra.mxu3 %v555_v14  ;;  %v6084_v39 = vld [vmem:[%s9262_s5 + $0xb8] sm:$0xff]  ;;  %v6105_v40 = vld [vmem:[%s9262_s5 + $0x160] sm:$0xff]  ;;  %v6126_v41 = vld [vmem:[%s9262_s5 + $0x208] sm:$0xff] }
  0x60   : > { %1376 = vmatpush.bf16.msra.mxu0 %v555_v14  ;;  %6226 = vmatpush.bf16.msra.mxu1 %v555_v14  ;;  %v6065_v42 = vld [vmem:[%s9262_s5 + $0x20] sm:$0xff]  ;;  %v6106_v44 = vld [vmem:[%s9262_s5 + $0x168] sm:$0xff]  ;;  %v6127_v45 = vld [vmem:[%s9262_s5 + $0x210] sm:$0xff] }
  0x61   : > { %v6085_v43 = vld [vmem:[%s9262_s5 + $0xc0] sm:$0xff]  ;;  %v6066_v46 = vld [vmem:[%s9262_s5 + $0x28] sm:$0xff]  ;;  %v6107_v48 = vld [vmem:[%s9262_s5 + $0x170] sm:$0xff] }
  0x62   : > { %v6086_v47 = vld [vmem:[%s9262_s5 + $0xc8] sm:$0xff]  ;;  %v6128_v49 = vld [vmem:[%s9262_s5 + $0x218] sm:$0xff]  ;;  %v6067_v50 = vld [vmem:[%s9262_s5 + $0x30] sm:$0xff] }
  0x63   : > { %6230 = vmatpush.bf16.msra.mxu2 %v554_v17  ;;  %6231 = vmatpush.bf16.msra.mxu3 %v554_v17  ;;  %v6087_v51 = vld [vmem:[%s9262_s5 + $0xd0] sm:$0xff]  ;;  %v6108_v52 = vld [vmem:[%s9262_s5 + $0x178] sm:$0xff]  ;;  %v6129_v53 = vld [vmem:[%s9262_s5 + $0x220] sm:$0xff] }
  0x64   : > { %1377 = vmatpush.bf16.msra.mxu0 %v554_v17  ;;  %6229 = vmatpush.bf16.msra.mxu1 %v554_v17  ;;  %v6068_v54 = vld [vmem:[%s9262_s5 + $0x38] sm:$0xff]  ;;  %v6109_v56 = vld [vmem:[%s9262_s5 + $0x180] sm:$0xff]  ;;  %v6130_v57 = vld [vmem:[%s9262_s5 + $0x228] sm:$0xff] }
  0x65   : > { %v6088_v55 = vld [vmem:[%s9262_s5 + $0xd8] sm:$0xff]  ;;  %v6069_v58 = vld [vmem:[%s9262_s5 + $0x40] sm:$0xff]  ;;  %v6110_v11 = vld [vmem:[%s9262_s5 + $0x188] sm:$0xff] }
  0x66   : > { %v6089_v59 = vld [vmem:[%s9262_s5 + $0xe0] sm:$0xff]  ;;  %v6131_v13 = vld [vmem:[%s9262_s5 + $0x230] sm:$0xff]  ;;  %v6070_v14 = vld [vmem:[%s9262_s5 + $0x48] sm:$0xff] }
  0x67   : > { %6233 = vmatpush.bf16.msra.mxu2 %v553_v20  ;;  %6234 = vmatpush.bf16.msra.mxu3 %v553_v20  ;;  %v6090_v15 = vld [vmem:[%s9262_s5 + $0xe8] sm:$0xff] }
  0x68   : > { %1378 = vmatpush.bf16.msra.mxu0 %v553_v20  ;;  %6232 = vmatpush.bf16.msra.mxu1 %v553_v20 }
  0x6b   : > { %6236 = vmatpush.bf16.msra.mxu2 %v552_v23  ;;  %6237 = vmatpush.bf16.msra.mxu3 %v552_v23 }
  0x6c   : > { %1379 = vmatpush.bf16.msra.mxu0 %v552_v23  ;;  %6235 = vmatpush.bf16.msra.mxu1 %v552_v23 }
  0x6e   : > { %5604 = vmatmul.msk.bf16.vlgmr.msra.gmra.mxu2 %vm1124_vm1, %v6101_v24  ;;  %5625 = vmatmul.msk.bf16.vlgmr.msra.gmra.mxu3 %vm1124_vm1, %v6122_v25 }
  0x6f   : > { %5564 = vmatmul.msk.bf16.vlgmr.msra.gmra.mxu0 %vm1124_vm1, %v6061_v26  ;;  %5584 = vmatmul.msk.bf16.vlgmr.msra.gmra.mxu1 %vm1124_vm1, %v6081_v27 }
  0x7e   : > { %5605 = vmatmul.msk.bf16.gmra.mxu2 %vm1124_vm1, %v6102_v28  ;;  %5626 = vmatmul.msk.bf16.gmra.mxu3 %vm1124_vm1, %v6123_v29 }
  0x7f   : > { %5565 = vmatmul.msk.bf16.gmra.mxu0 %vm1124_vm1, %v6062_v30  ;;  %5585 = vmatmul.msk.bf16.gmra.mxu1 %vm1124_vm1, %v6082_v31  ;;  %v6111_v31 = vld [vmem:[%s9262_s5 + $0x190] sm:$0xff] }
  0x8e   : > { %5606 = vmatmul.msk.bf16.gmra.mxu2 %vm1124_vm1, %v6103_v32  ;;  %5627 = vmatmul.msk.bf16.gmra.mxu3 %vm1124_vm1, %v6124_v33  ;;  %v6132_v33 = vld [vmem:[%s9262_s5 + $0x238] sm:$0xff] }
  0x8f   : > { %5566 = vmatmul.msk.bf16.gmra.mxu0 %vm1124_vm1, %v6063_v34  ;;  %5586 = vmatmul.msk.bf16.gmra.mxu1 %vm1124_vm1, %v6083_v35  ;;  %v6071_v34 = vld [vmem:[%s9262_s5 + $0x50] sm:$0xff] }
  0x90   : > { %v6091_v35 = vld [vmem:[%s9262_s5 + $0xf0] sm:$0xff] }
  0x9e   : > { %5607 = vmatmul.msk.bf16.gmra.mxu2 %vm1124_vm1, %v6104_v36  ;;  %5628 = vmatmul.msk.bf16.gmra.mxu3 %vm1124_vm1, %v6125_v37 }
  0x9f   : > { %5567 = vmatmul.msk.bf16.gmra.mxu0 %vm1124_vm1, %v6064_v38  ;;  %5587 = vmatmul.msk.bf16.gmra.mxu1 %vm1124_vm1, %v6084_v39 }
  0xae   : > { %5608 = vmatmul.msk.bf16.gmra.mxu2 %vm1124_vm1, %v6105_v40  ;;  %5629 = vmatmul.msk.bf16.gmra.mxu3 %vm1124_vm1, %v6126_v41 }
  0xaf   : > { %5568 = vmatmul.msk.bf16.gmra.mxu0 %vm1124_vm1, %v6065_v42  ;;  %5588 = vmatmul.msk.bf16.gmra.mxu1 %vm1124_vm1, %v6085_v43 }
  0xbe   : > { %5609 = vmatmul.msk.bf16.gmra.mxu2 %vm1124_vm1, %v6106_v44  ;;  %5630 = vmatmul.msk.bf16.gmra.mxu3 %vm1124_vm1, %v6127_v45 }
  0xbf   : > { %5569 = vmatmul.msk.bf16.gmra.mxu0 %vm1124_vm1, %v6066_v46  ;;  %5589 = vmatmul.msk.bf16.gmra.mxu1 %vm1124_vm1, %v6086_v47 }
  0xce   : > { %5610 = vmatmul.msk.bf16.gmra.mxu2 %vm1124_vm1, %v6107_v48  ;;  %5631 = vmatmul.msk.bf16.gmra.mxu3 %vm1124_vm1, %v6128_v49 }
  0xcf   : > { %5570 = vmatmul.msk.bf16.gmra.mxu0 %vm1124_vm1, %v6067_v50  ;;  %5590 = vmatmul.msk.bf16.gmra.mxu1 %vm1124_vm1, %v6087_v51  ;;  %v6112_v51 = vld [vmem:[%s9262_s5 + $0x198] sm:$0xff] }
  0xde   : > { %5611 = vmatmul.msk.bf16.gmra.mxu2 %vm1124_vm1, %v6108_v52  ;;  %5632 = vmatmul.msk.bf16.gmra.mxu3 %vm1124_vm1, %v6129_v53  ;;  %v6133_v53 = vld [vmem:[%s9262_s5 + $0x240] sm:$0xff] }
  0xdf   : > { %5571 = vmatmul.msk.bf16.gmra.mxu0 %vm1124_vm1, %v6068_v54  ;;  %5591 = vmatmul.msk.bf16.gmra.mxu1 %vm1124_vm1, %v6088_v55  ;;  %v6072_v54 = vld [vmem:[%s9262_s5 + $0x58] sm:$0xff] }
  0xe0   : > { %v6092_v55 = vld [vmem:[%s9262_s5 + $0xf8] sm:$0xff] }
  0xec   : > { %v1381_v60 = vpop.f32.mrf.mxu0  ;;  %v1481_v61 = vpop.f32.mrf.mxu1 }
  0xed   : > { %v1786_v62 = vpack.c.bf16 %v1381_v60, %v1381_v60  ;;  %v1826_v63 = vpack.c.bf16 %v1481_v61, %v1481_v61 }
  0xee   : > { %5612 = vmatmul.msk.bf16.gmra.mxu2 %vm1124_vm1, %v6109_v56  ;;  %5633 = vmatmul.msk.bf16.gmra.mxu3 %vm1124_vm1, %v6130_v57 }
  0xef   : > { %1949 = vst.msk [vmem:[#allocation2] sm:$0xf] %vm1948_vm2, %v1786_v62  ;;  %5572 = vmatmul.msk.bf16.gmra.mxu0 %vm1124_vm1, %v6069_v58  ;;  %5592 = vmatmul.msk.bf16.gmra.mxu1 %vm1124_vm1, %v6089_v59 }
  0xf0   : > { %1989 = vst.msk [vmem:[#allocation2 + $0xa0] sm:$0xf] %vm1948_vm2, %v1826_v63 }
  0xf1   : > { %v1581_v0 = vpop.f32.mrf.mxu2  ;;  %v1686_v1 = vpop.f32.mrf.mxu3 }
  0xf2   : > { %v1866_v2 = vpack.c.bf16 %v1581_v0, %v1581_v0  ;;  %v1908_v3 = vpack.c.bf16 %v1686_v1, %v1686_v1 }
  0xf4   : > { %2029 = vst.msk [vmem:[#allocation2 + $0x140] sm:$0xf] %vm1948_vm2, %v1866_v2  ;;  %v1383_v4 = vpop.f32.mrf.mxu0  ;;  %v1483_v5 = vpop.f32.mrf.mxu1 }
  0xf5   : > { %2071 = vst.msk [vmem:[#allocation2 + $0x1e8] sm:$0xf] %vm1948_vm2, %v1908_v3  ;;  %v1787_v6 = vpack.c.bf16 %v1383_v4, %v1383_v4  ;;  %v1827_v7 = vpack.c.bf16 %v1483_v5, %v1483_v5 }
  0xf7   : > { %1950 = vst.msk [vmem:[#allocation2 + $0x4] sm:$0xf] %vm1948_vm2, %v1787_v6 }
  0xf8   : > { %1990 = vst.msk [vmem:[#allocation2 + $0xa4] sm:$0xf] %vm1948_vm2, %v1827_v7  ;;  %v6113_v7 = vld [vmem:[%s9262_s5 + $0x1a0] sm:$0xff] }
  0xf9   : > { %v1583_v8 = vpop.f32.mrf.mxu2  ;;  %v1688_v9 = vpop.f32.mrf.mxu3 }
  0xfa   : > { %v1867_v10 = vpack.c.bf16 %v1583_v8, %v1583_v8  ;;  %v1909_v12 = vpack.c.bf16 %v1688_v9, %v1688_v9  ;;  %v6134_v9 = vld [vmem:[%s9262_s5 + $0x248] sm:$0xff] }
  0xfc   : > { %2030 = vst.msk [vmem:[#allocation2 + $0x144] sm:$0xf] %vm1948_vm2, %v1867_v10  ;;  %v1386_v16 = vpop.f32.mrf.mxu0  ;;  %v1486_v17 = vpop.f32.mrf.mxu1  ;;  %v6073_v10 = vld [vmem:[%s9262_s5 + $0x60] sm:$0xff] }
  0xfd   : > { %2072 = vst.msk [vmem:[#allocation2 + $0x1ec] sm:$0xf] %vm1948_vm2, %v1909_v12  ;;  %v1788_v18 = vpack.c.bf16 %v1386_v16, %v1386_v16  ;;  %v1828_v19 = vpack.c.bf16 %v1486_v17, %v1486_v17 }
  0xfe   : > { %5613 = vmatmul.msk.bf16.gmra.mxu2 %vm1124_vm1, %v6110_v11  ;;  %5634 = vmatmul.msk.bf16.gmra.mxu3 %vm1124_vm1, %v6131_v13  ;;  %v6093_v11 = vld [vmem:[%s9262_s5 + $0x100] sm:$0xff] }
  0xff   : > { %1951 = vst.msk [vmem:[#allocation2 + $0x8] sm:$0xf] %vm1948_vm2, %v1788_v18  ;;  %5573 = vmatmul.msk.bf16.gmra.mxu0 %vm1124_vm1, %v6070_v14  ;;  %5593 = vmatmul.msk.bf16.gmra.mxu1 %vm1124_vm1, %v6090_v15 }
 0x100   : > { %1991 = vst.msk [vmem:[#allocation2 + $0xa8] sm:$0xf] %vm1948_vm2, %v1828_v19 }
 0x101   : > { %v1586_v20 = vpop.f32.mrf.mxu2  ;;  %v1691_v21 = vpop.f32.mrf.mxu3 }
 0x102   : > { %v1868_v22 = vpack.c.bf16 %v1586_v20, %v1586_v20  ;;  %v1910_v23 = vpack.c.bf16 %v1691_v21, %v1691_v21 }
 0x104   : > { %2031 = vst.msk [vmem:[#allocation2 + $0x148] sm:$0xf] %vm1948_vm2, %v1868_v22  ;;  %v1388_v24 = vpop.f32.mrf.mxu0  ;;  %v1488_v25 = vpop.f32.mrf.mxu1 }
 0x105   : > { %2073 = vst.msk [vmem:[#allocation2 + $0x1f0] sm:$0xf] %vm1948_vm2, %v1910_v23  ;;  %v1789_v26 = vpack.c.bf16 %v1388_v24, %v1388_v24  ;;  %v1829_v27 = vpack.c.bf16 %v1488_v25, %v1488_v25 }
 0x107   : > { %1952 = vst.msk [vmem:[#allocation2 + $0xc] sm:$0xf] %vm1948_vm2, %v1789_v26 }
 0x108   : > { %1992 = vst.msk [vmem:[#allocation2 + $0xac] sm:$0xf] %vm1948_vm2, %v1829_v27  ;;  %v6114_v27 = vld [vmem:[%s9262_s5 + $0x1a8] sm:$0xff] }
 0x109   : > { %v1588_v28 = vpop.f32.mrf.mxu2  ;;  %v1693_v29 = vpop.f32.mrf.mxu3 }
 0x10a   : > { %v1869_v30 = vpack.c.bf16 %v1588_v28, %v1588_v28  ;;  %v1911_v32 = vpack.c.bf16 %v1693_v29, %v1693_v29  ;;  %v6135_v29 = vld [vmem:[%s9262_s5 + $0x250] sm:$0xff] }
 0x10c   : > { %2032 = vst.msk [vmem:[#allocation2 + $0x14c] sm:$0xf] %vm1948_vm2, %v1869_v30  ;;  %v1391_v36 = vpop.f32.mrf.mxu0  ;;  %v1491_v37 = vpop.f32.mrf.mxu1  ;;  %v6074_v30 = vld [vmem:[%s9262_s5 + $0x68] sm:$0xff] }
 0x10d   : > { %2074 = vst.msk [vmem:[#allocation2 + $0x1f4] sm:$0xf] %vm1948_vm2, %v1911_v32  ;;  %v1790_v38 = vpack.c.bf16 %v1391_v36, %v1391_v36  ;;  %v1830_v39 = vpack.c.bf16 %v1491_v37, %v1491_v37 }
 0x10e   : > { %5614 = vmatmul.msk.bf16.gmra.mxu2 %vm1124_vm1, %v6111_v31  ;;  %5635 = vmatmul.msk.bf16.gmra.mxu3 %vm1124_vm1, %v6132_v33  ;;  %v6094_v31 = vld [vmem:[%s9262_s5 + $0x108] sm:$0xff] }
 0x10f   : > { %1953 = vst.msk [vmem:[#allocation2 + $0x10] sm:$0xf] %vm1948_vm2, %v1790_v38  ;;  %5574 = vmatmul.msk.bf16.gmra.mxu0 %vm1124_vm1, %v6071_v34  ;;  %5594 = vmatmul.msk.bf16.gmra.mxu1 %vm1124_vm1, %v6091_v35 }
 0x110   : > { %1993 = vst.msk [vmem:[#allocation2 + $0xb0] sm:$0xf] %vm1948_vm2, %v1830_v39 }
 0x111   : > { %v1591_v40 = vpop.f32.mrf.mxu2  ;;  %v1696_v41 = vpop.f32.mrf.mxu3 }
 0x112   : > { %v1870_v42 = vpack.c.bf16 %v1591_v40, %v1591_v40  ;;  %v1912_v43 = vpack.c.bf16 %v1696_v41, %v1696_v41 }
 0x114   : > { %2033 = vst.msk [vmem:[#allocation2 + $0x150] sm:$0xf] %vm1948_vm2, %v1870_v42  ;;  %v1393_v44 = vpop.f32.mrf.mxu0  ;;  %v1493_v45 = vpop.f32.mrf.mxu1 }
 0x115   : > { %2075 = vst.msk [vmem:[#allocation2 + $0x1f8] sm:$0xf] %vm1948_vm2, %v1912_v43  ;;  %v1791_v46 = vpack.c.bf16 %v1393_v44, %v1393_v44  ;;  %v1831_v47 = vpack.c.bf16 %v1493_v45, %v1493_v45 }
 0x117   : > { %1954 = vst.msk [vmem:[#allocation2 + $0x14] sm:$0xf] %vm1948_vm2, %v1791_v46 }
 0x118   : > { %1994 = vst.msk [vmem:[#allocation2 + $0xb4] sm:$0xf] %vm1948_vm2, %v1831_v47  ;;  %v6115_v47 = vld [vmem:[%s9262_s5 + $0x1b0] sm:$0xff] }
 0x119   : > { %v1593_v48 = vpop.f32.mrf.mxu2  ;;  %v1698_v49 = vpop.f32.mrf.mxu3 }
 0x11a   : > { %v1871_v50 = vpack.c.bf16 %v1593_v48, %v1593_v48  ;;  %v1913_v52 = vpack.c.bf16 %v1698_v49, %v1698_v49  ;;  %v6136_v49 = vld [vmem:[%s9262_s5 + $0x258] sm:$0xff] }
 0x11c   : > { %2034 = vst.msk [vmem:[#allocation2 + $0x154] sm:$0xf] %vm1948_vm2, %v1871_v50  ;;  %v1396_v56 = vpop.f32.mrf.mxu0  ;;  %v1496_v57 = vpop.f32.mrf.mxu1  ;;  %v6075_v50 = vld [vmem:[%s9262_s5 + $0x70] sm:$0xff] }
 0x11d   : > { %2076 = vst.msk [vmem:[#allocation2 + $0x1fc] sm:$0xf] %vm1948_vm2, %v1913_v52  ;;  %v1792_v58 = vpack.c.bf16 %v1396_v56, %v1396_v56  ;;  %v1832_v59 = vpack.c.bf16 %v1496_v57, %v1496_v57 }
 0x11e   : > { %5615 = vmatmul.msk.bf16.gmra.mxu2 %vm1124_vm1, %v6112_v51  ;;  %5636 = vmatmul.msk.bf16.gmra.mxu3 %vm1124_vm1, %v6133_v53  ;;  %v6095_v51 = vld [vmem:[%s9262_s5 + $0x110] sm:$0xff] }
 0x11f   : > { %1955 = vst.msk [vmem:[#allocation2 + $0x18] sm:$0xf] %vm1948_vm2, %v1792_v58  ;;  %5575 = vmatmul.msk.bf16.gmra.mxu0 %vm1124_vm1, %v6072_v54  ;;  %5595 = vmatmul.msk.bf16.gmra.mxu1 %vm1124_vm1, %v6092_v55 }
 0x120   : > { %1995 = vst.msk [vmem:[#allocation2 + $0xb8] sm:$0xf] %vm1948_vm2, %v1832_v59 }
 0x121   : > { %v1596_v60 = vpop.f32.mrf.mxu2  ;;  %v1701_v61 = vpop.f32.mrf.mxu3 }
 0x122   : > { %v1872_v62 = vpack.c.bf16 %v1596_v60, %v1596_v60  ;;  %v1914_v63 = vpack.c.bf16 %v1701_v61, %v1701_v61 }
 0x124   : > { %2035 = vst.msk [vmem:[#allocation2 + $0x158] sm:$0xf] %vm1948_vm2, %v1872_v62  ;;  %v1398_v0 = vpop.f32.mrf.mxu0  ;;  %v1498_v1 = vpop.f32.mrf.mxu1 }
 0x125   : > { %2077 = vst.msk [vmem:[#allocation2 + $0x200] sm:$0xf] %vm1948_vm2, %v1914_v63  ;;  %v1793_v2 = vpack.c.bf16 %v1398_v0, %v1398_v0  ;;  %v1833_v3 = vpack.c.bf16 %v1498_v1, %v1498_v1 }
 0x127   : > { %1956 = vst.msk [vmem:[#allocation2 + $0x1c] sm:$0xf] %vm1948_vm2, %v1793_v2 }
 0x128   : > { %1996 = vst.msk [vmem:[#allocation2 + $0xbc] sm:$0xf] %vm1948_vm2, %v1833_v3  ;;  %v6116_v3 = vld [vmem:[%s9262_s5 + $0x1b8] sm:$0xff] }
 0x129   : > { %v1598_v4 = vpop.f32.mrf.mxu2  ;;  %v1703_v5 = vpop.f32.mrf.mxu3 }
 0x12a   : > { %v1873_v6 = vpack.c.bf16 %v1598_v4, %v1598_v4  ;;  %v1915_v8 = vpack.c.bf16 %v1703_v5, %v1703_v5  ;;  %v6137_v5 = vld [vmem:[%s9262_s5 + $0x260] sm:$0xff] }
 0x12c   : > { %2036 = vst.msk [vmem:[#allocation2 + $0x15c] sm:$0xf] %vm1948_vm2, %v1873_v6  ;;  %v1401_v12 = vpop.f32.mrf.mxu0  ;;  %v1501_v13 = vpop.f32.mrf.mxu1  ;;  %v6076_v6 = vld [vmem:[%s9262_s5 + $0x78] sm:$0xff] }
 0x12d   : > { %2078 = vst.msk [vmem:[#allocation2 + $0x204] sm:$0xf] %vm1948_vm2, %v1915_v8  ;;  %v1794_v14 = vpack.c.bf16 %v1401_v12, %v1401_v12  ;;  %v1834_v15 = vpack.c.bf16 %v1501_v13, %v1501_v13 }
 0x12e   : > { %5616 = vmatmul.msk.bf16.gmra.mxu2 %vm1124_vm1, %v6113_v7  ;;  %5637 = vmatmul.msk.bf16.gmra.mxu3 %vm1124_vm1, %v6134_v9  ;;  %v6096_v7 = vld [vmem:[%s9262_s5 + $0x118] sm:$0xff] }
 0x12f   : > { %1957 = vst.msk [vmem:[#allocation2 + $0x20] sm:$0xf] %vm1948_vm2, %v1794_v14  ;;  %5576 = vmatmul.msk.bf16.gmra.mxu0 %vm1124_vm1, %v6073_v10  ;;  %5596 = vmatmul.msk.bf16.gmra.mxu1 %vm1124_vm1, %v6093_v11 }
 0x130   : > { %1997 = vst.msk [vmem:[#allocation2 + $0xc0] sm:$0xf] %vm1948_vm2, %v1834_v15 }
 0x131   : > { %v1601_v16 = vpop.f32.mrf.mxu2  ;;  %v1706_v17 = vpop.f32.mrf.mxu3 }
 0x132   : > { %v1874_v18 = vpack.c.bf16 %v1601_v16, %v1601_v16  ;;  %v1916_v19 = vpack.c.bf16 %v1706_v17, %v1706_v17 }
 0x134   : > { %2037 = vst.msk [vmem:[#allocation2 + $0x160] sm:$0xf] %vm1948_vm2, %v1874_v18  ;;  %v1403_v20 = vpop.f32.mrf.mxu0  ;;  %v1503_v21 = vpop.f32.mrf.mxu1 }
 0x135   : > { %2079 = vst.msk [vmem:[#allocation2 + $0x208] sm:$0xf] %vm1948_vm2, %v1916_v19  ;;  %v1795_v22 = vpack.c.bf16 %v1403_v20, %v1403_v20  ;;  %v1835_v23 = vpack.c.bf16 %v1503_v21, %v1503_v21 }
 0x137   : > { %1958 = vst.msk [vmem:[#allocation2 + $0x24] sm:$0xf] %vm1948_vm2, %v1795_v22 }
 0x138   : > { %1998 = vst.msk [vmem:[#allocation2 + $0xc4] sm:$0xf] %vm1948_vm2, %v1835_v23  ;;  %v6117_v23 = vld [vmem:[%s9262_s5 + $0x1c0] sm:$0xff] }
 0x139   : > { %v1603_v24 = vpop.f32.mrf.mxu2  ;;  %v1708_v25 = vpop.f32.mrf.mxu3 }
 0x13a   : > { %v1875_v26 = vpack.c.bf16 %v1603_v24, %v1603_v24  ;;  %v1917_v28 = vpack.c.bf16 %v1708_v25, %v1708_v25  ;;  %v6138_v25 = vld [vmem:[%s9262_s5 + $0x268] sm:$0xff] }
 0x13c   : > { %2038 = vst.msk [vmem:[#allocation2 + $0x164] sm:$0xf] %vm1948_vm2, %v1875_v26  ;;  %v1406_v32 = vpop.f32.mrf.mxu0  ;;  %v1506_v33 = vpop.f32.mrf.mxu1  ;;  %v6077_v26 = vld [vmem:[%s9262_s5 + $0x80] sm:$0xff] }
 0x13d   : > { %2080 = vst.msk [vmem:[#allocation2 + $0x20c] sm:$0xf] %vm1948_vm2, %v1917_v28  ;;  %v1796_v34 = vpack.c.bf16 %v1406_v32, %v1406_v32  ;;  %v1836_v35 = vpack.c.bf16 %v1506_v33, %v1506_v33 }
 0x13e   : > { %5617 = vmatmul.msk.bf16.gmra.mxu2 %vm1124_vm1, %v6114_v27  ;;  %5638 = vmatmul.msk.bf16.gmra.mxu3 %vm1124_vm1, %v6135_v29  ;;  %v6097_v27 = vld [vmem:[%s9262_s5 + $0x120] sm:$0xff] }
 0x13f   : > { %1959 = vst.msk [vmem:[#allocation2 + $0x28] sm:$0xf] %vm1948_vm2, %v1796_v34  ;;  %5577 = vmatmul.msk.bf16.gmra.mxu0 %vm1124_vm1, %v6074_v30  ;;  %5597 = vmatmul.msk.bf16.gmra.mxu1 %vm1124_vm1, %v6094_v31 }
 0x140   : > { %1999 = vst.msk [vmem:[#allocation2 + $0xc8] sm:$0xf] %vm1948_vm2, %v1836_v35 }
 0x141   : > { %v1606_v36 = vpop.f32.mrf.mxu2  ;;  %v1711_v37 = vpop.f32.mrf.mxu3 }
 0x142   : > { %v1876_v38 = vpack.c.bf16 %v1606_v36, %v1606_v36  ;;  %v1918_v39 = vpack.c.bf16 %v1711_v37, %v1711_v37 }
 0x144   : > { %2039 = vst.msk [vmem:[#allocation2 + $0x168] sm:$0xf] %vm1948_vm2, %v1876_v38  ;;  %v1408_v40 = vpop.f32.mrf.mxu0  ;;  %v1508_v41 = vpop.f32.mrf.mxu1 }
 0x145   : > { %2081 = vst.msk [vmem:[#allocation2 + $0x210] sm:$0xf] %vm1948_vm2, %v1918_v39  ;;  %v1797_v42 = vpack.c.bf16 %v1408_v40, %v1408_v40  ;;  %v1837_v43 = vpack.c.bf16 %v1508_v41, %v1508_v41 }
 0x147   : > { %1960 = vst.msk [vmem:[#allocation2 + $0x2c] sm:$0xf] %vm1948_vm2, %v1797_v42 }
 0x148   : > { %2000 = vst.msk [vmem:[#allocation2 + $0xcc] sm:$0xf] %vm1948_vm2, %v1837_v43  ;;  %v6118_v43 = vld [vmem:[%s9262_s5 + $0x1c8] sm:$0xff] }
 0x149   : > { %v1608_v44 = vpop.f32.mrf.mxu2  ;;  %v1713_v45 = vpop.f32.mrf.mxu3 }
 0x14a   : > { %v1877_v46 = vpack.c.bf16 %v1608_v44, %v1608_v44  ;;  %v1919_v48 = vpack.c.bf16 %v1713_v45, %v1713_v45  ;;  %v6139_v45 = vld [vmem:[%s9262_s5 + $0x270] sm:$0xff] }
 0x14c   : > { %2040 = vst.msk [vmem:[#allocation2 + $0x16c] sm:$0xf] %vm1948_vm2, %v1877_v46  ;;  %v1411_v52 = vpop.f32.mrf.mxu0  ;;  %v1511_v53 = vpop.f32.mrf.mxu1  ;;  %v6078_v46 = vld [vmem:[%s9262_s5 + $0x88] sm:$0xff] }
 0x14d   : > { %2082 = vst.msk [vmem:[#allocation2 + $0x214] sm:$0xf] %vm1948_vm2, %v1919_v48  ;;  %v1798_v54 = vpack.c.bf16 %v1411_v52, %v1411_v52  ;;  %v1838_v55 = vpack.c.bf16 %v1511_v53, %v1511_v53 }
 0x14e   : > { %5618 = vmatmul.msk.bf16.gmra.mxu2 %vm1124_vm1, %v6115_v47  ;;  %5639 = vmatmul.msk.bf16.gmra.mxu3 %vm1124_vm1, %v6136_v49  ;;  %v6098_v47 = vld [vmem:[%s9262_s5 + $0x128] sm:$0xff] }
 0x14f   : > { %1961 = vst.msk [vmem:[#allocation2 + $0x30] sm:$0xf] %vm1948_vm2, %v1798_v54  ;;  %5578 = vmatmul.msk.bf16.gmra.mxu0 %vm1124_vm1, %v6075_v50  ;;  %5598 = vmatmul.msk.bf16.gmra.mxu1 %vm1124_vm1, %v6095_v51 }
 0x150   : > { %2001 = vst.msk [vmem:[#allocation2 + $0xd0] sm:$0xf] %vm1948_vm2, %v1838_v55 }
 0x151   : > { %v1611_v56 = vpop.f32.mrf.mxu2  ;;  %v1716_v57 = vpop.f32.mrf.mxu3 }
 0x152   : > { %v1878_v58 = vpack.c.bf16 %v1611_v56, %v1611_v56  ;;  %v1920_v59 = vpack.c.bf16 %v1716_v57, %v1716_v57 }
 0x154   : > { %2041 = vst.msk [vmem:[#allocation2 + $0x170] sm:$0xf] %vm1948_vm2, %v1878_v58  ;;  %v1413_v60 = vpop.f32.mrf.mxu0  ;;  %v1513_v61 = vpop.f32.mrf.mxu1 }
 0x155   : > { %2083 = vst.msk [vmem:[#allocation2 + $0x218] sm:$0xf] %vm1948_vm2, %v1920_v59  ;;  %v1799_v62 = vpack.c.bf16 %v1413_v60, %v1413_v60  ;;  %v1839_v63 = vpack.c.bf16 %v1513_v61, %v1513_v61 }
 0x157   : > { %1962 = vst.msk [vmem:[#allocation2 + $0x34] sm:$0xf] %vm1948_vm2, %v1799_v62 }
 0x158   : > { %2002 = vst.msk [vmem:[#allocation2 + $0xd4] sm:$0xf] %vm1948_vm2, %v1839_v63  ;;  %v6119_v63 = vld [vmem:[%s9262_s5 + $0x1d0] sm:$0xff] }
 0x159   : > { %v1613_v0 = vpop.f32.mrf.mxu2  ;;  %v1718_v1 = vpop.f32.mrf.mxu3 }
 0x15a   : > { %v1879_v2 = vpack.c.bf16 %v1613_v0, %v1613_v0  ;;  %v1921_v4 = vpack.c.bf16 %v1718_v1, %v1718_v1  ;;  %v6140_v1 = vld [vmem:[%s9262_s5 + $0x278] sm:$0xff] }
 0x15c   : > { %2042 = vst.msk [vmem:[#allocation2 + $0x174] sm:$0xf] %vm1948_vm2, %v1879_v2  ;;  %v1416_v8 = vpop.f32.mrf.mxu0  ;;  %v1516_v9 = vpop.f32.mrf.mxu1  ;;  %v6079_v2 = vld [vmem:[%s9262_s5 + $0x90] sm:$0xff] }
 0x15d   : > { %2084 = vst.msk [vmem:[#allocation2 + $0x21c] sm:$0xf] %vm1948_vm2, %v1921_v4  ;;  %v1800_v10 = vpack.c.bf16 %v1416_v8, %v1416_v8  ;;  %v1840_v11 = vpack.c.bf16 %v1516_v9, %v1516_v9 }
 0x15e   : > { %5619 = vmatmul.msk.bf16.gmra.mxu2 %vm1124_vm1, %v6116_v3  ;;  %5640 = vmatmul.msk.bf16.gmra.mxu3 %vm1124_vm1, %v6137_v5  ;;  %v6099_v3 = vld [vmem:[%s9262_s5 + $0x130] sm:$0xff] }
 0x15f   : > { %1963 = vst.msk [vmem:[#allocation2 + $0x38] sm:$0xf] %vm1948_vm2, %v1800_v10  ;;  %5579 = vmatmul.msk.bf16.gmra.mxu0 %vm1124_vm1, %v6076_v6  ;;  %5599 = vmatmul.msk.bf16.gmra.mxu1 %vm1124_vm1, %v6096_v7 }
 0x160   : > { %2003 = vst.msk [vmem:[#allocation2 + $0xd8] sm:$0xf] %vm1948_vm2, %v1840_v11 }
 0x161   : > { %v1616_v12 = vpop.f32.mrf.mxu2  ;;  %v1721_v13 = vpop.f32.mrf.mxu3 }
 0x162   : > { %v1880_v14 = vpack.c.bf16 %v1616_v12, %v1616_v12  ;;  %v1922_v15 = vpack.c.bf16 %v1721_v13, %v1721_v13 }
 0x164   : > { %2043 = vst.msk [vmem:[#allocation2 + $0x178] sm:$0xf] %vm1948_vm2, %v1880_v14  ;;  %v1418_v16 = vpop.f32.mrf.mxu0  ;;  %v1518_v17 = vpop.f32.mrf.mxu1 }
 0x165   : > { %2085 = vst.msk [vmem:[#allocation2 + $0x220] sm:$0xf] %vm1948_vm2, %v1922_v15  ;;  %v1801_v18 = vpack.c.bf16 %v1418_v16, %v1418_v16  ;;  %v1841_v19 = vpack.c.bf16 %v1518_v17, %v1518_v17 }
 0x167   : > { %1964 = vst.msk [vmem:[#allocation2 + $0x3c] sm:$0xf] %vm1948_vm2, %v1801_v18 }
 0x168   : > { %2004 = vst.msk [vmem:[#allocation2 + $0xdc] sm:$0xf] %vm1948_vm2, %v1841_v19  ;;  %v6120_v19 = vld [vmem:[%s9262_s5 + $0x1d8] sm:$0xff] }
 0x169   : > { %v1618_v20 = vpop.f32.mrf.mxu2  ;;  %v1723_v21 = vpop.f32.mrf.mxu3 }
 0x16a   : > { %v1881_v22 = vpack.c.bf16 %v1618_v20, %v1618_v20  ;;  %v1923_v24 = vpack.c.bf16 %v1723_v21, %v1723_v21  ;;  %v6141_v21 = vld [vmem:[%s9262_s5 + $0x280] sm:$0xff] }
 0x16c   : > { %2044 = vst.msk [vmem:[#allocation2 + $0x17c] sm:$0xf] %vm1948_vm2, %v1881_v22  ;;  %v1421_v28 = vpop.f32.mrf.mxu0  ;;  %v1521_v29 = vpop.f32.mrf.mxu1  ;;  %v6080_v22 = vld [vmem:[%s9262_s5 + $0x98] sm:$0xff] }
 0x16d   : > { %2086 = vst.msk [vmem:[#allocation2 + $0x224] sm:$0xf] %vm1948_vm2, %v1923_v24  ;;  %v1802_v30 = vpack.c.bf16 %v1421_v28, %v1421_v28  ;;  %v1842_v31 = vpack.c.bf16 %v1521_v29, %v1521_v29 }
 0x16e   : > { %5620 = vmatmul.msk.bf16.gmra.mxu2 %vm1124_vm1, %v6117_v23  ;;  %5641 = vmatmul.msk.bf16.gmra.mxu3 %vm1124_vm1, %v6138_v25  ;;  %v6100_v23 = vld [vmem:[%s9262_s5 + $0x138] sm:$0xff] }
 0x16f   : > { %1965 = vst.msk [vmem:[#allocation2 + $0x40] sm:$0xf] %vm1948_vm2, %v1802_v30  ;;  %5580 = vmatmul.msk.bf16.gmra.mxu0 %vm1124_vm1, %v6077_v26  ;;  %5600 = vmatmul.msk.bf16.gmra.mxu1 %vm1124_vm1, %v6097_v27 }
 0x170   : > { %2005 = vst.msk [vmem:[#allocation2 + $0xe0] sm:$0xf] %vm1948_vm2, %v1842_v31 }
 0x171   : > { %v1621_v32 = vpop.f32.mrf.mxu2  ;;  %v1726_v33 = vpop.f32.mrf.mxu3 }
 0x172   : > { %v1882_v34 = vpack.c.bf16 %v1621_v32, %v1621_v32  ;;  %v1924_v35 = vpack.c.bf16 %v1726_v33, %v1726_v33 }
 0x174   : > { %2045 = vst.msk [vmem:[#allocation2 + $0x180] sm:$0xf] %vm1948_vm2, %v1882_v34  ;;  %v1423_v36 = vpop.f32.mrf.mxu0  ;;  %v1523_v37 = vpop.f32.mrf.mxu1 }
 0x175   : > { %2087 = vst.msk [vmem:[#allocation2 + $0x228] sm:$0xf] %vm1948_vm2, %v1924_v35  ;;  %v1803_v38 = vpack.c.bf16 %v1423_v36, %v1423_v36  ;;  %v1843_v39 = vpack.c.bf16 %v1523_v37, %v1523_v37 }
 0x177   : > { %1966 = vst.msk [vmem:[#allocation2 + $0x44] sm:$0xf] %vm1948_vm2, %v1803_v38 }
 0x178   : > { %2006 = vst.msk [vmem:[#allocation2 + $0xe4] sm:$0xf] %vm1948_vm2, %v1843_v39  ;;  %v6121_v39 = vld [vmem:[%s9262_s5 + $0x1e0] sm:$0xff] }
 0x179   : > { %v1623_v40 = vpop.f32.mrf.mxu2  ;;  %v1728_v41 = vpop.f32.mrf.mxu3 }
 0x17a   : > { %v1883_v42 = vpack.c.bf16 %v1623_v40, %v1623_v40  ;;  %v1925_v44 = vpack.c.bf16 %v1728_v41, %v1728_v41 }
 0x17c   : > { %2046 = vst.msk [vmem:[#allocation2 + $0x184] sm:$0xf] %vm1948_vm2, %v1883_v42  ;;  %v1426_v48 = vpop.f32.mrf.mxu0  ;;  %v1526_v49 = vpop.f32.mrf.mxu1 }
 0x17d   : > { %2088 = vst.msk [vmem:[#allocation2 + $0x22c] sm:$0xf] %vm1948_vm2, %v1925_v44  ;;  %v1804_v50 = vpack.c.bf16 %v1426_v48, %v1426_v48  ;;  %v1844_v51 = vpack.c.bf16 %v1526_v49, %v1526_v49 }
 0x17e   : > { %5621 = vmatmul.msk.bf16.gmra.mxu2 %vm1124_vm1, %v6118_v43  ;;  %5642 = vmatmul.msk.bf16.gmra.mxu3 %vm1124_vm1, %v6139_v45 }
 0x17f   : > { %1967 = vst.msk [vmem:[#allocation2 + $0x48] sm:$0xf] %vm1948_vm2, %v1804_v50  ;;  %5581 = vmatmul.msk.bf16.gmra.mxu0 %vm1124_vm1, %v6078_v46  ;;  %5601 = vmatmul.msk.bf16.gmra.mxu1 %vm1124_vm1, %v6098_v47 }
 0x180   : > { %2007 = vst.msk [vmem:[#allocation2 + $0xe8] sm:$0xf] %vm1948_vm2, %v1844_v51 }
 0x181   : > { %v1626_v52 = vpop.f32.mrf.mxu2  ;;  %v1731_v53 = vpop.f32.mrf.mxu3 }
 0x182   : > { %v1884_v54 = vpack.c.bf16 %v1626_v52, %v1626_v52  ;;  %v1926_v55 = vpack.c.bf16 %v1731_v53, %v1731_v53 }
 0x184   : > { %2047 = vst.msk [vmem:[#allocation2 + $0x188] sm:$0xf] %vm1948_vm2, %v1884_v54  ;;  %v1428_v56 = vpop.f32.mrf.mxu0  ;;  %v1528_v57 = vpop.f32.mrf.mxu1 }
 0x185   : > { %2089 = vst.msk [vmem:[#allocation2 + $0x230] sm:$0xf] %vm1948_vm2, %v1926_v55  ;;  %v1805_v58 = vpack.c.bf16 %v1428_v56, %v1428_v56  ;;  %v1845_v59 = vpack.c.bf16 %v1528_v57, %v1528_v57 }
 0x187   : > { %1968 = vst.msk [vmem:[#allocation2 + $0x4c] sm:$0xf] %vm1948_vm2, %v1805_v58 }
 0x188   : > { %2008 = vst.msk [vmem:[#allocation2 + $0xec] sm:$0xf] %vm1948_vm2, %v1845_v59 }
 0x189   : > { %v1628_v60 = vpop.f32.mrf.mxu2  ;;  %v1733_v61 = vpop.f32.mrf.mxu3 }
 0x18a   : > { %v1885_v62 = vpack.c.bf16 %v1628_v60, %v1628_v60  ;;  %v1927_v0 = vpack.c.bf16 %v1733_v61, %v1733_v61 }
 0x18c   : > { %2048 = vst.msk [vmem:[#allocation2 + $0x18c] sm:$0xf] %vm1948_vm2, %v1885_v62  ;;  %v1431_v4 = vpop.f32.mrf.mxu0  ;;  %v1531_v5 = vpop.f32.mrf.mxu1 }
 0x18d   : > { %2090 = vst.msk [vmem:[#allocation2 + $0x234] sm:$0xf] %vm1948_vm2, %v1927_v0  ;;  %v1806_v6 = vpack.c.bf16 %v1431_v4, %v1431_v4  ;;  %v1846_v7 = vpack.c.bf16 %v1531_v5, %v1531_v5 }
 0x18e   : > { %5622 = vmatmul.msk.bf16.gmra.mxu2 %vm1124_vm1, %v6119_v63  ;;  %5643 = vmatmul.msk.bf16.gmra.mxu3 %vm1124_vm1, %v6140_v1 }
 0x18f   : > { %1969 = vst.msk [vmem:[#allocation2 + $0x50] sm:$0xf] %vm1948_vm2, %v1806_v6  ;;  %5582 = vmatmul.msk.bf16.gmra.mxu0 %vm1124_vm1, %v6079_v2  ;;  %5602 = vmatmul.msk.bf16.gmra.mxu1 %vm1124_vm1, %v6099_v3 }
 0x190   : > { %2009 = vst.msk [vmem:[#allocation2 + $0xf0] sm:$0xf] %vm1948_vm2, %v1846_v7 }
 0x191   : > { %v1631_v8 = vpop.f32.mrf.mxu2  ;;  %v1736_v9 = vpop.f32.mrf.mxu3 }
 0x192   : > { %v1886_v10 = vpack.c.bf16 %v1631_v8, %v1631_v8  ;;  %v1928_v11 = vpack.c.bf16 %v1736_v9, %v1736_v9 }
 0x194   : > { %2049 = vst.msk [vmem:[#allocation2 + $0x190] sm:$0xf] %vm1948_vm2, %v1886_v10  ;;  %v1433_v12 = vpop.f32.mrf.mxu0  ;;  %v1533_v13 = vpop.f32.mrf.mxu1 }
 0x195   : > { %2091 = vst.msk [vmem:[#allocation2 + $0x238] sm:$0xf] %vm1948_vm2, %v1928_v11  ;;  %v1807_v14 = vpack.c.bf16 %v1433_v12, %v1433_v12  ;;  %v1847_v15 = vpack.c.bf16 %v1533_v13, %v1533_v13 }
 0x197   : > { %1970 = vst.msk [vmem:[#allocation2 + $0x54] sm:$0xf] %vm1948_vm2, %v1807_v14 }
 0x198   : > { %2010 = vst.msk [vmem:[#allocation2 + $0xf4] sm:$0xf] %vm1948_vm2, %v1847_v15 }
 0x199   : > { %v1633_v16 = vpop.f32.mrf.mxu2  ;;  %v1738_v17 = vpop.f32.mrf.mxu3 }
 0x19a   : > { %v1887_v18 = vpack.c.bf16 %v1633_v16, %v1633_v16  ;;  %v1929_v20 = vpack.c.bf16 %v1738_v17, %v1738_v17 }
 0x19c   : > { %2050 = vst.msk [vmem:[#allocation2 + $0x194] sm:$0xf] %vm1948_vm2, %v1887_v18  ;;  %v1436_v24 = vpop.f32.mrf.mxu0  ;;  %v1536_v25 = vpop.f32.mrf.mxu1 }
 0x19d   : > { %2092 = vst.msk [vmem:[#allocation2 + $0x23c] sm:$0xf] %vm1948_vm2, %v1929_v20  ;;  %v1808_v26 = vpack.c.bf16 %v1436_v24, %v1436_v24  ;;  %v1848_v27 = vpack.c.bf16 %v1536_v25, %v1536_v25 }
 0x19e   : > { %5623 = vmatmul.msk.bf16.gmra.mxu2 %vm1124_vm1, %v6120_v19  ;;  %5644 = vmatmul.msk.bf16.gmra.mxu3 %vm1124_vm1, %v6141_v21 }
 0x19f   : > { %1971 = vst.msk [vmem:[#allocation2 + $0x58] sm:$0xf] %vm1948_vm2, %v1808_v26  ;;  %5583 = vmatmul.msk.bf16.gmra.mxu0 %vm1124_vm1, %v6080_v22  ;;  %5603 = vmatmul.msk.bf16.gmra.mxu1 %vm1124_vm1, %v6100_v23 }
 0x1a0   : > { %2011 = vst.msk [vmem:[#allocation2 + $0xf8] sm:$0xf] %vm1948_vm2, %v1848_v27 }
 0x1a1   : > { %v1636_v28 = vpop.f32.mrf.mxu2  ;;  %v1741_v29 = vpop.f32.mrf.mxu3 }
 0x1a2   : > { %v1888_v30 = vpack.c.bf16 %v1636_v28, %v1636_v28  ;;  %v1930_v31 = vpack.c.bf16 %v1741_v29, %v1741_v29 }
 0x1a4   : > { %2051 = vst.msk [vmem:[#allocation2 + $0x198] sm:$0xf] %vm1948_vm2, %v1888_v30  ;;  %v1438_v32 = vpop.f32.mrf.mxu0  ;;  %v1538_v33 = vpop.f32.mrf.mxu1 }
 0x1a5   : > { %2093 = vst.msk [vmem:[#allocation2 + $0x240] sm:$0xf] %vm1948_vm2, %v1930_v31  ;;  %v1809_v34 = vpack.c.bf16 %v1438_v32, %v1438_v32  ;;  %v1849_v35 = vpack.c.bf16 %v1538_v33, %v1538_v33 }
 0x1a7   : > { %1972 = vst.msk [vmem:[#allocation2 + $0x5c] sm:$0xf] %vm1948_vm2, %v1809_v34 }
 0x1a8   : > { %2012 = vst.msk [vmem:[#allocation2 + $0xfc] sm:$0xf] %vm1948_vm2, %v1849_v35 }
 0x1a9   : > { %v1638_v36 = vpop.f32.mrf.mxu2  ;;  %v1743_v37 = vpop.f32.mrf.mxu3 }
 0x1aa   : > { %v1889_v38 = vpack.c.bf16 %v1638_v36, %v1638_v36  ;;  %v1931_v40 = vpack.c.bf16 %v1743_v37, %v1743_v37 }
 0x1ac   : > { %2052 = vst.msk [vmem:[#allocation2 + $0x19c] sm:$0xf] %vm1948_vm2, %v1889_v38  ;;  %v1441_v41 = vpop.f32.mrf.mxu0  ;;  %v1541_v42 = vpop.f32.mrf.mxu1 }
 0x1ad   : > { %2094 = vst.msk [vmem:[#allocation2 + $0x244] sm:$0xf] %vm1948_vm2, %v1931_v40  ;;  %v1810_v43 = vpack.c.bf16 %v1441_v41, %v1441_v41  ;;  %v1850_v44 = vpack.c.bf16 %v1541_v42, %v1541_v42 }
 0x1ae   : > { %5624 = vmatmul.msk.bf16.gmra.mxu2 %vm1124_vm1, %v6121_v39 }
 0x1af   : > { %1973 = vst.msk [vmem:[#allocation2 + $0x60] sm:$0xf] %vm1948_vm2, %v1810_v43 }
 0x1b0   : > { %2013 = vst.msk [vmem:[#allocation2 + $0x100] sm:$0xf] %vm1948_vm2, %v1850_v44 }
 0x1b1   : > { %v1641_v45 = vpop.f32.mrf.mxu2  ;;  %v1746_v46 = vpop.f32.mrf.mxu3 }
 0x1b2   : > { %v1890_v47 = vpack.c.bf16 %v1641_v45, %v1641_v45  ;;  %v1932_v48 = vpack.c.bf16 %v1746_v46, %v1746_v46 }
 0x1b4   : > { %2053 = vst.msk [vmem:[#allocation2 + $0x1a0] sm:$0xf] %vm1948_vm2, %v1890_v47  ;;  %v1443_v49 = vpop.f32.mrf.mxu0  ;;  %v1543_v50 = vpop.f32.mrf.mxu1 }
 0x1b5   : > { %2095 = vst.msk [vmem:[#allocation2 + $0x248] sm:$0xf] %vm1948_vm2, %v1932_v48  ;;  %v1811_v51 = vpack.c.bf16 %v1443_v49, %v1443_v49  ;;  %v1851_v52 = vpack.c.bf16 %v1543_v50, %v1543_v50 }
 0x1b7   : > { %1974 = vst.msk [vmem:[#allocation2 + $0x64] sm:$0xf] %vm1948_vm2, %v1811_v51 }
 0x1b8   : > { %2014 = vst.msk [vmem:[#allocation2 + $0x104] sm:$0xf] %vm1948_vm2, %v1851_v52 }
 0x1b9   : > { %v1643_v53 = vpop.f32.mrf.mxu2  ;;  %v1748_v54 = vpop.f32.mrf.mxu3 }
 0x1ba   : > { %v1891_v55 = vpack.c.bf16 %v1643_v53, %v1643_v53  ;;  %v1933_v56 = vpack.c.bf16 %v1748_v54, %v1748_v54 }
 0x1bc   : > { %2054 = vst.msk [vmem:[#allocation2 + $0x1a4] sm:$0xf] %vm1948_vm2, %v1891_v55  ;;  %v1446_v57 = vpop.f32.mrf.mxu0  ;;  %v1546_v58 = vpop.f32.mrf.mxu1 }
 0x1bd   : > { %2096 = vst.msk [vmem:[#allocation2 + $0x24c] sm:$0xf] %vm1948_vm2, %v1933_v56  ;;  %v1812_v59 = vpack.c.bf16 %v1446_v57, %v1446_v57  ;;  %v1852_v60 = vpack.c.bf16 %v1546_v58, %v1546_v58 }
 0x1bf   : > { %1975 = vst.msk [vmem:[#allocation2 + $0x68] sm:$0xf] %vm1948_vm2, %v1812_v59 }
 0x1c0   : > { %2015 = vst.msk [vmem:[#allocation2 + $0x108] sm:$0xf] %vm1948_vm2, %v1852_v60 }
 0x1c1   : > { %v1646_v61 = vpop.f32.mrf.mxu2  ;;  %v1751_v62 = vpop.f32.mrf.mxu3 }
 0x1c2   : > { %v1892_v63 = vpack.c.bf16 %v1646_v61, %v1646_v61  ;;  %v1934_v0 = vpack.c.bf16 %v1751_v62, %v1751_v62 }
 0x1c4   : > { %2055 = vst.msk [vmem:[#allocation2 + $0x1a8] sm:$0xf] %vm1948_vm2, %v1892_v63  ;;  %v1448_v1 = vpop.f32.mrf.mxu0  ;;  %v1548_v2 = vpop.f32.mrf.mxu1 }
 0x1c5   : > { %2097 = vst.msk [vmem:[#allocation2 + $0x250] sm:$0xf] %vm1948_vm2, %v1934_v0  ;;  %v1813_v3 = vpack.c.bf16 %v1448_v1, %v1448_v1  ;;  %v1853_v4 = vpack.c.bf16 %v1548_v2, %v1548_v2 }
 0x1c7   : > { %1976 = vst.msk [vmem:[#allocation2 + $0x6c] sm:$0xf] %vm1948_vm2, %v1813_v3 }
 0x1c8   : > { %2016 = vst.msk [vmem:[#allocation2 + $0x10c] sm:$0xf] %vm1948_vm2, %v1853_v4 }
 0x1c9   : > { %v1648_v5 = vpop.f32.mrf.mxu2  ;;  %v1753_v6 = vpop.f32.mrf.mxu3 }
 0x1ca   : > { %v1893_v7 = vpack.c.bf16 %v1648_v5, %v1648_v5  ;;  %v1935_v8 = vpack.c.bf16 %v1753_v6, %v1753_v6 }
 0x1cc   : > { %2056 = vst.msk [vmem:[#allocation2 + $0x1ac] sm:$0xf] %vm1948_vm2, %v1893_v7  ;;  %v1451_v9 = vpop.f32.mrf.mxu0  ;;  %v1551_v10 = vpop.f32.mrf.mxu1 }
 0x1cd   : > { %2098 = vst.msk [vmem:[#allocation2 + $0x254] sm:$0xf] %vm1948_vm2, %v1935_v8  ;;  %v1814_v11 = vpack.c.bf16 %v1451_v9, %v1451_v9  ;;  %v1854_v12 = vpack.c.bf16 %v1551_v10, %v1551_v10 }
 0x1cf   : > { %1977 = vst.msk [vmem:[#allocation2 + $0x70] sm:$0xf] %vm1948_vm2, %v1814_v11 }
 0x1d0   : > { %2017 = vst.msk [vmem:[#allocation2 + $0x110] sm:$0xf] %vm1948_vm2, %v1854_v12 }
 0x1d1   : > { %v1651_v13 = vpop.f32.mrf.mxu2  ;;  %v1756_v14 = vpop.f32.mrf.mxu3 }
 0x1d2   : > { %v1894_v15 = vpack.c.bf16 %v1651_v13, %v1651_v13  ;;  %v1936_v16 = vpack.c.bf16 %v1756_v14, %v1756_v14 }
 0x1d4   : > { %2057 = vst.msk [vmem:[#allocation2 + $0x1b0] sm:$0xf] %vm1948_vm2, %v1894_v15  ;;  %v1453_v17 = vpop.f32.mrf.mxu0  ;;  %v1553_v18 = vpop.f32.mrf.mxu1 }
 0x1d5   : > { %2099 = vst.msk [vmem:[#allocation2 + $0x258] sm:$0xf] %vm1948_vm2, %v1936_v16  ;;  %v1815_v19 = vpack.c.bf16 %v1453_v17, %v1453_v17  ;;  %v1855_v20 = vpack.c.bf16 %v1553_v18, %v1553_v18 }
 0x1d7   : > { %1978 = vst.msk [vmem:[#allocation2 + $0x74] sm:$0xf] %vm1948_vm2, %v1815_v19 }
 0x1d8   : > { %2018 = vst.msk [vmem:[#allocation2 + $0x114] sm:$0xf] %vm1948_vm2, %v1855_v20 }
 0x1d9   : > { %v1653_v21 = vpop.f32.mrf.mxu2  ;;  %v1758_v22 = vpop.f32.mrf.mxu3 }
 0x1da   : > { %v1895_v23 = vpack.c.bf16 %v1653_v21, %v1653_v21  ;;  %v1937_v24 = vpack.c.bf16 %v1758_v22, %v1758_v22 }
 0x1dc   : > { %2058 = vst.msk [vmem:[#allocation2 + $0x1b4] sm:$0xf] %vm1948_vm2, %v1895_v23  ;;  %v1456_v25 = vpop.f32.mrf.mxu0  ;;  %v1556_v26 = vpop.f32.mrf.mxu1 }
 0x1dd   : > { %2100 = vst.msk [vmem:[#allocation2 + $0x25c] sm:$0xf] %vm1948_vm2, %v1937_v24  ;;  %v1816_v27 = vpack.c.bf16 %v1456_v25, %v1456_v25  ;;  %v1856_v28 = vpack.c.bf16 %v1556_v26, %v1556_v26 }
 0x1df   : > { %1979 = vst.msk [vmem:[#allocation2 + $0x78] sm:$0xf] %vm1948_vm2, %v1816_v27 }
 0x1e0   : > { %2019 = vst.msk [vmem:[#allocation2 + $0x118] sm:$0xf] %vm1948_vm2, %v1856_v28 }
 0x1e1   : > { %v1656_v29 = vpop.f32.mrf.mxu2  ;;  %v1761_v30 = vpop.f32.mrf.mxu3 }
 0x1e2   : > { %v1896_v31 = vpack.c.bf16 %v1656_v29, %v1656_v29  ;;  %v1938_v32 = vpack.c.bf16 %v1761_v30, %v1761_v30 }
 0x1e4   : > { %2059 = vst.msk [vmem:[#allocation2 + $0x1b8] sm:$0xf] %vm1948_vm2, %v1896_v31  ;;  %v1458_v33 = vpop.f32.mrf.mxu0  ;;  %v1558_v34 = vpop.f32.mrf.mxu1 }
 0x1e5   : > { %2101 = vst.msk [vmem:[#allocation2 + $0x260] sm:$0xf] %vm1948_vm2, %v1938_v32  ;;  %v1817_v35 = vpack.c.bf16 %v1458_v33, %v1458_v33  ;;  %v1857_v36 = vpack.c.bf16 %v1558_v34, %v1558_v34 }
 0x1e7   : > { %1980 = vst.msk [vmem:[#allocation2 + $0x7c] sm:$0xf] %vm1948_vm2, %v1817_v35 }
 0x1e8   : > { %2020 = vst.msk [vmem:[#allocation2 + $0x11c] sm:$0xf] %vm1948_vm2, %v1857_v36 }
 0x1e9   : > { %v1658_v37 = vpop.f32.mrf.mxu2  ;;  %v1763_v38 = vpop.f32.mrf.mxu3 }
 0x1ea   : > { %v1897_v39 = vpack.c.bf16 %v1658_v37, %v1658_v37  ;;  %v1939_v40 = vpack.c.bf16 %v1763_v38, %v1763_v38 }
 0x1ec   : > { %2060 = vst.msk [vmem:[#allocation2 + $0x1bc] sm:$0xf] %vm1948_vm2, %v1897_v39  ;;  %v1461_v41 = vpop.f32.mrf.mxu0  ;;  %v1561_v42 = vpop.f32.mrf.mxu1 }
 0x1ed   : > { %2102 = vst.msk [vmem:[#allocation2 + $0x264] sm:$0xf] %vm1948_vm2, %v1939_v40  ;;  %v1818_v43 = vpack.c.bf16 %v1461_v41, %v1461_v41  ;;  %v1858_v44 = vpack.c.bf16 %v1561_v42, %v1561_v42 }
 0x1ef   : > { %1981 = vst.msk [vmem:[#allocation2 + $0x80] sm:$0xf] %vm1948_vm2, %v1818_v43 }
 0x1f0   : > { %2021 = vst.msk [vmem:[#allocation2 + $0x120] sm:$0xf] %vm1948_vm2, %v1858_v44 }
 0x1f1   : > { %v1661_v45 = vpop.f32.mrf.mxu2  ;;  %v1766_v46 = vpop.f32.mrf.mxu3 }
 0x1f2   : > { %v1898_v47 = vpack.c.bf16 %v1661_v45, %v1661_v45  ;;  %v1940_v48 = vpack.c.bf16 %v1766_v46, %v1766_v46 }
 0x1f4   : > { %2061 = vst.msk [vmem:[#allocation2 + $0x1c0] sm:$0xf] %vm1948_vm2, %v1898_v47  ;;  %v1463_v49 = vpop.f32.mrf.mxu0  ;;  %v1563_v50 = vpop.f32.mrf.mxu1 }
 0x1f5   : > { %2103 = vst.msk [vmem:[#allocation2 + $0x268] sm:$0xf] %vm1948_vm2, %v1940_v48  ;;  %v1819_v51 = vpack.c.bf16 %v1463_v49, %v1463_v49  ;;  %v1859_v52 = vpack.c.bf16 %v1563_v50, %v1563_v50 }
 0x1f7   : > { %1982 = vst.msk [vmem:[#allocation2 + $0x84] sm:$0xf] %vm1948_vm2, %v1819_v51 }
 0x1f8   : > { %2022 = vst.msk [vmem:[#allocation2 + $0x124] sm:$0xf] %vm1948_vm2, %v1859_v52 }
 0x1f9   : > { %v1663_v53 = vpop.f32.mrf.mxu2  ;;  %v1768_v54 = vpop.f32.mrf.mxu3 }
 0x1fa   : > { %v1899_v55 = vpack.c.bf16 %v1663_v53, %v1663_v53  ;;  %v1941_v56 = vpack.c.bf16 %v1768_v54, %v1768_v54 }
 0x1fc   : > { %2062 = vst.msk [vmem:[#allocation2 + $0x1c4] sm:$0xf] %vm1948_vm2, %v1899_v55  ;;  %v1466_v57 = vpop.f32.mrf.mxu0  ;;  %v1566_v58 = vpop.f32.mrf.mxu1 }
 0x1fd   : > { %2104 = vst.msk [vmem:[#allocation2 + $0x26c] sm:$0xf] %vm1948_vm2, %v1941_v56  ;;  %v1820_v59 = vpack.c.bf16 %v1466_v57, %v1466_v57  ;;  %v1860_v60 = vpack.c.bf16 %v1566_v58, %v1566_v58 }
 0x1ff   : > { %1983 = vst.msk [vmem:[#allocation2 + $0x88] sm:$0xf] %vm1948_vm2, %v1820_v59 }
 0x200   : > { %2023 = vst.msk [vmem:[#allocation2 + $0x128] sm:$0xf] %vm1948_vm2, %v1860_v60 }
 0x201   : > { %v1666_v61 = vpop.f32.mrf.mxu2  ;;  %v1771_v62 = vpop.f32.mrf.mxu3 }
 0x202   : > { %v1900_v63 = vpack.c.bf16 %v1666_v61, %v1666_v61  ;;  %v1942_v0 = vpack.c.bf16 %v1771_v62, %v1771_v62 }
 0x204   : > { %2063 = vst.msk [vmem:[#allocation2 + $0x1c8] sm:$0xf] %vm1948_vm2, %v1900_v63  ;;  %v1468_v1 = vpop.f32.mrf.mxu0  ;;  %v1568_v2 = vpop.f32.mrf.mxu1 }
 0x205   : > { %2105 = vst.msk [vmem:[#allocation2 + $0x270] sm:$0xf] %vm1948_vm2, %v1942_v0  ;;  %v1821_v3 = vpack.c.bf16 %v1468_v1, %v1468_v1  ;;  %v1861_v4 = vpack.c.bf16 %v1568_v2, %v1568_v2 }
 0x207   : > { %1984 = vst.msk [vmem:[#allocation2 + $0x8c] sm:$0xf] %vm1948_vm2, %v1821_v3 }
 0x208   : > { %2024 = vst.msk [vmem:[#allocation2 + $0x12c] sm:$0xf] %vm1948_vm2, %v1861_v4 }
 0x209   : > { %v1668_v5 = vpop.f32.mrf.mxu2  ;;  %v1773_v6 = vpop.f32.mrf.mxu3 }
 0x20a   : > { %v1901_v7 = vpack.c.bf16 %v1668_v5, %v1668_v5  ;;  %v1943_v8 = vpack.c.bf16 %v1773_v6, %v1773_v6 }
 0x20c   : > { %2064 = vst.msk [vmem:[#allocation2 + $0x1cc] sm:$0xf] %vm1948_vm2, %v1901_v7  ;;  %v1471_v9 = vpop.f32.mrf.mxu0  ;;  %v1571_v10 = vpop.f32.mrf.mxu1 }
 0x20d   : > { %2106 = vst.msk [vmem:[#allocation2 + $0x274] sm:$0xf] %vm1948_vm2, %v1943_v8  ;;  %v1822_v11 = vpack.c.bf16 %v1471_v9, %v1471_v9  ;;  %v1862_v12 = vpack.c.bf16 %v1571_v10, %v1571_v10 }
 0x20f   : > { %1985 = vst.msk [vmem:[#allocation2 + $0x90] sm:$0xf] %vm1948_vm2, %v1822_v11 }
 0x210   : > { %2025 = vst.msk [vmem:[#allocation2 + $0x130] sm:$0xf] %vm1948_vm2, %v1862_v12 }
 0x211   : > { %v1671_v13 = vpop.f32.mrf.mxu2  ;;  %v1776_v14 = vpop.f32.mrf.mxu3 }
 0x212   : > { %v1902_v15 = vpack.c.bf16 %v1671_v13, %v1671_v13  ;;  %v1944_v16 = vpack.c.bf16 %v1776_v14, %v1776_v14 }
 0x214   : > { %2065 = vst.msk [vmem:[#allocation2 + $0x1d0] sm:$0xf] %vm1948_vm2, %v1902_v15  ;;  %v1473_v17 = vpop.f32.mrf.mxu0  ;;  %v1573_v18 = vpop.f32.mrf.mxu1 }
 0x215   : > { %2107 = vst.msk [vmem:[#allocation2 + $0x278] sm:$0xf] %vm1948_vm2, %v1944_v16  ;;  %v1823_v19 = vpack.c.bf16 %v1473_v17, %v1473_v17  ;;  %v1863_v20 = vpack.c.bf16 %v1573_v18, %v1573_v18 }
 0x217   : > { %1986 = vst.msk [vmem:[#allocation2 + $0x94] sm:$0xf] %vm1948_vm2, %v1823_v19 }
 0x218   : > { %2026 = vst.msk [vmem:[#allocation2 + $0x134] sm:$0xf] %vm1948_vm2, %v1863_v20 }
 0x219   : > { %v1673_v21 = vpop.f32.mrf.mxu2  ;;  %v1778_v22 = vpop.f32.mrf.mxu3 }
 0x21a   : > { %v1903_v23 = vpack.c.bf16 %v1673_v21, %v1673_v21  ;;  %v1945_v24 = vpack.c.bf16 %v1778_v22, %v1778_v22 }
 0x21c   : > { %2066 = vst.msk [vmem:[#allocation2 + $0x1d4] sm:$0xf] %vm1948_vm2, %v1903_v23  ;;  %v1476_v25 = vpop.f32.mrf.mxu0  ;;  %v1576_v26 = vpop.f32.mrf.mxu1 }
 0x21d   : > { %2108 = vst.msk [vmem:[#allocation2 + $0x27c] sm:$0xf] %vm1948_vm2, %v1945_v24  ;;  %v1824_v27 = vpack.c.bf16 %v1476_v25, %v1476_v25  ;;  %v1864_v28 = vpack.c.bf16 %v1576_v26, %v1576_v26 }
 0x21f   : > { %1987 = vst.msk [vmem:[#allocation2 + $0x98] sm:$0xf] %vm1948_vm2, %v1824_v27 }
 0x220   : > { %2027 = vst.msk [vmem:[#allocation2 + $0x138] sm:$0xf] %vm1948_vm2, %v1864_v28 }
 0x221   : > { %v1676_v29 = vpop.f32.mrf.mxu2  ;;  %v1781_v30 = vpop.f32.mrf.mxu3 }
 0x222   : > { %v1904_v31 = vpack.c.bf16 %v1676_v29, %v1676_v29  ;;  %v1946_v32 = vpack.c.bf16 %v1781_v30, %v1781_v30 }
 0x224   : > { %2067 = vst.msk [vmem:[#allocation2 + $0x1d8] sm:$0xf] %vm1948_vm2, %v1904_v31  ;;  %v1478_v33 = vpop.f32.mrf.mxu0  ;;  %v1578_v34 = vpop.f32.mrf.mxu1 }
 0x225   : > { %2109 = vst.msk [vmem:[#allocation2 + $0x280] sm:$0xf] %vm1948_vm2, %v1946_v32  ;;  %v1825_v35 = vpack.c.bf16 %v1478_v33, %v1478_v33  ;;  %v1865_v36 = vpack.c.bf16 %v1578_v34, %v1578_v34 }
 0x227   : > { %1988 = vst.msk [vmem:[#allocation2 + $0x9c] sm:$0xf] %vm1948_vm2, %v1825_v35 }
 0x228   : > { %2028 = vst.msk [vmem:[#allocation2 + $0x13c] sm:$0xf] %vm1948_vm2, %v1865_v36 }
 0x229   : > { %v1678_v37 = vpop.f32.mrf.mxu2  ;;  %v1783_v38 = vpop.f32.mrf.mxu3 }
 0x22a   : > { %v1905_v39 = vpack.c.bf16 %v1678_v37, %v1678_v37  ;;  %v1947_v40 = vpack.c.bf16 %v1783_v38, %v1783_v38 }
 0x22c   : > { %2068 = vst.msk [vmem:[#allocation2 + $0x1dc] sm:$0xf] %vm1948_vm2, %v1905_v39 }
 0x22d   : > { %2110 = vst.msk [vmem:[#allocation2 + $0x284] sm:$0xf] %vm1948_vm2, %v1947_v40 }
 0x231   : > { %v1681_v41 = vpop.f32.mrf.mxu2 }
 0x232   : > { %v1906_v42 = vpack.c.bf16 %v1681_v41, %v1681_v41 }
 0x234   : > { %2069 = vst.msk [vmem:[#allocation2 + $0x1e0] sm:$0xf] %vm1948_vm2, %v1906_v42 }
 0x239   : > { %v1683_v43 = vpop.f32.mrf.mxu2 }
 0x23a   : > { %v1907_v44 = vpack.c.bf16 %v1683_v43, %v1683_v43 }
 0x23c   : > { %2070 = vst.msk [vmem:[#allocation2 + $0x1e4] sm:$0xf] %vm1948_vm2, %v1907_v44 }
 0x23d PF: > { %v2119_v45 = vld [vmem:[%s6640_s23 + $0x20] sm:$0xf]  ;;  %vm2133_vm3 = vcmask 1043456   ;;  %v6449_v47 = vmov 0   ;;  %v2118_v49 = vld [vmem:[%s6640_s23 + $0x18] sm:$0xff]  ;;  %v2117_v51 = vld [vmem:[%s6640_s23 + $0x10] sm:$0xff] }
 0x23e   : > { %v2190_v46 = vld [vmem:[%s9264_s7 + $0x10] sm:$0x3]  ;;  %6335 = vset.pattern.permute.xlu1 %v6449_v47  ;;  %6334 = vset.pattern.permute.xlu0 %v6449_v47  ;;  %v2189_v48 = vld [vmem:[%s9264_s7 + $0x8] sm:$0xff]  ;;  %v2188_v54 = vld [vmem:[%s9264_s7] sm:$0xff]  ;;  %vm2120_vm4 = vcmask 293888   ;;  %vm2344_vm6 = vcmask 1040384  }
 0x23f   : > { %5645 = vmatpush.msk.msra.mxu0 %vm2133_vm3, %v2119_v45  ;;  %2229 = vperm.xlu0 %6334, %v2190_v46   ;;  %v2184_v50 = vld [vmem:[%s9263_s6 + $0x70] sm:$0xff]  ;;  %v2185_v55 = vld [vmem:[%s9263_s6 + $0x78] sm:$0xff]  ;;  %v2111_v56 = vld [vmem:[%s9261_s4] sm:$0xff]  ;;  %s6057_s21 = sshll.u32 %s6435_s15, 1  ;;  %s9487_s8 = sld [smem:[#allocation62_spill]] }
 0x240   : > { %2224 = vperm.xlu1 %6335, %v2189_v48   ;;  %6336 = vset.pattern.permute.xlu2 %v6449_v47  ;;  %v2116_v52 = vld [vmem:[%s6640_s23 + $0x8] sm:$0xff]  ;;  %v2115_v53 = vld [vmem:[%s6640_s23] sm:$0xff]  ;;  %v2182_v58 = vld [vmem:[%s9263_s6 + $0x60] sm:$0xff]  ;;  %s5090_s28 = sadd.s32 %s6431_s14, %s6057_s21  ;;  %s5094_s10 = sshll.u32 %s6644_s2, 4  ;;  %s5095_s10 = int_to_ptr.vmem [resolvable:$true] %s5094_s10 }
 0x241   : > { %2149 = vmatpush.msra.mxu0 %v2118_v49  ;;  %2474 = vperm.xlu2 %6336, %v2184_v50   ;;  %v2183_v57 = vld [vmem:[%s9263_s6 + $0x68] sm:$0xff]  ;;  %v2181_v59 = vld [vmem:[%s9263_s6 + $0x58] sm:$0xff]  ;;  %v2180_v61 = vld [vmem:[%s9263_s6 + $0x50] sm:$0xff]  ;;  %s6058_s23 = sshll.u32 %s5090_s28, 3 }
 0x242   : > { %v2112_v60 = vld [vmem:[%s9261_s4 + $0x8] sm:$0xff]  ;;  %v2178_v63 = vld [vmem:[%s9263_s6 + $0x40] sm:$0xff]  ;;  %v2113_v0 = vld [vmem:[%s9261_s4 + $0x10] sm:$0xff] }
 0x243   : > { %2150 = vmatpush.msra.mxu0 %v2117_v51  ;;  %v2179_v62 = vld [vmem:[%s9263_s6 + $0x48] sm:$0xff]  ;;  %v2177_v1 = vld [vmem:[%s9263_s6 + $0x38] sm:$0xff]  ;;  %v2176_v2 = vld [vmem:[%s9263_s6 + $0x30] sm:$0xff] }
 0x244   : > { %v2175_v3 = vld [vmem:[%s9263_s6 + $0x28] sm:$0xff]  ;;  %v2114_v4 = vld [vmem:[%s9261_s4 + $0x18] sm:$0xff]  ;;  %v2174_v5 = vld [vmem:[%s9263_s6 + $0x20] sm:$0xff] }
 0x245   : > { %2151 = vmatpush.msra.mxu0 %v2116_v52  ;;  %v2173_v6 = vld [vmem:[%s9263_s6 + $0x18] sm:$0xff]  ;;  %v2172_v7 = vld [vmem:[%s9263_s6 + $0x10] sm:$0xff]  ;;  %v2171_v8 = vld [vmem:[%s9263_s6 + $0x8] sm:$0xff]  ;;  %s5092_s27 = scalar_lea.hbm %s9487_s8, %s6058_s23  ;;  %s6357_s21 = scalar_lea.hbm %s9487_s8, 64 }
 0x246   : > { %v2170_v9 = vld [vmem:[%s9263_s6] sm:$0xff]  ;;  %v2187_v10 = vld [vmem:[%s9263_s6 + $0x88] sm:$0xff]  ;;  %s5096_s19 = sshll.u32 %s5092_s27, 4  ;;  %s5097_s19 = int_to_ptr.hbm [resolvable:$true] %s5096_s19 }
 0x247   : > { %2152 = vmatpush.msra.mxu0 %v2115_v53  ;;  %2219 = vperm.xlu0 %6334, %v2188_v54   ;;  %v2186_v11 = vld [vmem:[%s9263_s6 + $0x80] sm:$0xff]  ;;  %v2168_v14 = vld [vmem:[%s487_s22] sm:$0xff]  ;;  %s6351_s0 = sshra.s32 %s5097_s19, 4  ;;  %s6352_s0 = int_to_ptr.hbm [resolvable:$true] %s6351_s0 }
 0x248   : > { %2479 = vperm.xlu1 %6335, %v2185_v55   ;;  %5646 = vmatmul.msk.f32.vlgmr.msra.gmra.mxu0 %vm2120_vm4, %v2111_v56  ;;  %v2169_v20 = vld [vmem:[%s487_s22 + $0x8] sm:$0xff]  ;;  %s9486_s22 = sld [smem:[#allocation61_spill]]  ;;  %s6353_s17 = scalar_lea.hbm %s6352_s0, 8 }
 0x249   : > { %2469 = vperm.xlu2 %6336, %v2183_v57   ;;  %p6354_p6 = scmp.ne.s32.totalorder %s6352_s0, %s6353_s17  ;;  %p6358_p9 = scmp.lt.s32.totalorder %s6352_s0, %s9487_s8 }
 0x24a   : > { %p6359_p10 = scmp.lt.s32.totalorder %s6357_s21, %s6353_s17 }
 0x24b   : > { %p6355_p7 = pnand %p6354_p6, %p6589_p11 }
 0x24c   : > { %p6360_p12 = por %p6359_p10, %p6358_p9 }
 0x24d   : > { %p6356_p8 = pneg %p6355_p7 }
 0x24f   : > { %2464 = vperm.xlu0 %6334, %v2182_v58   ;;  %p6361_p0 = pnand %p6360_p12, %p6356_p8 }
 0x250   : > { %2459 = vperm.xlu1 %6335, %v2181_v59   ;;  %5647 = vmatmul.msk.f32.gmra.mxu0 %vm2120_vm4, %v2112_v60 }
 0x251   : > { %2454 = vperm.xlu2 %6336, %v2180_v61  }
 0x257   : > { %2449 = vperm.xlu0 %6334, %v2179_v62  }
 0x258   : > { %2444 = vperm.xlu1 %6335, %v2178_v63   ;;  %5648 = vmatmul.msk.f32.gmra.mxu0 %vm2120_vm4, %v2113_v0 }
 0x259   : > { %2439 = vperm.xlu2 %6336, %v2177_v1  }
 0x25f   : > { %2434 = vperm.xlu0 %6334, %v2176_v2  }
 0x260   : > { %2429 = vperm.xlu1 %6335, %v2175_v3   ;;  %5649 = vmatmul.msk.f32.gmra.mxu0 %vm2120_vm4, %v2114_v4 }
 0x261   : > { %2424 = vperm.xlu2 %6336, %v2174_v5  }
 0x267   : > { %2419 = vperm.xlu0 %6334, %v2173_v6  }
 0x268   : > { %2414 = vperm.xlu1 %6335, %v2172_v7  }
 0x269   : > { %2409 = vperm.xlu2 %6336, %v2171_v8  }
 0x26f   : > { %2404 = vperm.xlu0 %6334, %v2170_v9  }
 0x270   : > { %2489 = vperm.xlu1 %6335, %v2187_v10  }
 0x271   : > { %2484 = vperm.xlu2 %6336, %v2186_v11  }
 0x2b1   : > { %v7236_v25 = vpop.permute.xlu0 %2229 }
 0x2b2   : > { %v7259_v52 = vpop.permute.xlu1 %2224 }
 0x2b9   : > { %v7261_v53 = vpop.permute.xlu0 %2219 }
 0x2c5   : > { %v7226_v12 = vpop.f32.mrf.mxu0 }
 0x2cd   : > { %v7228_v13 = vpop.f32.mrf.mxu0 }
 0x2ce   : > { %9325 = vst [vmem:[#allocation14_spill] sm:$0xff] %v7228_v13 }
 0x2d5   : > { %v2160_v15 = vpop.f32.mrf.mxu0 }
 0x2d6   : > { %v2192_v16 = vadd.f32 %v2168_v14, %v2160_v15 }
 0x2d8   : > { %v2194_v17 = vfloor.f32 %v2192_v16  ;;  %v2207_v18 = vmax.f32 %v2192_v16, 0.0 }
 0x2da   : > { %v2200_v19 = vmax.f32 %v2194_v17, 0.0  ;;  %v2202_v21 = vadd.f32 1.0, %v2194_v17  ;;  %v2208_v23 = vmin.f32 %v2207_v18, 17.0 }
 0x2dc   : > { %v7234_v22 = vmin.f32 %v2200_v19, 17.0  ;;  %v2203_v26 = vmax.f32 %v2202_v21, 0.0 }
 0x2dd   : > { %v2163_v24 = vpop.f32.mrf.mxu0 }
 0x2de   : > { %v4709_v27 = vadd.f32 %v2169_v20, %v2163_v24  ;;  %v2213_v28 = vsub.f32 %v7234_v22, %v2208_v23  ;;  %v7239_v29 = vmin.f32 %v2203_v26, 17.0  ;;  %v2232_v32 = vperm.slane %v7234_v22, 0 }
 0x2df   : > { %v3218_v44 = vperm.slane %v7234_v22, 3  ;;  %v2622_v18 = vperm.slane %v7234_v22, 1  ;;  %v7290_v26 = vperm.slane %v7234_v22, 2 }
 0x2e0   : > { %v4711_v30 = vfloor.f32 %v4709_v27  ;;  %v4724_v31 = vmax.f32 %v4709_v27, 0.0  ;;  %v7242_v33 = vadd.f32 1.0, %v2213_v28  ;;  %v2215_v34 = vsub.f32 %v7239_v29, %v2208_v23 }
 0x2e1   : > { %vm2235_vm5 = vcmp.eq.f32.partialorder %v7236_v25, %v2232_v32  ;;  %v2240_v42 = vperm.slane %v7239_v29, 0  ;;  %vm3221_vm8 = vcmp.eq.f32.partialorder %v7236_v25, %v3218_v44  ;;  %v3226_v50 = vperm.slane %v7239_v29, 3 }
 0x2e2   : > { %v4717_v35 = vmax.f32 %v4711_v30, 0.0  ;;  %v4719_v36 = vadd.f32 1.0, %v4711_v30  ;;  %v4725_v37 = vmin.f32 %v4724_v31, 17.0  ;;  %v2236_v38 = vperm.slane %v7242_v33, 0 }
 0x2e3   : > { %v7247_v39 = vsub.f32 1.0, %v2215_v34  ;;  %v3222_v45 = vperm.slane %v7242_v33, 3  ;;  %vm2243_vm7 = vcmp.eq.f32.partialorder %v7236_v25, %v2240_v42  ;;  %vm3229_vm9 = vcmp.eq.f32.partialorder %v7236_v25, %v3226_v50 }
 0x2e4   : > { %v4718_v40 = vmin.f32 %v4717_v35, 17.0  ;;  %v4720_v41 = vmax.f32 %v4719_v36, 0.0  ;;  %v2239_v43 = vsel %vm2235_vm5, %v2236_v38, 0.0  ;;  %vm2233_vm10 = vcmp.eq.f32.partialorder %v7261_v53, %v2232_v32 }
 0x2e5   : > { %v2244_v49 = vperm.slane %v7247_v39, 0  ;;  %v3230_v51 = vperm.slane %v7247_v39, 3  ;;  %v3225_v57 = vsel %vm3221_vm8, %v3222_v45, 0.0  ;;  %vm2234_vm11 = vcmp.eq.f32.partialorder %v7259_v52, %v2232_v32 }
 0x2e6   : > { %v4721_v46 = vmin.f32 %v4720_v41, 17.0  ;;  %v4730_v47 = vsub.f32 %v4718_v40, %v4725_v37  ;;  %v7252_v48 = vperm.slane %v4718_v40, 0  ;;  %v2237_v0 = vsel %vm2233_vm10, %v2236_v38, 0.0 }
 0x2e7   : > { %v2247_v58 = vsel %vm2243_vm7, %v2244_v49, 0.0  ;;  %v3233_v62 = vsel %vm3229_vm9, %v3230_v51, 0.0  ;;  %v2238_v1 = vsel %vm2234_vm11, %v2236_v38, 0.0  ;;  %vm2241_vm12 = vcmp.eq.f32.partialorder %v7261_v53, %v2240_v42 }
 0x2e8   : > { %v4731_v54 = vadd.f32 1.0, %v4730_v47  ;;  %v4732_v55 = vsub.f32 %v4721_v46, %v4725_v37  ;;  %v7263_v56 = vperm.slane %v4721_v46, 0  ;;  %v2250_v61 = vadd.f32 %v2247_v58, %v2239_v43  ;;  %v6142_v47 = vld [vmem:[#allocation2] sm:$0xff] }
 0x2e9   : > { %v3236_v63 = vadd.f32 %v3233_v62, %v3225_v57  ;;  %vm2242_vm13 = vcmp.eq.f32.partialorder %v7259_v52, %v2240_v42  ;;  %v2245_v4 = vsel %vm2241_vm12, %v2244_v49, 0.0  ;;  %vm3219_vm14 = vcmp.eq.f32.partialorder %v7261_v53, %v3218_v44 }
 0x2ea   : > { %v4733_v59 = vsub.f32 1.0, %v4732_v55  ;;  %v7268_v60 = vperm.slane %v4731_v54, 0  ;;  %v2270_v3 = vpack.c.bf16 %v2250_v61, %v2250_v61  ;;  %v2246_v6 = vsel %vm2242_vm13, %v2244_v49, 0.0  ;;  %v6145_v49 = vld [vmem:[#allocation2 + $0x18] sm:$0xff]  ;;  %v6148_v61 = vld [vmem:[#allocation2 + $0x30] sm:$0xff] }
 0x2eb   : > { %v3256_v5 = vpack.c.bf16 %v3236_v63, %v3236_v63  ;;  %v2248_v7 = vadd.f32 %v2245_v4, %v2237_v0  ;;  %v2249_v9 = vadd.f32 %v2246_v6, %v2238_v1  ;;  %vm3220_vm15 = vcmp.eq.f32.partialorder %v7259_v52, %v3218_v44  ;;  %v6169_v55 = vld [vmem:[#allocation2 + $0xd8] sm:$0xff] }
 0x2ec   : > { %v7271_v2 = vperm.slane %v4733_v59, 0  ;;  %v2346_v8 = vsel %vm2344_vm6, %v2270_v3, 0  ;;  %v3223_v10 = vsel %vm3219_vm14, %v3222_v45, 0.0  ;;  %v3224_v14 = vsel %vm3220_vm15, %v3222_v45, 0.0 }
 0x2ed   : > { %2354 = vmatpush.bf16.msra.mxu1 %v2346_v8  ;;  %6238 = vmatpush.bf16.msra.mxu2 %v2346_v8  ;;  %v3330_v11 = vsel %vm2344_vm6, %v3256_v5, 0  ;;  %vm3227_vm0 = vcmp.eq.f32.partialorder %v7261_v53, %v3226_v50  ;;  %vm3228_vm1 = vcmp.eq.f32.partialorder %v7259_v52, %v3226_v50  ;;  %v2269_v15 = vpack.c.bf16 %v2249_v9, %v2248_v7 }
 0x2ee   : > { %6239 = vmatpush.bf16.msra.mxu3 %v2346_v8  ;;  %3338 = vmatpush.bf16.msrb.mxu0 %v3330_v11  ;;  %v3231_v16 = vsel %vm3227_vm0, %v3230_v51, 0.0  ;;  %v3232_v17 = vsel %vm3228_vm1, %v3230_v51, 0.0  ;;  %v2626_v21 = vperm.slane %v7242_v33, 1  ;;  %v7283_v23 = vperm.slane %v7239_v29, 1 }
 0x2ef   : > { %v3234_v19 = vadd.f32 %v3231_v16, %v3223_v10  ;;  %v3235_v20 = vadd.f32 %v3232_v17, %v3224_v14  ;;  %vm2625_vm2 = vcmp.eq.f32.partialorder %v7236_v25, %v2622_v18  ;;  %v7287_v24 = vperm.slane %v7247_v39, 1 }
 0x2f0   : > { %v7293_v27 = vperm.slane %v7242_v33, 2  ;;  %v2629_v30 = vsel %vm2625_vm2, %v2626_v21, 0.0  ;;  %vm2633_vm3 = vcmp.eq.f32.partialorder %v7236_v25, %v7283_v23  ;;  %v7298_v31 = vperm.slane %v7239_v29, 2 }
 0x2f1   : > { %2355 = vmatpush.bf16.msra.mxu1 %v2269_v15  ;;  %6240 = vmatpush.bf16.msra.mxu2 %v2269_v15  ;;  %v3255_v28 = vpack.c.bf16 %v3235_v20, %v3234_v19  ;;  %v2637_v32 = vsel %vm2633_vm3, %v7287_v24, 0.0  ;;  %vm2923_vm4 = vcmp.eq.f32.partialorder %v7236_v25, %v7290_v26  ;;  %v7304_v34 = vperm.slane %v7247_v39, 2 }
 0x2f2   : > { %6241 = vmatpush.bf16.msra.mxu3 %v2269_v15  ;;  %v7307_v35 = vperm.slane %v7234_v22, 4  ;;  %v2640_v36 = vadd.f32 %v2637_v32, %v2629_v30  ;;  %v2927_v37 = vsel %vm2923_vm4, %v7293_v27, 0.0  ;;  %vm2931_vm5 = vcmp.eq.f32.partialorder %v7236_v25, %v7298_v31 }
 0x2f3   : > { %3339 = vmatpush.bf16.msrb.mxu0 %v3255_v28  ;;  %v7313_v38 = vperm.slane %v7242_v33, 4  ;;  %v2935_v40 = vsel %vm2931_vm5, %v7304_v34, 0.0  ;;  %v7319_v41 = vperm.slane %v7239_v29, 4  ;;  %v7322_v42 = vperm.slane %v7247_v39, 4 }
 0x2f4   : > { %vm3519_vm7 = vcmp.eq.f32.partialorder %v7236_v25, %v7307_v35  ;;  %v2660_v43 = vpack.c.bf16 %v2640_v36, %v2640_v36  ;;  %v2938_v44 = vadd.f32 %v2935_v40, %v2927_v37  ;;  %v7326_v46 = vperm.slane %v7234_v22, 7 }
 0x2f5   : > { %v3523_v45 = vsel %vm3519_vm7, %v7313_v38, 0.0  ;;  %vm3527_vm8 = vcmp.eq.f32.partialorder %v7236_v25, %v7319_v41  ;;  %v7331_v50 = vperm.slane %v7242_v33, 7  ;;  %v7334_v51 = vperm.slane %v7239_v29, 7 }
 0x2f6   : > { %v7337_v54 = vperm.slane %v7247_v39, 7  ;;  %v2734_v57 = vsel %vm2344_vm6, %v2660_v43, 0  ;;  %v2958_v58 = vpack.c.bf16 %v2938_v44, %v2938_v44  ;;  %v3531_v59 = vsel %vm3527_vm8, %v7322_v42, 0.0  ;;  %v6143_v44 = vld [vmem:[#allocation2 + $0x8] sm:$0xff] }
 0x2f7   : > { %vm4413_vm9 = vcmp.eq.f32.partialorder %v7236_v25, %v7326_v46  ;;  %2742 = vmatpush.bf16.msrb.mxu2 %v2734_v57  ;;  %v3534_v62 = vadd.f32 %v3531_v59, %v3523_v45  ;;  %vm4421_vm10 = vcmp.eq.f32.partialorder %v7236_v25, %v7334_v51  ;;  %vm2316_vm11 = vcmask 146432   ;;  %v6146_v45 = vld [vmem:[#allocation2 + $0x20] sm:$0xff] }
 0x2f8   : > { %v4417_v63 = vsel %vm4413_vm9, %v7331_v50, 0.0  ;;  %v3032_v0 = vsel %vm2344_vm6, %v2958_v58, 0  ;;  %v4425_v1 = vsel %vm4421_vm10, %v7337_v54, 0.0  ;;  %5686 = vmatmul.msk.bf16.vlgmr.msra.gmra.mxu1 %vm2316_vm11, %v6142_v47  ;;  %5689 = vmatmul.msk.bf16.vlgmr.msra.gmra.mxu2 %vm2316_vm11, %v6145_v49  ;;  %vm2623_vm12 = vcmp.eq.f32.partialorder %v7261_v53, %v2622_v18  ;;  %v6170_v57 = vld [vmem:[#allocation2 + $0xe0] sm:$0xff] }
 0x2f9   : > { %vm2624_vm13 = vcmp.eq.f32.partialorder %v7259_v52, %v2622_v18  ;;  %3040 = vmatpush.bf16.msrb.mxu3 %v3032_v0  ;;  %v3554_v3 = vpack.c.bf16 %v3534_v62, %v3534_v62  ;;  %v4428_v4 = vadd.f32 %v4425_v1, %v4417_v63  ;;  %5821 = vmatmul.msk.bf16.vlgmr.msrb.gmra.mxu0 %vm2316_vm11, %v6169_v55  ;;  %v2627_v5 = vsel %vm2623_vm12, %v2626_v21, 0.0  ;;  %v6149_v55 = vld [vmem:[#allocation2 + $0x38] sm:$0xff] }
 0x2fa   : > { %v2628_v6 = vsel %vm2624_vm13, %v2626_v21, 0.0  ;;  %5692 = vmatmul.msk.bf16.vlgmr.msra.gmra.mxu3 %vm2316_vm11, %v6148_v61  ;;  %vm2631_vm14 = vcmp.eq.f32.partialorder %v7261_v53, %v7283_v23  ;;  %vm2632_vm15 = vcmp.eq.f32.partialorder %v7259_v52, %v7283_v23  ;;  %vm2921_vm0 = vcmp.eq.f32.partialorder %v7261_v53, %v7290_v26 }
 0x2fb   : > { %vm2922_vm1 = vcmp.eq.f32.partialorder %v7259_v52, %v7290_v26  ;;  %v3628_v7 = vsel %vm2344_vm6, %v3554_v3, 0  ;;  %v4448_v8 = vpack.c.bf16 %v4428_v4, %v4428_v4  ;;  %v2635_v9 = vsel %vm2631_vm14, %v7287_v24, 0.0 }
 0x2fc   : > { %v2636_v10 = vsel %vm2632_vm15, %v7287_v24, 0.0  ;;  %3636 = vmatpush.bf16.msrb.mxu1 %v3628_v7  ;;  %v2638_v11 = vadd.f32 %v2635_v9, %v2627_v5  ;;  %v2925_v15 = vsel %vm2921_vm0, %v7293_v27, 0.0  ;;  %v2926_v16 = vsel %vm2922_vm1, %v7293_v27, 0.0 }
 0x2fd   : > { %v2639_v14 = vadd.f32 %v2636_v10, %v2628_v6  ;;  %v4522_v17 = vsel %vm2344_vm6, %v4448_v8, 0  ;;  %vm2929_vm2 = vcmp.eq.f32.partialorder %v7261_v53, %v7298_v31  ;;  %vm2930_vm3 = vcmp.eq.f32.partialorder %v7259_v52, %v7298_v31 }
 0x2fe   : > { %vm3517_vm4 = vcmp.eq.f32.partialorder %v7261_v53, %v7307_v35  ;;  %4530 = vmatpush.bf16.msra.mxu0 %v4522_v17  ;;  %v2933_v19 = vsel %vm2929_vm2, %v7304_v34, 0.0  ;;  %v2934_v20 = vsel %vm2930_vm3, %v7304_v34, 0.0  ;;  %vm3518_vm5 = vcmp.eq.f32.partialorder %v7259_v52, %v7307_v35 }
 0x2ff   : > { %v2659_v18 = vpack.c.bf16 %v2639_v14, %v2638_v11  ;;  %v2936_v21 = vadd.f32 %v2933_v19, %v2925_v15  ;;  %v2937_v23 = vadd.f32 %v2934_v20, %v2926_v16  ;;  %v3521_v24 = vsel %vm3517_vm4, %v7313_v38, 0.0 }
 0x300   : > { %v3522_v26 = vsel %vm3518_vm5, %v7313_v38, 0.0  ;;  %vm3525_vm7 = vcmp.eq.f32.partialorder %v7261_v53, %v7319_v41  ;;  %vm3526_vm8 = vcmp.eq.f32.partialorder %v7259_v52, %v7319_v41  ;;  %vm4411_vm9 = vcmp.eq.f32.partialorder %v7261_v53, %v7326_v46 }
 0x301   : > { %2743 = vmatpush.bf16.msrb.mxu2 %v2659_v18  ;;  %vm4412_vm10 = vcmp.eq.f32.partialorder %v7259_v52, %v7326_v46  ;;  %v2957_v27 = vpack.c.bf16 %v2937_v23, %v2936_v21  ;;  %v3529_v28 = vsel %vm3525_vm7, %v7322_v42, 0.0  ;;  %v3530_v30 = vsel %vm3526_vm8, %v7322_v42, 0.0 }
 0x302   : > { %v4415_v31 = vsel %vm4411_vm9, %v7331_v50, 0.0  ;;  %v3532_v32 = vadd.f32 %v3529_v28, %v3521_v24  ;;  %v3533_v34 = vadd.f32 %v3530_v30, %v3522_v26  ;;  %v4416_v35 = vsel %vm4412_vm10, %v7331_v50, 0.0 }
 0x303   : > { %vm4419_vm12 = vcmp.eq.f32.partialorder %v7261_v53, %v7334_v51  ;;  %3041 = vmatpush.bf16.msrb.mxu3 %v2957_v27  ;;  %vm4420_vm13 = vcmp.eq.f32.partialorder %v7259_v52, %v7334_v51  ;;  %v3814_v37 = vperm.slane %v7234_v22, 5  ;;  %v3818_v38 = vperm.slane %v7242_v33, 5 }
 0x304   : > { %v4423_v36 = vsel %vm4419_vm12, %v7337_v54, 0.0  ;;  %v3553_v40 = vpack.c.bf16 %v3533_v34, %v3532_v32  ;;  %v4424_v41 = vsel %vm4420_vm13, %v7337_v54, 0.0  ;;  %v3822_v43 = vperm.slane %v7239_v29, 5  ;;  %v6147_v32 = vld [vmem:[#allocation2 + $0x28] sm:$0xff] }
 0x305   : > { %v4426_v42 = vadd.f32 %v4423_v36, %v4415_v31  ;;  %v4427_v46 = vadd.f32 %v4424_v41, %v4416_v35  ;;  %vm3817_vm14 = vcmp.eq.f32.partialorder %v7236_v25, %v3814_v37  ;;  %v3826_v47 = vperm.slane %v7247_v39, 5  ;;  %v6150_v35 = vld [vmem:[#allocation2 + $0x40] sm:$0xff]  ;;  %v6171_v36 = vld [vmem:[#allocation2 + $0xe8] sm:$0xff]  ;;  %v7455_v41 = vpop.permute.xlu0 %2464 }
 0x306   : > { %v4112_v49 = vperm.slane %v7234_v22, 6  ;;  %3637 = vmatpush.bf16.msrb.mxu1 %v3553_v40  ;;  %v3821_v50 = vsel %vm3817_vm14, %v3818_v38, 0.0  ;;  %vm3825_vm15 = vcmp.eq.f32.partialorder %v7236_v25, %v3822_v43  ;;  %v4116_v51 = vperm.slane %v7242_v33, 6  ;;  %v6173_v40 = vld [vmem:[#allocation2 + $0xf8] sm:$0xff]  ;;  %9326 = vst [vmem:[#allocation15_spill] sm:$0xff] %v7455_v41 }
 0x307   : > { %v4120_v54 = vperm.slane %v7239_v29, 6  ;;  %v4447_v58 = vpack.c.bf16 %v4427_v46, %v4426_v42  ;;  %v3829_v59 = vsel %vm3825_vm15, %v3826_v47, 0.0  ;;  %v4124_v61 = vperm.slane %v7247_v39, 6  ;;  %v6153_v42 = vld [vmem:[#allocation2 + $0x58] sm:$0xff]  ;;  %v6174_v46 = vld [vmem:[#allocation2 + $0x100] sm:$0xff] }
 0x308   : > { %vm4115_vm0 = vcmp.eq.f32.partialorder %v7236_v25, %v4112_v49  ;;  %v3832_v62 = vadd.f32 %v3829_v59, %v3821_v50  ;;  %vm4737_vm2 = vcmp.eq.f32.partialorder %v7236_v25, %v7252_v48  ;;  %5687 = vmatmul.msk.bf16.gmra.mxu1 %vm2316_vm11, %v6143_v44  ;;  %5690 = vmatmul.msk.bf16.gmra.mxu2 %vm2316_vm11, %v6146_v45  ;;  %v6180_v44 = vld [vmem:[#allocation2 + $0x130] sm:$0xff]  ;;  %v6162_v45 = vld [vmem:[#allocation2 + $0xa0] sm:$0xff]  ;;  %v2166_v50 = vld [vmem:[%s480_s25] sm:$0xff] }
 0x309   : > { %vm4123_vm1 = vcmp.eq.f32.partialorder %v7236_v25, %v4120_v54  ;;  %4531 = vmatpush.bf16.msra.mxu0 %v4447_v58  ;;  %v4119_v22 = vsel %vm4115_vm0, %v4116_v51, 0.0  ;;  %v4741_v33 = vsel %vm4737_vm2, %v7268_v60, 0.0  ;;  %vm4745_vm3 = vcmp.eq.f32.partialorder %v7236_v25, %v7263_v56  ;;  %v6163_v58 = vld [vmem:[#allocation2 + $0xa8] sm:$0xff] }
 0x30a   : > { %v4127_v29 = vsel %vm4123_vm1, %v4124_v61, 0.0  ;;  %v3852_v63 = vpack.c.bf16 %v3832_v62, %v3832_v62  ;;  %v4749_v0 = vsel %vm4745_vm3, %v7271_v2, 0.0  ;;  %vm3815_vm4 = vcmp.eq.f32.partialorder %v7261_v53, %v3814_v37  ;;  %5693 = vmatmul.msk.bf16.gmra.mxu3 %vm2316_vm11, %v6149_v55  ;;  %5822 = vmatmul.msk.bf16.gmra.mxu0 %vm2316_vm11, %v6170_v57  ;;  %v6154_v55 = vld [vmem:[#allocation2 + $0x60] sm:$0xff]  ;;  %v6181_v57 = vld [vmem:[#allocation2 + $0x138] sm:$0xff]  ;;  %v6175_v59 = vld [vmem:[#allocation2 + $0x108] sm:$0xff] }
 0x30b   : > { %v4130_v39 = vadd.f32 %v4127_v29, %v4119_v22  ;;  %v4752_v1 = vadd.f32 %v4749_v0, %v4741_v33  ;;  %vm3816_vm5 = vcmp.eq.f32.partialorder %v7259_v52, %v3814_v37  ;;  %v3819_v3 = vsel %vm3815_vm4, %v3818_v38, 0.0  ;;  %v6179_v37 = vld [vmem:[#allocation2 + $0x128] sm:$0xff] }
 0x30c   : > { %vm3823_vm7 = vcmp.eq.f32.partialorder %v7261_v53, %v3822_v43  ;;  %v3926_v4 = vsel %vm2344_vm6, %v3852_v63, 0  ;;  %vm3824_vm8 = vcmp.eq.f32.partialorder %v7259_v52, %v3822_v43  ;;  %v3820_v7 = vsel %vm3816_vm5, %v3818_v38, 0.0  ;;  %v6161_v38 = vld [vmem:[#allocation2 + $0x98] sm:$0xff]  ;;  %v7457_v43 = vpop.permute.xlu2 %2474 }
 0x30d   : > { %v4150_v5 = vpack.c.bf16 %v4130_v39, %v4130_v39  ;;  %v3827_v25 = vsel %vm3823_vm7, %v3826_v47, 0.0  ;;  %3934 = vmatpush.bf16.msra.mxu2 %v3926_v4  ;;  %v4772_v6 = vpack.c.bf16 %v4752_v1, %v4752_v1  ;;  %v3828_v8 = vsel %vm3824_vm8, %v3826_v47, 0.0  ;;  %v7463_v47 = vpop.permute.xlu0 %2449 }
 0x30e   : > { %v3830_v9 = vadd.f32 %v3827_v25, %v3819_v3  ;;  %v3831_v11 = vadd.f32 %v3828_v8, %v3820_v7  ;;  %vm4113_vm9 = vcmp.eq.f32.partialorder %v7261_v53, %v4112_v49  ;;  %vm4114_vm10 = vcmp.eq.f32.partialorder %v7259_v52, %v4112_v49  ;;  %9327 = vst [vmem:[#allocation16_spill] sm:$0xff] %v7463_v47  ;;  %v6164_v7 = vld [vmem:[#allocation2 + $0xb0] sm:$0xff] }
 0x30f   : > { %v4224_v10 = vsel %vm2344_vm6, %v4150_v5, 0  ;;  %v4846_v14 = vsel %vm2344_vm6, %v4772_v6, 0  ;;  %v4117_v15 = vsel %vm4113_vm9, %v4116_v51, 0.0  ;;  %vm4121_vm12 = vcmp.eq.f32.partialorder %v7261_v53, %v4120_v54  ;;  %v6155_v5 = vld [vmem:[#allocation2 + $0x68] sm:$0xff]  ;;  %v6182_v6 = vld [vmem:[#allocation2 + $0x140] sm:$0xff]  ;;  %v6176_v8 = vld [vmem:[#allocation2 + $0x110] sm:$0xff] }
 0x310   : > { %4232 = vmatpush.bf16.msra.mxu3 %v4224_v10  ;;  %vm4122_vm13 = vcmp.eq.f32.partialorder %v7259_v52, %v4120_v54  ;;  %4854 = vmatpush.bf16.msra.mxu1 %v4846_v14  ;;  %v3851_v16 = vpack.c.bf16 %v3831_v11, %v3830_v9  ;;  %v4118_v17 = vsel %vm4114_vm10, %v4116_v51, 0.0  ;;  %v4125_v18 = vsel %vm4121_vm12, %v4124_v61, 0.0  ;;  %v7469_v51 = vpop.permute.xlu1 %2479 }
 0x311   : > { %v4126_v19 = vsel %vm4122_vm13, %v4124_v61, 0.0  ;;  %v4128_v20 = vadd.f32 %v4125_v18, %v4117_v15  ;;  %vm4735_vm14 = vcmp.eq.f32.partialorder %v7261_v53, %v7252_v48  ;;  %vm4736_vm15 = vcmp.eq.f32.partialorder %v7259_v52, %v7252_v48  ;;  %v6144_v48 = vld [vmem:[#allocation2 + $0x10] sm:$0xff]  ;;  %9329 = vst [vmem:[#allocation18_spill] sm:$0xff] %v7469_v51 }
 0x312   : > { %v4129_v21 = vadd.f32 %v4126_v19, %v4118_v17  ;;  %3935 = vmatpush.bf16.msra.mxu2 %v3851_v16  ;;  %v4739_v23 = vsel %vm4735_vm14, %v7268_v60, 0.0  ;;  %vm4743_vm6 = vcmp.eq.f32.partialorder %v7261_v53, %v7263_v56  ;;  %vm4744_vm0 = vcmp.eq.f32.partialorder %v7259_v52, %v7263_v56  ;;  %v6151_v52 = vld [vmem:[#allocation2 + $0x48] sm:$0xff]  ;;  %v6178_v53 = vld [vmem:[#allocation2 + $0x120] sm:$0xff]  ;;  %v6160_v56 = vld [vmem:[#allocation2 + $0x90] sm:$0xff] }
 0x313   : > { %v4740_v26 = vsel %vm4736_vm15, %v7268_v60, 0.0  ;;  %v4747_v27 = vsel %vm4743_vm6, %v7271_v2, 0.0  ;;  %v4748_v28 = vsel %vm4744_vm0, %v7271_v2, 0.0  ;;  %v6172_v60 = vld [vmem:[#allocation2 + $0xf0] sm:$0xff]  ;;  %v2191_v54 = vadd.f32 %v2166_v50, %v7226_v12 }
 0x314   : > { %v4149_v24 = vpack.c.bf16 %v4129_v21, %v4128_v20  ;;  %v4750_v30 = vadd.f32 %v4747_v27, %v4739_v23  ;;  %v4751_v31 = vadd.f32 %v4748_v28, %v4740_v26  ;;  %v6152_v2 = vld [vmem:[#allocation2 + $0x50] sm:$0xff]  ;;  %v7465_v49 = vpop.permute.xlu2 %2469 }
 0x315   : > { %9328 = vst [vmem:[#allocation17_spill] sm:$0xff] %v7465_v49  ;;  %v2193_v61 = vfloor.f32 %v2191_v54  ;;  %v7472_v62 = vpop.permute.xlu0 %2434  ;;  %v2205_v39 = vmax.f32 %v2191_v54, 0.0 }
 0x316   : > { %4233 = vmatpush.bf16.msra.mxu3 %v4149_v24  ;;  %v4771_v34 = vpack.c.bf16 %v4751_v31, %v4750_v30 }
 0x317   : > { %v2197_v29 = vadd.f32 1.0, %v2193_v61  ;;  %v2195_v12 = vmax.f32 %v2193_v61, 0.0  ;;  %v2206_v25 = vmin.f32 %v2205_v39, 17.0 }
 0x318   : > { %4855 = vmatpush.bf16.msra.mxu1 %v4771_v34  ;;  %5691 = vmatmul.msk.bf16.gmra.mxu2 %vm2316_vm11, %v6147_v32  ;;  %v7480_v33 = vpop.permute.xlu1 %2459 }
 0x319   : > { %5688 = vmatmul.msk.bf16.gmra.mxu1 %vm2316_vm11, %v6144_v48  ;;  %9331 = vst [vmem:[#allocation20_spill] sm:$0xff] %v7480_v33  ;;  %v2198_v63 = vmax.f32 %v2197_v29, 0.0  ;;  %v7486_v3 = vmin.f32 %v2195_v12, 17.0 }
 0x31a   : > { %5694 = vmatmul.msk.bf16.gmra.mxu3 %vm2316_vm11, %v6150_v35  ;;  %5823 = vmatmul.msk.bf16.gmra.mxu0 %vm2316_vm11, %v6171_v36  ;;  %v6156_v35 = vld [vmem:[#allocation2 + $0x70] sm:$0xff] }
 0x31b   : > { %9333 = vst [vmem:[#allocation22_spill] sm:$0xff] %v7486_v3  ;;  %v7488_v4 = vmin.f32 %v2198_v63, 17.0  ;;  %v2209_v9 = vsub.f32 %v7486_v3, %v2206_v25  ;;  %v7505_v17 = vperm.slane %v7486_v3, 0  ;;  %v7513_v20 = vperm.slane %v7486_v3, 3 }
 0x31c   : > { %v7475_v22 = vpop.permute.xlu2 %2454 }
 0x31d   : > { %9330 = vst [vmem:[#allocation19_spill] sm:$0xff] %v7475_v22  ;;  %v7482_v0 = vpop.permute.xlu0 %2419  ;;  %v2211_v10 = vsub.f32 %v7488_v4, %v2206_v25  ;;  %v7498_v14 = vadd.f32 1.0, %v2209_v9  ;;  %v7508_v18 = vperm.slane %v7488_v4, 0  ;;  %v7516_v21 = vperm.slane %v7488_v4, 3 }
 0x31e   : > { %9334 = vst [vmem:[#allocation23_spill] sm:$0xff] %v7488_v4  ;;  %vm2499_vm5 = vcmp.eq.f32.partialorder %v7472_v62, %v7505_v17  ;;  %vm2505_vm12 = vcmp.eq.f32.partialorder %v7455_v41, %v7505_v17 }
 0x31f   : > { %9336 = vst [vmem:[#allocation25_spill] sm:$0xff] %v7498_v14  ;;  %v7500_v15 = vsub.f32 1.0, %v2211_v10  ;;  %v7523_v23 = vperm.slane %v7498_v14, 0  ;;  %v7533_v26 = vperm.slane %v7498_v14, 3  ;;  %vm2537_vm7 = vcmp.eq.f32.partialorder %v7472_v62, %v7508_v18 }
 0x320   : > { %v7492_v11 = vpop.permute.xlu1 %2444  ;;  %vm2543_vm8 = vcmp.eq.f32.partialorder %v7455_v41, %v7508_v18  ;;  %v6168_v41 = vld [vmem:[#allocation2 + $0xd0] sm:$0xff] }
 0x321   : > { %9335 = vst [vmem:[#allocation24_spill] sm:$0xff] %v7492_v11  ;;  %v7526_v24 = vperm.slane %v7500_v15, 0  ;;  %v7536_v27 = vperm.slane %v7500_v15, 3 }
 0x322   : > { %9337 = vst [vmem:[#allocation26_spill] sm:$0xff] %v7500_v15 }
 0x324   : > { %v7484_v1 = vpop.permute.xlu2 %2439 }
 0x325   : > { %9332 = vst [vmem:[#allocation21_spill] sm:$0xff] %v7484_v1  ;;  %v7502_v16 = vpop.permute.xlu0 %2404  ;;  %vm2538_vm15 = vcmp.eq.f32.partialorder %v7484_v1, %v7508_v18 }
 0x326   : > { %9338 = vst [vmem:[#allocation27_spill] sm:$0xff] %v7502_v16  ;;  %vm2493_vm1 = vcmp.eq.f32.partialorder %v7502_v16, %v7505_v17  ;;  %vm2531_vm2 = vcmp.eq.f32.partialorder %v7502_v16, %v7508_v18  ;;  %vm3387_vm3 = vcmp.eq.f32.partialorder %v7502_v16, %v7513_v20  ;;  %vm3425_vm4 = vcmp.eq.f32.partialorder %v7502_v16, %v7516_v21 }
 0x327   : > { %v2512_v30 = vsel %vm2493_vm1, %v7523_v23, 0.0  ;;  %v2550_v31 = vsel %vm2531_vm2, %v7526_v24, 0.0  ;;  %v3406_v32 = vsel %vm3387_vm3, %v7533_v26, 0.0  ;;  %v3444_v48 = vsel %vm3425_vm4, %v7536_v27, 0.0 }
 0x328   : > { %5731 = vmatmul.msk.bf16.vlgmr.msrb.gmra.mxu2 %vm2316_vm11, %v6151_v52  ;;  %v7538_v28 = vpop.permute.xlu1 %2429  ;;  %v2568_v34 = vadd.f32 %v2550_v31, %v2512_v30  ;;  %v3462_v52 = vadd.f32 %v3444_v48, %v3406_v32  ;;  %v2557_v10 = vsel %vm2538_vm15, %v7526_v24, 0.0  ;;  %vm2500_vm3 = vcmp.eq.f32.partialorder %v7484_v1, %v7505_v17 }
 0x329   : > { %5866 = vmatmul.msk.bf16.vlgmr.msrb.gmra.mxu1 %vm2316_vm11, %v6178_v53  ;;  %v6183_v53 = vld [vmem:[#allocation2 + $0x148] sm:$0xff]  ;;  %vm2544_vm4 = vcmp.eq.f32.partialorder %v7465_v49, %v7508_v18  ;;  %v2519_v30 = vsel %vm2500_vm3, %v7523_v23, 0.0  ;;  %vm2507_vm15 = vcmp.eq.f32.partialorder %v7457_v43, %v7505_v17  ;;  %vm2508_vm3 = vcmp.eq.f32.partialorder %v7469_v51, %v7505_v17 }
 0x32a   : > { %5776 = vmatmul.msk.bf16.vlgmr.msrb.gmra.mxu3 %vm2316_vm11, %v6160_v56  ;;  %5824 = vmatmul.msk.bf16.gmra.mxu0 %vm2316_vm11, %v6172_v60  ;;  %v2563_v31 = vsel %vm2544_vm4, %v7526_v24, 0.0 }
 0x32c   : > { %v7510_v19 = vpop.permute.xlu2 %2424 }
 0x32d   : > { %vm3429_vm4 = vcmp.eq.f32.partialorder %v7510_v19, %v7516_v21 }
 0x338   : > { %5732 = vmatmul.msk.bf16.gmra.mxu2 %vm2316_vm11, %v6152_v2  ;;  %v6165_v2 = vld [vmem:[#allocation2 + $0xb8] sm:$0xff] }
 0x339   : > { %5867 = vmatmul.msk.bf16.gmra.mxu1 %vm2316_vm11, %v6179_v37  ;;  %v6177_v37 = vld [vmem:[#allocation2 + $0x118] sm:$0xff] }
 0x33a   : > { %5777 = vmatmul.msk.bf16.gmra.mxu3 %vm2316_vm11, %v6161_v38  ;;  %5825 = vmatmul.msk.bf16.gmra.mxu0 %vm2316_vm11, %v6173_v40  ;;  %v7550_v38 = vpop.permute.xlu2 %2409 }
 0x33b   : > { %9339 = vst [vmem:[#allocation28_spill] sm:$0xff] %v7550_v38  ;;  %vm2532_vm9 = vcmp.eq.f32.partialorder %v7550_v38, %v7508_v18  ;;  %vm3426_vm10 = vcmp.eq.f32.partialorder %v7550_v38, %v7516_v21  ;;  %vm2494_vm13 = vcmp.eq.f32.partialorder %v7550_v38, %v7505_v17  ;;  %vm3388_vm14 = vcmp.eq.f32.partialorder %v7550_v38, %v7513_v20 }
 0x33c   : > { %v3445_v54 = vsel %vm3426_vm10, %v7536_v27, 0.0  ;;  %v3407_v63 = vsel %vm3388_vm14, %v7533_v26, 0.0  ;;  %vm2501_vm10 = vcmp.eq.f32.partialorder %v7492_v11, %v7505_v17  ;;  %vm3428_vm14 = vcmp.eq.f32.partialorder %v7482_v0, %v7516_v21 }
 0x33d   : > { %v3463_v25 = vadd.f32 %v3445_v54, %v3407_v63 }
 0x348   : > { %5733 = vmatmul.msk.bf16.gmra.mxu2 %vm2316_vm11, %v6153_v42  ;;  %v2556_v42 = vsel %vm2537_vm7, %v7526_v24, 0.0  ;;  %vm2539_vm7 = vcmp.eq.f32.partialorder %v7492_v11, %v7508_v18 }
 0x349   : > { %5868 = vmatmul.msk.bf16.gmra.mxu1 %vm2316_vm11, %v6180_v44  ;;  %v2518_v44 = vsel %vm2499_vm5, %v7523_v23, 0.0  ;;  %vm2506_vm5 = vcmp.eq.f32.partialorder %v7465_v49, %v7505_v17 }
 0x34a   : > { %5778 = vmatmul.msk.bf16.gmra.mxu3 %vm2316_vm11, %v6162_v45  ;;  %5826 = vmatmul.msk.bf16.gmra.mxu0 %vm2316_vm11, %v6174_v46  ;;  %v2562_v45 = vsel %vm2543_vm8, %v7526_v24, 0.0  ;;  %v2551_v46 = vsel %vm2532_vm9, %v7526_v24, 0.0  ;;  %v2574_v50 = vadd.f32 %v2556_v42, %v2518_v44  ;;  %v6157_v42 = vld [vmem:[#allocation2 + $0x78] sm:$0xff]  ;;  %vm2496_vm8 = vcmp.eq.f32.partialorder %v7482_v0, %v7505_v17 }
 0x34b   : > { %vm2534_vm9 = vcmp.eq.f32.partialorder %v7482_v0, %v7508_v18 }
 0x358   : > { %5734 = vmatmul.msk.bf16.gmra.mxu2 %vm2316_vm11, %v6154_v55  ;;  %v7573_v55 = vpop.permute.xlu1 %2414 }
 0x359   : > { %5869 = vmatmul.msk.bf16.gmra.mxu1 %vm2316_vm11, %v6181_v57  ;;  %vm2495_vm6 = vcmp.eq.f32.partialorder %v7573_v55, %v7505_v17  ;;  %vm2533_vm0 = vcmp.eq.f32.partialorder %v7573_v55, %v7508_v18  ;;  %vm3389_vm1 = vcmp.eq.f32.partialorder %v7573_v55, %v7513_v20  ;;  %vm3427_vm2 = vcmp.eq.f32.partialorder %v7573_v55, %v7516_v21 }
 0x35a   : > { %5779 = vmatmul.msk.bf16.gmra.mxu3 %vm2316_vm11, %v6163_v58  ;;  %5827 = vmatmul.msk.bf16.gmra.mxu0 %vm2316_vm11, %v6175_v59  ;;  %v2524_v58 = vsel %vm2505_vm12, %v7523_v23, 0.0  ;;  %v2513_v59 = vsel %vm2494_vm13, %v7523_v23, 0.0  ;;  %v2514_v32 = vsel %vm2495_vm6, %v7523_v23, 0.0  ;;  %v2552_v48 = vsel %vm2533_vm0, %v7526_v24, 0.0 }
 0x35b   : > { %v2580_v29 = vadd.f32 %v2562_v45, %v2524_v58  ;;  %v2569_v12 = vadd.f32 %v2551_v46, %v2513_v59  ;;  %v6166_v58 = vld [vmem:[#allocation2 + $0xc0] sm:$0xff]  ;;  %v6205_v59 = vld [vmem:[#allocation2 + $0x1f8] sm:$0xff]  ;;  %vm2545_vm12 = vcmp.eq.f32.partialorder %v7457_v43, %v7508_v18  ;;  %vm3390_vm13 = vcmp.eq.f32.partialorder %v7482_v0, %v7513_v20 }
 0x35c   : > { %vm2540_vm6 = vcmp.eq.f32.partialorder %v7463_v47, %v7508_v18  ;;  %vm2502_vm0 = vcmp.eq.f32.partialorder %v7463_v47, %v7505_v17 }
 0x368   : > { %5735 = vmatmul.msk.bf16.gmra.mxu2 %vm2316_vm11, %v6155_v5 }
 0x369   : > { %5870 = vmatmul.msk.bf16.gmra.mxu1 %vm2316_vm11, %v6182_v6 }
 0x36a   : > { %5780 = vmatmul.msk.bf16.gmra.mxu3 %vm2316_vm11, %v6164_v7  ;;  %5828 = vmatmul.msk.bf16.gmra.mxu0 %vm2316_vm11, %v6176_v8 }
 0x375   : > { %v2357_v36 = vpop.f32.mrf.mxu1 }
 0x376   : > { %v7544_v56 = vmul.f32 %v2568_v34, %v2357_v36  ;;  %v3341_v60 = vpop.f32.mrf.mxu0  ;;  %v2575_v34 = vadd.f32 %v2557_v10, %v2519_v30  ;;  %v3446_v36 = vsel %vm3427_vm2, %v7536_v27, 0.0  ;;  %vm2535_vm2 = vcmp.eq.f32.partialorder %v7510_v19, %v7508_v18 }
 0x377   : > { %v7552_v40 = vmul.f32 %v3462_v52, %v3341_v60 }
 0x378   : > { %5736 = vmatmul.msk.bf16.gmra.mxu2 %vm2316_vm11, %v6156_v35  ;;  %v3408_v35 = vsel %vm3389_vm1, %v7533_v26, 0.0  ;;  %vm2546_vm1 = vcmp.eq.f32.partialorder %v7469_v51, %v7508_v18 }
 0x379   : > { %5871 = vmatmul.msk.bf16.gmra.mxu1 %vm2316_vm11, %v6183_v53  ;;  %v2525_v53 = vsel %vm2506_vm5, %v7523_v23, 0.0  ;;  %v3464_v46 = vadd.f32 %v3446_v36, %v3408_v35  ;;  %vm2497_vm5 = vcmp.eq.f32.partialorder %v7510_v19, %v7505_v17 }
 0x37a   : > { %5781 = vmatmul.msk.bf16.gmra.mxu3 %vm2316_vm11, %v6165_v2  ;;  %5829 = vmatmul.msk.bf16.gmra.mxu0 %vm2316_vm11, %v6177_v37  ;;  %v2581_v2 = vadd.f32 %v2563_v31, %v2525_v53  ;;  %v2570_v37 = vadd.f32 %v2552_v48, %v2514_v32  ;;  %v2526_v31 = vsel %vm2507_vm15, %v7523_v23, 0.0  ;;  %v3409_v32 = vsel %vm3390_vm13, %v7533_v26, 0.0 }
 0x37b   : > { %v2372_v57 = vpop.f32.mrf.mxu2  ;;  %v3447_v48 = vsel %vm3428_vm14, %v7536_v27, 0.0  ;;  %vm2536_vm13 = vcmp.eq.f32.partialorder %v7538_v28, %v7508_v18  ;;  %vm3392_vm14 = vcmp.eq.f32.partialorder %v7538_v28, %v7513_v20  ;;  %vm3430_vm15 = vcmp.eq.f32.partialorder %v7538_v28, %v7516_v21 }
 0x37c   : > { %v7579_v61 = vmul.f32 %v2574_v50, %v2372_v57  ;;  %v6184_v50 = vld [vmem:[#allocation2 + $0x150] sm:$0xff] }
 0x37d   : > { %v2387_v39 = vpop.f32.mrf.mxu3  ;;  %v2359_v5 = vpop.f32.mrf.mxu1 }
 0x37e   : > { %v7584_v6 = vmul.f32 %v2580_v29, %v2387_v39  ;;  %v7586_v7 = vmul.f32 %v2569_v12, %v2359_v5  ;;  %v3343_v8 = vpop.f32.mrf.mxu0  ;;  %v2558_v12 = vsel %vm2539_vm7, %v7526_v24, 0.0  ;;  %v2520_v39 = vsel %vm2501_vm10, %v7523_v23, 0.0 }
 0x37f   : > { %v7592_v9 = vmul.f32 %v3463_v25, %v3343_v8  ;;  %v2564_v5 = vsel %vm2545_vm12, %v7526_v24, 0.0  ;;  %v2515_v25 = vsel %vm2496_vm8, %v7523_v23, 0.0  ;;  %v2553_v8 = vsel %vm2534_vm9, %v7526_v24, 0.0 }
 0x380   : > { %9340 = vst [vmem:[#allocation29_spill] sm:$0xff] %v7584_v6  ;;  %v2576_v10 = vadd.f32 %v2558_v12, %v2520_v39  ;;  %v2582_v35 = vadd.f32 %v2564_v5, %v2526_v31  ;;  %v2571_v36 = vadd.f32 %v2553_v8, %v2515_v25  ;;  %v2527_v39 = vsel %vm2508_vm3, %v7523_v23, 0.0 }
 0x381   : > { %v3448_v5 = vsel %vm3429_vm4, %v7536_v27, 0.0  ;;  %vm3391_vm7 = vcmp.eq.f32.partialorder %v7510_v19, %v7513_v20  ;;  %vm2541_vm8 = vcmp.eq.f32.partialorder %v7475_v22, %v7508_v18  ;;  %vm2503_vm9 = vcmp.eq.f32.partialorder %v7475_v22, %v7505_v17 }
 0x382   : > { %vm2498_vm12 = vcmp.eq.f32.partialorder %v7538_v28, %v7505_v17  ;;  %v7794_v6 = vperm.slane %v7498_v14, 2 }
 0x383   : > { %v2374_v52 = vpop.f32.mrf.mxu2 }
 0x384   : > { %v7612_v60 = vmul.f32 %v2575_v34, %v2374_v52 }
 0x385   : > { %v2389_v44 = vpop.f32.mrf.mxu3  ;;  %v2362_v45 = vpop.f32.mrf.mxu1 }
 0x386   : > { %v7616_v54 = vmul.f32 %v2581_v2, %v2389_v44  ;;  %v7618_v57 = vmul.f32 %v2570_v37, %v2362_v45  ;;  %v2559_v45 = vsel %vm2540_vm6, %v7526_v24, 0.0 }
 0x387   : > { %v3346_v29 = vpop.f32.mrf.mxu0 }
 0x388   : > { %9341 = vst [vmem:[#allocation30_spill] sm:$0xff] %v7616_v54  ;;  %v7627_v63 = vmul.f32 %v3464_v46, %v3346_v29  ;;  %5737 = vmatmul.msk.bf16.gmra.mxu2 %vm2316_vm11, %v6157_v42  ;;  %v3465_v42 = vadd.f32 %v3447_v48, %v3409_v32  ;;  %v2554_v29 = vsel %vm2535_vm2, %v7526_v24, 0.0  ;;  %v3410_v48 = vsel %vm3391_vm7, %v7533_v26, 0.0 }
 0x389   : > { %5872 = vmatmul.msk.bf16.gmra.mxu1 %vm2316_vm11, %v6184_v50  ;;  %v2521_v50 = vsel %vm2502_vm0, %v7523_v23, 0.0  ;;  %vm2542_vm0 = vcmp.eq.f32.partialorder %v7480_v33, %v7508_v18  ;;  %vm3393_vm7 = vcmp.eq.f32.partialorder %v7472_v62, %v7513_v20  ;;  %v7791_v54 = vperm.slane %v7500_v15, 1 }
 0x38a   : > { %5782 = vmatmul.msk.bf16.gmra.mxu3 %vm2316_vm11, %v6166_v58  ;;  %6001 = vmatmul.msk.bf16.vlgmr.msra.gmra.mxu0 %vm2316_vm11, %v6205_v59  ;;  %v2565_v58 = vsel %vm2546_vm1, %v7526_v24, 0.0  ;;  %v2577_v59 = vadd.f32 %v2559_v45, %v2521_v50  ;;  %v6206_v45 = vld [vmem:[#allocation2 + $0x200] sm:$0xff] }
 0x38b   : > { %v2377_v30 = vpop.f32.mrf.mxu2  ;;  %v2583_v8 = vadd.f32 %v2565_v58, %v2527_v39 }
 0x38c   : > { %v7648_v34 = vmul.f32 %v2576_v10, %v2377_v30  ;;  %v2516_v10 = vsel %vm2497_vm5, %v7523_v23, 0.0  ;;  %v6158_v30 = vld [vmem:[#allocation2 + $0x80] sm:$0xff]  ;;  %vm2504_vm5 = vcmp.eq.f32.partialorder %v7480_v33, %v7505_v17 }
 0x38d   : > { %v2392_v52 = vpop.f32.mrf.mxu3  ;;  %v2364_v53 = vpop.f32.mrf.mxu1  ;;  %v2572_v32 = vadd.f32 %v2554_v29, %v2516_v10  ;;  %v3449_v10 = vsel %vm3430_vm15, %v7536_v27, 0.0  ;;  %vm3432_vm15 = vcmp.eq.f32.partialorder %v7484_v1, %v7516_v21 }
 0x38e   : > { %v7650_v2 = vmul.f32 %v2582_v35, %v2392_v52  ;;  %v7652_v37 = vmul.f32 %v2571_v36, %v2364_v53  ;;  %v6185_v35 = vld [vmem:[#allocation2 + $0x158] sm:$0xff]  ;;  %v7682_v36 = vpop.permute.xlu2 %2484 }
 0x38f   : > { %v3348_v44 = vpop.f32.mrf.mxu0  ;;  %9344 = vst [vmem:[#allocation33_spill] sm:$0xff] %v7682_v36  ;;  %vm2547_vm10 = vcmp.eq.f32.partialorder %v7682_v36, %v7508_v18  ;;  %vm2509_vm6 = vcmp.eq.f32.partialorder %v7682_v36, %v7505_v17  ;;  %v6208_v36 = vld [vmem:[#allocation2 + $0x210] sm:$0xff] }
 0x390   : > { %9342 = vst [vmem:[#allocation31_spill] sm:$0xff] %v7650_v2  ;;  %v7657_v46 = vmul.f32 %v3465_v42, %v3348_v44  ;;  %v3466_v42 = vadd.f32 %v3448_v5, %v3410_v48  ;;  %v6167_v44 = vld [vmem:[#allocation2 + $0xc8] sm:$0xff]  ;;  %v2566_v39 = vsel %vm2547_vm10, %v7526_v24, 0.0  ;;  %v2561_v2 = vsel %vm2542_vm0, %v7526_v24, 0.0 }
 0x391   : > { %vm3394_vm0 = vcmp.eq.f32.partialorder %v7484_v1, %v7513_v20 }
 0x393   : > { %v2379_v12 = vpop.f32.mrf.mxu2 }
 0x394   : > { %v7676_v25 = vmul.f32 %v2577_v59, %v2379_v12  ;;  %v2560_v59 = vsel %vm2541_vm8, %v7526_v24, 0.0  ;;  %v2522_v12 = vsel %vm2503_vm9, %v7523_v23, 0.0  ;;  %vm3431_vm8 = vcmp.eq.f32.partialorder %v7472_v62, %v7516_v21 }
 0x395   : > { %v2394_v31 = vpop.f32.mrf.mxu3  ;;  %v2578_v5 = vadd.f32 %v2560_v59, %v2522_v12  ;;  %v7738_v59 = vperm.slane %v7488_v4, 4 }
 0x396   : > { %9343 = vst [vmem:[#allocation32_spill] sm:$0xff] %v7676_v25  ;;  %v7684_v52 = vmul.f32 %v2583_v8, %v2394_v31  ;;  %v2367_v53 = vpop.f32.mrf.mxu1  ;;  %v2555_v8 = vsel %vm2536_vm13, %v7526_v24, 0.0  ;;  %v7719_v31 = vperm.slane %v7486_v3, 4  ;;  %v6196_v25 = vld [vmem:[#allocation2 + $0x1b0] sm:$0xff] }
 0x397   : > { %v7688_v50 = vmul.f32 %v2572_v32, %v2367_v53  ;;  %v3351_v58 = vpop.f32.mrf.mxu0  ;;  %v7721_v32 = vpop.permute.xlu1 %2489  ;;  %vm3723_vm4 = vcmp.eq.f32.partialorder %v7502_v16, %v7738_v59 }
 0x398   : > { %9345 = vst [vmem:[#allocation34_spill] sm:$0xff] %v7684_v52  ;;  %v7695_v29 = vmul.f32 %v3466_v42, %v3351_v58  ;;  %5738 = vmatmul.msk.bf16.gmra.mxu2 %vm2316_vm11, %v6158_v30  ;;  %v7716_v30 = vperm.slane %v7486_v3, 1  ;;  %v7735_v58 = vperm.slane %v7488_v4, 1  ;;  %vm2510_vm1 = vcmp.eq.f32.partialorder %v7721_v32, %v7505_v17 }
 0x399   : > { %5873 = vmatmul.msk.bf16.gmra.mxu1 %vm2316_vm11, %v6185_v35  ;;  %9346 = vst [vmem:[#allocation35_spill] sm:$0xff] %v7721_v32  ;;  %v2528_v35 = vsel %vm2509_vm6, %v7523_v23, 0.0  ;;  %vm2548_vm2 = vcmp.eq.f32.partialorder %v7721_v32, %v7508_v18  ;;  %vm3685_vm3 = vcmp.eq.f32.partialorder %v7502_v16, %v7719_v31  ;;  %v2523_v18 = vsel %vm2504_vm5, %v7523_v23, 0.0 }
 0x39a   : > { %5783 = vmatmul.msk.bf16.gmra.mxu3 %vm2316_vm11, %v6167_v44  ;;  %6002 = vmatmul.msk.bf16.gmra.mxu0 %vm2316_vm11, %v6206_v45  ;;  %v2584_v42 = vadd.f32 %v2566_v39, %v2528_v35  ;;  %v2517_v44 = vsel %vm2498_vm12, %v7523_v23, 0.0  ;;  %v3411_v45 = vsel %vm3392_vm14, %v7533_v26, 0.0  ;;  %v7778_v17 = vperm.slane %v7486_v3, 2 }
 0x39b   : > { %v2382_v48 = vpop.f32.mrf.mxu2  ;;  %vm2791_vm9 = vcmp.eq.f32.partialorder %v7502_v16, %v7716_v30  ;;  %vm2829_vm10 = vcmp.eq.f32.partialorder %v7502_v16, %v7735_v58  ;;  %vm3724_vm14 = vcmp.eq.f32.partialorder %v7550_v38, %v7738_v59  ;;  %vm3686_vm6 = vcmp.eq.f32.partialorder %v7550_v38, %v7719_v31 }
 0x39c   : > { %v7724_v53 = vmul.f32 %v2578_v5, %v2382_v48  ;;  %v2573_v5 = vadd.f32 %v2555_v8, %v2517_v44  ;;  %v3467_v48 = vadd.f32 %v3449_v10, %v3411_v45  ;;  %v7756_v8 = vperm.slane %v7498_v14, 4 }
 0x39d   : > { %v2397_v12 = vpop.f32.mrf.mxu3  ;;  %v7759_v10 = vperm.slane %v7500_v15, 4  ;;  %v2529_v44 = vsel %vm2510_vm1, %v7523_v23, 0.0  ;;  %v2567_v45 = vsel %vm2548_vm2, %v7526_v24, 0.0  ;;  %v7781_v23 = vperm.slane %v7488_v4, 2  ;;  %v6207_v4 = vld [vmem:[#allocation2 + $0x208] sm:$0xff] }
 0x39e   : > { %9347 = vst [vmem:[#allocation36_spill] sm:$0xff] %v7724_v53  ;;  %v7740_v39 = vmul.f32 %v2584_v42, %v2397_v12  ;;  %v2369_v35 = vpop.f32.mrf.mxu1  ;;  %v2579_v12 = vadd.f32 %v2561_v2, %v2523_v18  ;;  %v2585_v18 = vadd.f32 %v2567_v45, %v2529_v44  ;;  %v6186_v45 = vld [vmem:[#allocation2 + $0x160] sm:$0xff]  ;;  %vm3089_vm12 = vcmp.eq.f32.partialorder %v7502_v16, %v7778_v17 }
 0x39f   : > { %v7748_v13 = vmul.f32 %v2573_v5, %v2369_v35  ;;  %v3353_v52 = vpop.f32.mrf.mxu0  ;;  %v3704_v5 = vsel %vm3685_vm3, %v7756_v8, 0.0  ;;  %v3450_v35 = vsel %vm3431_vm8, %v7536_v27, 0.0  ;;  %vm3127_vm13 = vcmp.eq.f32.partialorder %v7502_v16, %v7781_v23 }
 0x3a0   : > { %9348 = vst [vmem:[#allocation37_spill] sm:$0xff] %v7740_v39  ;;  %v7761_v42 = vmul.f32 %v3467_v48, %v3353_v52  ;;  %v3742_v52 = vsel %vm3723_vm4, %v7759_v10, 0.0  ;;  %v7775_v48 = vperm.slane %v7498_v14, 1  ;;  %v6159_v39 = vld [vmem:[#allocation2 + $0x88] sm:$0xff]  ;;  %v7807_v14 = vperm.slane %v7500_v15, 2 }
 0x3a1   : > { %v3760_v44 = vadd.f32 %v3742_v52, %v3704_v5  ;;  %v2848_v5 = vsel %vm2829_vm10, %v7791_v54, 0.0  ;;  %vm2792_vm1 = vcmp.eq.f32.partialorder %v7550_v38, %v7716_v30  ;;  %vm2830_vm2 = vcmp.eq.f32.partialorder %v7550_v38, %v7735_v58 }
 0x3a2   : > { %v2811_v16 = vsel %vm2792_vm1, %v7775_v48, 0.0  ;;  %vm3687_vm3 = vcmp.eq.f32.partialorder %v7573_v55, %v7719_v31  ;;  %vm3725_vm4 = vcmp.eq.f32.partialorder %v7573_v55, %v7738_v59  ;;  %vm3128_vm5 = vcmp.eq.f32.partialorder %v7550_v38, %v7781_v23 }
 0x3a3   : > { %v2384_v24 = vpop.f32.mrf.mxu2  ;;  %vm3090_vm8 = vcmp.eq.f32.partialorder %v7550_v38, %v7778_v17  ;;  %vm3395_vm10 = vcmp.eq.f32.partialorder %v7492_v11, %v7513_v20  ;;  %vm3434_vm1 = vcmp.eq.f32.partialorder %v7463_v47, %v7516_v21 }
 0x3a4   : > { %v7784_v2 = vmul.f32 %v2579_v12, %v2384_v24  ;;  %v3412_v12 = vsel %vm3393_vm7, %v7533_v26, 0.0  ;;  %vm3433_vm7 = vcmp.eq.f32.partialorder %v7492_v11, %v7516_v21 }
 0x3a5   : > { %v2399_v49 = vpop.f32.mrf.mxu3 }
 0x3a6   : > { %9349 = vst [vmem:[#allocation38_spill] sm:$0xff] %v7784_v2  ;;  %v7800_v24 = vmul.f32 %v2585_v18, %v2399_v49  ;;  %v3468_v2 = vadd.f32 %v3450_v35, %v3412_v12  ;;  %v3639_v53 = vpop.f32.mrf.mxu1  ;;  %v2810_v49 = vsel %vm2791_vm9, %v7775_v48, 0.0  ;;  %v3108_v35 = vsel %vm3089_vm12, %v7794_v6, 0.0 }
 0x3a7   : > { %v3356_v3 = vpop.f32.mrf.mxu0  ;;  %v7809_v32 = vmul.f32 %v3760_v44, %v3639_v53  ;;  %v3146_v53 = vsel %vm3127_vm13, %v7807_v14, 0.0  ;;  %v2866_v18 = vadd.f32 %v2848_v5, %v2810_v49  ;;  %vm2793_vm9 = vcmp.eq.f32.partialorder %v7573_v55, %v7716_v30 }
 0x3a8   : > { %9350 = vst [vmem:[#allocation39_spill] sm:$0xff] %v7800_v24  ;;  %v7819_v52 = vmul.f32 %v3468_v2, %v3356_v3  ;;  %5739 = vmatmul.msk.bf16.gmra.mxu2 %vm2316_vm11, %v6159_v39  ;;  %v3743_v3 = vsel %vm3724_vm14, %v7759_v10, 0.0  ;;  %v3451_v2 = vsel %vm3432_vm15, %v7536_v27, 0.0  ;;  %v3164_v44 = vadd.f32 %v3146_v53, %v3108_v35 }
 0x3a9   : > { %9351 = vst [vmem:[#allocation40_spill] sm:$0xff] %v7809_v32  ;;  %5874 = vmatmul.msk.bf16.gmra.mxu1 %vm2316_vm11, %v6186_v45  ;;  %v3413_v45 = vsel %vm3394_vm0, %v7533_v26, 0.0  ;;  %v2849_v53 = vsel %vm2830_vm2, %v7791_v54, 0.0  ;;  %vm2831_vm12 = vcmp.eq.f32.partialorder %v7573_v55, %v7735_v58  ;;  %vm3091_vm13 = vcmp.eq.f32.partialorder %v7573_v55, %v7778_v17 }
 0x3aa   : > { %5784 = vmatmul.msk.bf16.gmra.mxu3 %vm2316_vm11, %v6168_v41  ;;  %6003 = vmatmul.msk.bf16.gmra.mxu0 %vm2316_vm11, %v6207_v4  ;;  %v3705_v41 = vsel %vm3686_vm6, %v7756_v8, 0.0  ;;  %vm3129_vm14 = vcmp.eq.f32.partialorder %v7573_v55, %v7781_v23  ;;  %vm3688_vm15 = vcmp.eq.f32.partialorder %v7482_v0, %v7719_v31  ;;  %vm3726_vm6 = vcmp.eq.f32.partialorder %v7482_v0, %v7738_v59 }
 0x3ab   : > { %v2745_v39 = vpop.f32.mrf.mxu2  ;;  %v3761_v49 = vadd.f32 %v3743_v3, %v3705_v41  ;;  %vm3396_vm0 = vcmp.eq.f32.partialorder %v7463_v47, %v7513_v20  ;;  %vm2794_vm2 = vcmp.eq.f32.partialorder %v7482_v0, %v7716_v30 }
 0x3ac   : > { %v2884_v12 = vmul.f32 %v2866_v18, %v2745_v39  ;;  %v3469_v18 = vadd.f32 %v3451_v2, %v3413_v45  ;;  %v3147_v2 = vsel %vm3128_vm5, %v7807_v14, 0.0  ;;  %vm3130_vm5 = vcmp.eq.f32.partialorder %v7482_v0, %v7781_v23 }
 0x3ad   : > { %v3043_v4 = vpop.f32.mrf.mxu3 }
 0x3ae   : > { %v2902_v5 = vadd.f32 %v2884_v12, %v7544_v56  ;;  %v3182_v24 = vmul.f32 %v3164_v44, %v3043_v4  ;;  %v3641_v35 = vpop.f32.mrf.mxu1  ;;  %v2867_v56 = vadd.f32 %v2849_v53, %v2811_v16  ;;  %v3452_v12 = vsel %vm3433_vm7, %v7536_v27, 0.0 }
 0x3af   : > { %v3358_v39 = vpop.f32.mrf.mxu0  ;;  %v7845_v32 = vmul.f32 %v3761_v49, %v3641_v35  ;;  %v3744_v4 = vsel %vm3725_vm4, %v7759_v10, 0.0  ;;  %v3109_v16 = vsel %vm3090_vm8, %v7794_v6, 0.0  ;;  %vm3092_vm4 = vcmp.eq.f32.partialorder %v7482_v0, %v7778_v17 }
 0x3b0   : > { %v3200_v3 = vadd.f32 %v3182_v24, %v2902_v5  ;;  %v7852_v41 = vmul.f32 %v3469_v18, %v3358_v39  ;;  %v3706_v24 = vsel %vm3687_vm3, %v7756_v8, 0.0  ;;  %v3165_v5 = vadd.f32 %v3147_v2, %v3109_v16  ;;  %v6187_v18 = vld [vmem:[#allocation2 + $0x168] sm:$0xff] }
 0x3b1   : > { %9352 = vst [vmem:[#allocation41_spill] sm:$0xff] %v7845_v32  ;;  %v3762_v39 = vadd.f32 %v3744_v4, %v3706_v24  ;;  %v2812_v32 = vsel %vm2793_vm9, %v7775_v48, 0.0  ;;  %v3110_v4 = vsel %vm3091_vm13, %v7794_v6, 0.0  ;;  %v3148_v16 = vsel %vm3129_vm14, %v7807_v14, 0.0 }
 0x3b2   : > { %v7863_v44 = vadd.f32 %v7552_v40, %v3200_v3  ;;  %v3414_v40 = vsel %vm3395_vm10, %v7533_v26, 0.0  ;;  %v6214_v3 = vld [vmem:[#allocation2 + $0x240] sm:$0xff]  ;;  %vm2832_vm3 = vcmp.eq.f32.partialorder %v7482_v0, %v7735_v58  ;;  %vm3435_vm7 = vcmp.eq.f32.partialorder %v7475_v22, %v7516_v21 }
 0x3b3   : > { %v2747_v45 = vpop.f32.mrf.mxu2  ;;  %v3470_v53 = vadd.f32 %v3452_v12, %v3414_v40  ;;  %vm3727_vm8 = vcmp.eq.f32.partialorder %v7510_v19, %v7738_v59  ;;  %vm3397_vm9 = vcmp.eq.f32.partialorder %v7475_v22, %v7513_v20  ;;  %vm3689_vm10 = vcmp.eq.f32.partialorder %v7510_v19, %v7719_v31 }
 0x3b4   : > { %9353 = vst [vmem:[#allocation42_spill] sm:$0xff] %v7863_v44  ;;  %v2885_v49 = vmul.f32 %v2867_v56, %v2747_v45  ;;  %v2850_v56 = vsel %vm2831_vm12, %v7791_v54, 0.0  ;;  %vm2795_vm12 = vcmp.eq.f32.partialorder %v7510_v19, %v7716_v30  ;;  %vm2833_vm13 = vcmp.eq.f32.partialorder %v7510_v19, %v7735_v58 }
 0x3b5   : > { %v3045_v35 = vpop.f32.mrf.mxu3  ;;  %v2868_v45 = vadd.f32 %v2850_v56, %v2812_v32  ;;  %v3745_v32 = vsel %vm3726_vm6, %v7759_v10, 0.0  ;;  %vm3093_vm14 = vcmp.eq.f32.partialorder %v7510_v19, %v7778_v17  ;;  %vm3436_vm6 = vcmp.eq.f32.partialorder %v7480_v33, %v7516_v21 }
 0x3b6   : > { %v2903_v44 = vadd.f32 %v2885_v49, %v7586_v7  ;;  %v3183_v38 = vmul.f32 %v3165_v5, %v3045_v35  ;;  %v3644_v15 = vpop.f32.mrf.mxu1  ;;  %v3415_v5 = vsel %vm3396_vm0, %v7533_v26, 0.0  ;;  %vm3690_vm0 = vcmp.eq.f32.partialorder %v7538_v28, %v7719_v31 }
 0x3b7   : > { %v3361_v2 = vpop.f32.mrf.mxu0  ;;  %v7885_v12 = vmul.f32 %v3762_v39, %v3644_v15 }
 0x3b8   : > { %v3201_v7 = vadd.f32 %v3183_v38, %v2903_v44  ;;  %v7891_v24 = vmul.f32 %v3470_v53, %v3361_v2  ;;  %5911 = vmatmul.msk.bf16.vlgmr.msra.gmra.mxu2 %vm2316_vm11, %v6187_v18  ;;  %v3453_v38 = vsel %vm3434_vm1, %v7536_v27, 0.0  ;;  %v3707_v44 = vsel %vm3688_vm15, %v7756_v8, 0.0 }
 0x3b9   : > { %6046 = vmatmul.msk.bf16.vlgmr.msra.gmra.mxu1 %vm2316_vm11, %v6214_v3  ;;  %v3166_v18 = vadd.f32 %v3148_v16, %v3110_v4  ;;  %v2813_v2 = vsel %vm2794_vm2, %v7775_v48, 0.0  ;;  %v3149_v16 = vsel %vm3130_vm5, %v7807_v14, 0.0  ;;  %vm3131_vm15 = vcmp.eq.f32.partialorder %v7510_v19, %v7781_v23 }
 0x3ba   : > { %v7902_v15 = vadd.f32 %v7592_v9, %v3201_v7  ;;  %5956 = vmatmul.msk.bf16.vlgmr.msra.gmra.mxu3 %vm2316_vm11, %v6196_v25  ;;  %6004 = vmatmul.msk.bf16.gmra.mxu0 %vm2316_vm11, %v6208_v36  ;;  %v3471_v25 = vadd.f32 %v3453_v38, %v3415_v5  ;;  %v3763_v36 = vadd.f32 %v3745_v32, %v3707_v44  ;;  %v2851_v7 = vsel %vm2832_vm3, %v7791_v54, 0.0 }
 0x3bb   : > { %v2750_v49 = vpop.f32.mrf.mxu2  ;;  %v2869_v44 = vadd.f32 %v2851_v7, %v2813_v2  ;;  %v3454_v32 = vsel %vm3435_vm7, %v7536_v27, 0.0  ;;  %vm3728_vm1 = vcmp.eq.f32.partialorder %v7538_v28, %v7738_v59  ;;  %vm3398_vm2 = vcmp.eq.f32.partialorder %v7480_v33, %v7513_v20 }
 0x3bc   : > { %v2886_v40 = vmul.f32 %v2868_v45, %v2750_v49  ;;  %v3746_v49 = vsel %vm3727_vm8, %v7759_v10, 0.0  ;;  %vm2796_vm3 = vcmp.eq.f32.partialorder %v7538_v28, %v7716_v30  ;;  %vm3094_vm5 = vcmp.eq.f32.partialorder %v7538_v28, %v7778_v17 }
 0x3bd   : > { %v3048_v9 = vpop.f32.mrf.mxu3  ;;  %vm3132_vm7 = vcmp.eq.f32.partialorder %v7538_v28, %v7781_v23  ;;  %vm3691_vm8 = vcmp.eq.f32.partialorder %v7472_v62, %v7719_v31 }
 0x3be   : > { %v2904_v35 = vadd.f32 %v2886_v40, %v7618_v57  ;;  %v3184_v53 = vmul.f32 %v3166_v18, %v3048_v9  ;;  %v3646_v39 = vpop.f32.mrf.mxu1  ;;  %v3111_v57 = vsel %vm3092_vm4, %v7794_v6, 0.0  ;;  %v3416_v9 = vsel %vm3397_vm9, %v7533_v26, 0.0 }
 0x3bf   : > { %v3363_v3 = vpop.f32.mrf.mxu0  ;;  %v7919_v56 = vmul.f32 %v3763_v36, %v3646_v39  ;;  %v3167_v18 = vadd.f32 %v3149_v16, %v3111_v57  ;;  %v6215_v39 = vld [vmem:[#allocation2 + $0x248] sm:$0xff]  ;;  %vm2834_vm4 = vcmp.eq.f32.partialorder %v7538_v28, %v7735_v58  ;;  %vm3729_vm9 = vcmp.eq.f32.partialorder %v7472_v62, %v7738_v59 }
 0x3c0   : > { %v3202_v4 = vadd.f32 %v3184_v53, %v2904_v35  ;;  %v7923_v45 = vmul.f32 %v3471_v25, %v3363_v3  ;;  %v3708_v25 = vsel %vm3689_vm10, %v7756_v8, 0.0  ;;  %v3472_v35 = vadd.f32 %v3454_v32, %v3416_v9 }
 0x3c1   : > { %9354 = vst [vmem:[#allocation43_spill] sm:$0xff] %v7919_v56  ;;  %v3764_v53 = vadd.f32 %v3746_v49, %v3708_v25  ;;  %v6209_v56 = vld [vmem:[#allocation2 + $0x218] sm:$0xff]  ;;  %v2852_v32 = vsel %vm2833_vm13, %v7791_v54, 0.0  ;;  %v3455_v9 = vsel %vm3436_vm6, %v7536_v27, 0.0  ;;  %v3747_v25 = vsel %vm3728_vm1, %v7759_v10, 0.0 }
 0x3c2   : > { %v7932_v38 = vadd.f32 %v7627_v63, %v3202_v4  ;;  %v6188_v63 = vld [vmem:[#allocation2 + $0x170] sm:$0xff]  ;;  %v6197_v4 = vld [vmem:[#allocation2 + $0x1b8] sm:$0xff]  ;;  %vm2797_vm10 = vcmp.eq.f32.partialorder %v7472_v62, %v7716_v30  ;;  %vm3095_vm13 = vcmp.eq.f32.partialorder %v7472_v62, %v7778_v17  ;;  %vm3692_vm6 = vcmp.eq.f32.partialorder %v7484_v1, %v7719_v31 }
 0x3c3   : > { %v2752_v5 = vpop.f32.mrf.mxu2  ;;  %vm2798_vm1 = vcmp.eq.f32.partialorder %v7484_v1, %v7716_v30 }
 0x3c4   : > { %v2887_v40 = vmul.f32 %v2869_v44, %v2752_v5  ;;  %v2814_v44 = vsel %vm2795_vm12, %v7775_v48, 0.0  ;;  %vm2835_vm12 = vcmp.eq.f32.partialorder %v7472_v62, %v7735_v58 }
 0x3c5   : > { %v3050_v36 = vpop.f32.mrf.mxu3 }
 0x3c6   : > { %v2905_v3 = vadd.f32 %v2887_v40, %v7652_v37  ;;  %v3185_v2 = vmul.f32 %v3167_v18, %v3050_v36  ;;  %v3649_v7 = vpop.f32.mrf.mxu1  ;;  %v3150_v37 = vsel %vm3131_vm15, %v7807_v14, 0.0  ;;  %v2870_v18 = vadd.f32 %v2852_v32, %v2814_v44 }
 0x3c7   : > { %v3366_v57 = vpop.f32.mrf.mxu0  ;;  %v7947_v16 = vmul.f32 %v3764_v53, %v3649_v7  ;;  %v3112_v36 = vsel %vm3093_vm14, %v7794_v6, 0.0  ;;  %vm3133_vm14 = vcmp.eq.f32.partialorder %v7472_v62, %v7781_v23  ;;  %vm3730_vm15 = vcmp.eq.f32.partialorder %v7484_v1, %v7738_v59 }
 0x3c8   : > { %v3203_v49 = vadd.f32 %v3185_v2, %v2905_v3  ;;  %v7951_v5 = vmul.f32 %v3472_v35, %v3366_v57  ;;  %5912 = vmatmul.msk.bf16.gmra.mxu2 %vm2316_vm11, %v6188_v63  ;;  %v3168_v53 = vadd.f32 %v3150_v37, %v3112_v36  ;;  %v3748_v36 = vsel %vm3729_vm9, %v7759_v10, 0.0 }
 0x3c9   : > { %9355 = vst [vmem:[#allocation44_spill] sm:$0xff] %v7947_v16  ;;  %6047 = vmatmul.msk.bf16.gmra.mxu1 %vm2316_vm11, %v6215_v39  ;;  %v3709_v39 = vsel %vm3690_vm0, %v7756_v8, 0.0  ;;  %vm2836_vm0 = vcmp.eq.f32.partialorder %v7484_v1, %v7735_v58  ;;  %vm2837_vm9 = vcmp.eq.f32.partialorder %v7492_v11, %v7735_v58 }
 0x3ca   : > { %v7967_v40 = vadd.f32 %v7657_v46, %v3203_v49  ;;  %5957 = vmatmul.msk.bf16.gmra.mxu3 %vm2316_vm11, %v6197_v4  ;;  %6005 = vmatmul.msk.bf16.gmra.mxu0 %vm2316_vm11, %v6209_v56  ;;  %v3417_v46 = vsel %vm3398_vm2, %v7533_v26, 0.0  ;;  %v3765_v56 = vadd.f32 %v3747_v25, %v3709_v39  ;;  %v2853_v49 = vsel %vm2834_vm4, %v7791_v54, 0.0 }
 0x3cb   : > { %v2755_v63 = vpop.f32.mrf.mxu2  ;;  %v3473_v2 = vadd.f32 %v3455_v9, %v3417_v46  ;;  %v3151_v9 = vsel %vm3132_vm7, %v7807_v14, 0.0  ;;  %vm3134_vm2 = vcmp.eq.f32.partialorder %v7484_v1, %v7781_v23  ;;  %vm3731_vm4 = vcmp.eq.f32.partialorder %v7492_v11, %v7738_v59 }
 0x3cc   : > { %9356 = vst [vmem:[#allocation45_spill] sm:$0xff] %v7967_v40  ;;  %v2888_v35 = vmul.f32 %v2870_v18, %v2755_v63  ;;  %vm3693_vm7 = vcmp.eq.f32.partialorder %v7492_v11, %v7719_v31  ;;  %v6213_v40 = vld [vmem:[#allocation2 + $0x238] sm:$0xff] }
 0x3cd   : > { %v3053_v3 = vpop.f32.mrf.mxu3 }
 0x3ce   : > { %v2906_v7 = vadd.f32 %v2888_v35, %v7688_v50  ;;  %v3186_v4 = vmul.f32 %v3168_v53, %v3053_v3  ;;  %v3651_v57 = vpop.f32.mrf.mxu1  ;;  %v2815_v50 = vsel %vm2796_vm3, %v7775_v48, 0.0  ;;  %v3113_v53 = vsel %vm3094_vm5, %v7794_v6, 0.0 }
 0x3cf   : > { %v3368_v44 = vpop.f32.mrf.mxu0  ;;  %v7983_v32 = vmul.f32 %v3765_v56, %v3651_v57  ;;  %v2871_v63 = vadd.f32 %v2853_v49, %v2815_v50  ;;  %v3169_v39 = vadd.f32 %v3151_v9, %v3113_v53  ;;  %v3710_v3 = vsel %vm3691_vm8, %v7756_v8, 0.0 }
 0x3d0   : > { %v3204_v37 = vadd.f32 %v3186_v4, %v2906_v7  ;;  %v7986_v18 = vmul.f32 %v3473_v2, %v3368_v44  ;;  %v6189_v2 = vld [vmem:[#allocation2 + $0x178] sm:$0xff]  ;;  %v3766_v7 = vadd.f32 %v3748_v36, %v3710_v3  ;;  %v6216_v4 = vld [vmem:[#allocation2 + $0x250] sm:$0xff]  ;;  %v2854_v9 = vsel %vm2835_vm12, %v7791_v54, 0.0 }
 0x3d1   : > { %9357 = vst [vmem:[#allocation46_spill] sm:$0xff] %v7983_v32  ;;  %v3152_v36 = vsel %vm3133_vm14, %v7807_v14, 0.0  ;;  %v3749_v53 = vsel %vm3730_vm15, %v7759_v10, 0.0  ;;  %vm3096_vm3 = vcmp.eq.f32.partialorder %v7484_v1, %v7778_v17  ;;  %vm3439_vm5 = vcmp.eq.f32.partialorder %v7457_v43, %v7516_v21 }
 0x3d2   : > { %v7999_v25 = vadd.f32 %v7695_v29, %v3204_v37  ;;  %v6198_v29 = vld [vmem:[#allocation2 + $0x1c0] sm:$0xff]  ;;  %vm3401_vm8 = vcmp.eq.f32.partialorder %v7457_v43, %v7513_v20  ;;  %vm3135_vm12 = vcmp.eq.f32.partialorder %v7492_v11, %v7781_v23  ;;  %vm3732_vm14 = vcmp.eq.f32.partialorder %v7463_v47, %v7738_v59 }
 0x3d3   : > { %v2757_v35 = vpop.f32.mrf.mxu2  ;;  %v6210_v37 = vld [vmem:[#allocation2 + $0x220] sm:$0xff]  ;;  %vm3440_vm15 = vcmp.eq.f32.partialorder %v7469_v51, %v7516_v21 }
 0x3d4   : > { %9358 = vst [vmem:[#allocation47_spill] sm:$0xff] %v7999_v25  ;;  %v2889_v46 = vmul.f32 %v2871_v63, %v2757_v35 }
 0x3d5   : > { %v3055_v56 = vpop.f32.mrf.mxu3 }
 0x3d6   : > { %v2907_v57 = vadd.f32 %v2889_v46, %v7748_v13  ;;  %v3187_v44 = vmul.f32 %v3169_v39, %v3055_v56  ;;  %v3654_v32 = vpop.f32.mrf.mxu1  ;;  %v2816_v13 = vsel %vm2797_vm10, %v7775_v48, 0.0  ;;  %v3114_v39 = vsel %vm3095_vm13, %v7794_v6, 0.0 }
 0x3d7   : > { %v8009_v49 = vpop.f32.mrf.mxu0  ;;  %v8011_v50 = vmul.f32 %v3766_v7, %v3654_v32  ;;  %v2872_v35 = vadd.f32 %v2854_v9, %v2816_v13  ;;  %v3711_v56 = vsel %vm3692_vm6, %v7756_v8, 0.0  ;;  %v2855_v9 = vsel %vm2836_vm0, %v7791_v54, 0.0 }
 0x3d8   : > { %v3205_v63 = vadd.f32 %v3187_v44, %v2907_v57  ;;  %5913 = vmatmul.msk.bf16.gmra.mxu2 %vm2316_vm11, %v6189_v2  ;;  %v3170_v2 = vadd.f32 %v3152_v36, %v3114_v39  ;;  %v3153_v13 = vsel %vm3134_vm2, %v7807_v14, 0.0  ;;  %v3115_v39 = vsel %vm3096_vm3, %v7794_v6, 0.0 }
 0x3d9   : > { %9359 = vst [vmem:[#allocation48_spill] sm:$0xff] %v8011_v50  ;;  %6048 = vmatmul.msk.bf16.gmra.mxu1 %vm2316_vm11, %v6216_v4  ;;  %v6199_v50 = vld [vmem:[#allocation2 + $0x1c8] sm:$0xff]  ;;  %vm2799_vm10 = vcmp.eq.f32.partialorder %v7492_v11, %v7716_v30  ;;  %vm3097_vm13 = vcmp.eq.f32.partialorder %v7492_v11, %v7778_v17  ;;  %vm3694_vm6 = vcmp.eq.f32.partialorder %v7463_v47, %v7719_v31 }
 0x3da   : > { %v8025_v32 = vadd.f32 %v7761_v42, %v3205_v63  ;;  %5958 = vmatmul.msk.bf16.gmra.mxu3 %vm2316_vm11, %v6198_v29  ;;  %6006 = vmatmul.msk.bf16.gmra.mxu0 %vm2316_vm11, %v6210_v37  ;;  %v3767_v42 = vadd.f32 %v3749_v53, %v3711_v56  ;;  %v3750_v53 = vsel %vm3731_vm4, %v7759_v10, 0.0  ;;  %v3171_v56 = vadd.f32 %v3153_v13, %v3115_v39 }
 0x3db   : > { %v2760_v46 = vpop.f32.mrf.mxu2  ;;  %vm3402_vm0 = vcmp.eq.f32.partialorder %v7469_v51, %v7513_v20  ;;  %vm2800_vm2 = vcmp.eq.f32.partialorder %v7463_v47, %v7716_v30  ;;  %vm3136_vm3 = vcmp.eq.f32.partialorder %v7463_v47, %v7781_v23  ;;  %vm3098_vm4 = vcmp.eq.f32.partialorder %v7463_v47, %v7778_v17 }
 0x3dc   : > { %9360 = vst [vmem:[#allocation49_spill] sm:$0xff] %v8025_v32  ;;  %v2890_v3 = vmul.f32 %v2872_v35, %v2760_v46 }
 0x3dd   : > { %v3058_v7 = vpop.f32.mrf.mxu3 }
 0x3de   : > { %v2908_v4 = vadd.f32 %v2890_v3, %v7579_v61  ;;  %v3188_v57 = vmul.f32 %v3170_v2, %v3058_v7  ;;  %v3656_v44 = vpop.f32.mrf.mxu1  ;;  %v2817_v61 = vsel %vm2798_vm1, %v7775_v48, 0.0  ;;  %v3458_v3 = vsel %vm3439_vm5, %v7536_v27, 0.0  ;;  %v6190_v7 = vld [vmem:[#allocation2 + $0x180] sm:$0xff] }
 0x3df   : > { %v8037_v29 = vpop.f32.mrf.mxu0  ;;  %v8039_v37 = vmul.f32 %v3767_v42, %v3656_v44  ;;  %v2873_v35 = vadd.f32 %v2855_v9, %v2817_v61  ;;  %v6217_v44 = vld [vmem:[#allocation2 + $0x258] sm:$0xff]  ;;  %vm2838_vm1 = vcmp.eq.f32.partialorder %v7463_v47, %v7735_v58  ;;  %vm3733_vm5 = vcmp.eq.f32.partialorder %v7475_v22, %v7738_v59 }
 0x3e0   : > { %v3206_v63 = vadd.f32 %v3188_v57, %v2908_v4  ;;  %v3420_v4 = vsel %vm3401_vm8, %v7533_v26, 0.0  ;;  %vm3695_vm8 = vcmp.eq.f32.partialorder %v7475_v22, %v7719_v31 }
 0x3e1   : > { %9361 = vst [vmem:[#allocation50_spill] sm:$0xff] %v8039_v37  ;;  %v3476_v61 = vadd.f32 %v3458_v3, %v3420_v4  ;;  %v3421_v4 = vsel %vm3402_vm0, %v7533_v26, 0.0  ;;  %vm3099_vm0 = vcmp.eq.f32.partialorder %v7475_v22, %v7778_v17 }
 0x3e2   : > { %v8053_v36 = vadd.f32 %v7819_v52, %v3206_v63  ;;  %v3712_v52 = vsel %vm3693_vm7, %v7756_v8, 0.0 }
 0x3e3   : > { %v2762_v46 = vpop.f32.mrf.mxu2  ;;  %v3768_v57 = vadd.f32 %v3750_v53, %v3712_v52  ;;  %v3116_v52 = vsel %vm3097_vm13, %v7794_v6, 0.0  ;;  %vm3137_vm13 = vcmp.eq.f32.partialorder %v7475_v22, %v7781_v23 }
 0x3e4   : > { %9362 = vst [vmem:[#allocation51_spill] sm:$0xff] %v8053_v36  ;;  %v2891_v2 = vmul.f32 %v2873_v35, %v2762_v46  ;;  %v6211_v36 = vld [vmem:[#allocation2 + $0x228] sm:$0xff]  ;;  %v2856_v46 = vsel %vm2837_vm9, %v7791_v54, 0.0 }
 0x3e5   : > { %v3060_v42 = vpop.f32.mrf.mxu3 }
 0x3e6   : > { %v2909_v9 = vadd.f32 %v2891_v2, %v7612_v60  ;;  %v3189_v63 = vmul.f32 %v3171_v56, %v3060_v42  ;;  %v3659_v37 = vpop.f32.mrf.mxu1  ;;  %v2818_v60 = vsel %vm2799_vm10, %v7775_v48, 0.0  ;;  %v3751_v2 = vsel %vm3732_vm14, %v7759_v10, 0.0 }
 0x3e7   : > { %v3376_v13 = vpop.f32.mrf.mxu0  ;;  %v8069_v35 = vmul.f32 %v3768_v57, %v3659_v37  ;;  %v3154_v37 = vsel %vm3135_vm12, %v7807_v14, 0.0  ;;  %v2874_v3 = vadd.f32 %v2856_v46, %v2818_v60  ;;  %vm2839_vm10 = vcmp.eq.f32.partialorder %v7475_v22, %v7735_v58 }
 0x3e8   : > { %v3207_v39 = vadd.f32 %v3189_v63, %v2909_v9  ;;  %v8072_v32 = vmul.f32 %v3476_v61, %v3376_v13  ;;  %5914 = vmatmul.msk.bf16.gmra.mxu2 %vm2316_vm11, %v6190_v7  ;;  %v3459_v7 = vsel %vm3440_vm15, %v7536_v27, 0.0  ;;  %v3172_v42 = vadd.f32 %v3154_v37, %v3116_v52  ;;  %v9367_v52 = vld [vmem:[#allocation33_spill] sm:$0xff] }
 0x3e9   : > { %9363 = vst [vmem:[#allocation52_spill] sm:$0xff] %v8069_v35  ;;  %6049 = vmatmul.msk.bf16.gmra.mxu1 %vm2316_vm11, %v6217_v44  ;;  %v3477_v63 = vadd.f32 %v3459_v7, %v3421_v4  ;;  %vm3441_vm7 = vcmp.eq.f32.partialorder %v9367_v52, %v7516_v21  ;;  %v3752_v7 = vsel %vm3733_vm5, %v7759_v10, 0.0  ;;  %vm3403_vm9 = vcmp.eq.f32.partialorder %v9367_v52, %v7513_v20  ;;  %v6212_v35 = vld [vmem:[#allocation2 + $0x230] sm:$0xff] }
 0x3ea   : > { %v8087_v53 = vadd.f32 %v7852_v41, %v3207_v39  ;;  %5959 = vmatmul.msk.bf16.gmra.mxu3 %vm2316_vm11, %v6199_v50  ;;  %6007 = vmatmul.msk.bf16.gmra.mxu0 %vm2316_vm11, %v6211_v36  ;;  %v3713_v50 = vsel %vm3694_vm6, %v7756_v8, 0.0  ;;  %v2857_v39 = vsel %vm2838_vm1, %v7791_v54, 0.0  ;;  %vm2801_vm12 = vcmp.eq.f32.partialorder %v7475_v22, %v7716_v30  ;;  %v9377_v22 = vld [vmem:[#allocation15_spill] sm:$0xff] }
 0x3eb   : > { %v2765_v56 = vpop.f32.mrf.mxu2  ;;  %v3769_v57 = vadd.f32 %v3751_v2, %v3713_v50  ;;  %v3460_v50 = vsel %vm3441_vm7, %v7536_v27, 0.0  ;;  %vm3734_vm6 = vcmp.eq.f32.partialorder %v7480_v33, %v7738_v59  ;;  %vm3696_vm1 = vcmp.eq.f32.partialorder %v7480_v33, %v7719_v31 }
 0x3ec   : > { %9364 = vst [vmem:[#allocation53_spill] sm:$0xff] %v8087_v53  ;;  %v2892_v41 = vmul.f32 %v2874_v3, %v2765_v56  ;;  %v3155_v3 = vsel %vm3136_vm3, %v7807_v14, 0.0  ;;  %vm2840_vm3 = vcmp.eq.f32.partialorder %v7480_v33, %v7735_v58  ;;  %vm3138_vm5 = vcmp.eq.f32.partialorder %v7480_v33, %v7781_v23 }
 0x3ed   : > { %v3063_v36 = vpop.f32.mrf.mxu3 }
 0x3ee   : > { %v2910_v44 = vadd.f32 %v2892_v41, %v7648_v34  ;;  %v3190_v9 = vmul.f32 %v3172_v42, %v3063_v36  ;;  %v3661_v61 = vpop.f32.mrf.mxu1  ;;  %v2819_v34 = vsel %vm2800_vm2, %v7775_v48, 0.0  ;;  %v3117_v42 = vsel %vm3098_vm4, %v7794_v6, 0.0 }
 0x3ef   : > { %v3378_v13 = vpop.f32.mrf.mxu0  ;;  %v8105_v46 = vmul.f32 %v3769_v57, %v3661_v61  ;;  %v2875_v56 = vadd.f32 %v2857_v39, %v2819_v34  ;;  %v3173_v4 = vadd.f32 %v3155_v3, %v3117_v42  ;;  %v6191_v57 = vld [vmem:[#allocation2 + $0x188] sm:$0xff]  ;;  %v6218_v61 = vld [vmem:[#allocation2 + $0x260] sm:$0xff]  ;;  %vm3399_vm2 = vcmp.eq.f32.partialorder %v9377_v22, %v7513_v20 }
 0x3f0   : > { %v3208_v60 = vadd.f32 %v3190_v9, %v2910_v44  ;;  %v8108_v37 = vmul.f32 %v3477_v63, %v3378_v13  ;;  %v3422_v9 = vsel %vm3403_vm9, %v7533_v26, 0.0  ;;  %v9368_v13 = vld [vmem:[#allocation32_spill] sm:$0xff]  ;;  %vm2802_vm4 = vcmp.eq.f32.partialorder %v7480_v33, %v7716_v30 }
 0x3f1   : > { %9365 = vst [vmem:[#allocation54_spill] sm:$0xff] %v8105_v46  ;;  %v3478_v34 = vadd.f32 %v3460_v50, %v3422_v9  ;;  %v6200_v46 = vld [vmem:[#allocation2 + $0x1d0] sm:$0xff]  ;;  %v3753_v9 = vsel %vm3734_vm6, %v7759_v10, 0.0  ;;  %vm3437_vm9 = vcmp.eq.f32.partialorder %v9377_v22, %v7516_v21  ;;  %vm3139_vm6 = vcmp.eq.f32.partialorder %v9377_v22, %v7781_v23 }
 0x3f2   : > { %v8121_v2 = vadd.f32 %v7891_v24, %v3208_v60  ;;  %v3714_v24 = vsel %vm3695_vm8, %v7756_v8, 0.0  ;;  %v9371_v50 = vld [vmem:[#allocation35_spill] sm:$0xff] }
 0x3f3   : > { %v2767_v41 = vpop.f32.mrf.mxu2  ;;  %v3770_v63 = vadd.f32 %v3752_v7, %v3714_v24  ;;  %vm3404_vm14 = vcmp.eq.f32.partialorder %v9371_v50, %v7513_v20  ;;  %vm3442_vm15 = vcmp.eq.f32.partialorder %v9371_v50, %v7516_v21  ;;  %v3156_v24 = vsel %vm3137_vm13, %v7807_v14, 0.0 }
 0x3f4   : > { %9366 = vst [vmem:[#allocation55_spill] sm:$0xff] %v8121_v2  ;;  %v2893_v36 = vmul.f32 %v2875_v56, %v2767_v41  ;;  %v2858_v41 = vsel %vm2839_vm10, %v7791_v54, 0.0  ;;  %v9378_v2 = vld [vmem:[#allocation36_spill] sm:$0xff]  ;;  %vm3735_vm10 = vcmp.eq.f32.partialorder %v9377_v22, %v7738_v59  ;;  %vm3697_vm13 = vcmp.eq.f32.partialorder %v9377_v22, %v7719_v31 }
 0x3f5   : > { %v3065_v44 = vpop.f32.mrf.mxu3 }
 0x3f6   : > { %v2911_v39 = vadd.f32 %v2893_v36, %v9368_v13  ;;  %v3191_v60 = vmul.f32 %v3173_v4, %v3065_v44  ;;  %v3664_v47 = vpop.f32.mrf.mxu1  ;;  %v2820_v4 = vsel %vm2801_vm12, %v7775_v48, 0.0  ;;  %v3423_v13 = vsel %vm3404_vm14, %v7533_v26, 0.0 }
 0x3f7   : > { %v3381_v3 = vpop.f32.mrf.mxu0  ;;  %v8137_v56 = vmul.f32 %v3770_v63, %v3664_v47  ;;  %v9372_v47 = vld [vmem:[#allocation22_spill] sm:$0xff]  ;;  %v2876_v44 = vadd.f32 %v2858_v41, %v2820_v4  ;;  %vm3100_vm12 = vcmp.eq.f32.partialorder %v7480_v33, %v7778_v17  ;;  %vm2841_vm14 = vcmp.eq.f32.partialorder %v9377_v22, %v7735_v58 }
 0x3f8   : > { %v3209_v7 = vadd.f32 %v3191_v60, %v2911_v39  ;;  %v8144_v42 = vmul.f32 %v3478_v34, %v3381_v3  ;;  %5915 = vmatmul.msk.bf16.gmra.mxu2 %vm2316_vm11, %v6191_v57  ;;  %v8152_v36 = vperm.slane %v9372_v47, 7  ;;  %v3461_v39 = vsel %vm3442_vm15, %v7536_v27, 0.0  ;;  %v9375_v3 = vld [vmem:[#allocation23_spill] sm:$0xff] }
 0x3f9   : > { %9369 = vst [vmem:[#allocation32_spill] sm:$0xff] %v8137_v56  ;;  %6050 = vmatmul.msk.bf16.gmra.mxu1 %vm2316_vm11, %v6218_v61  ;;  %v3118_v61 = vsel %vm3099_vm0, %v7794_v6, 0.0  ;;  %v3715_v34 = vsel %vm3696_vm1, %v7756_v8, 0.0  ;;  %v8177_v41 = vperm.slane %v9375_v3, 7  ;;  %v3479_v16 = vadd.f32 %v3461_v39, %v3423_v13 }
 0x3fa   : > { %9370 = vst [vmem:[#allocation56_spill] sm:$0xff] %v8144_v42  ;;  %v8160_v57 = vadd.f32 %v7923_v45, %v3209_v7  ;;  %5960 = vmatmul.msk.bf16.gmra.mxu3 %vm2316_vm11, %v6200_v46  ;;  %6008 = vmatmul.msk.bf16.gmra.mxu0 %vm2316_vm11, %v6212_v35  ;;  %v9374_v45 = vld [vmem:[#allocation25_spill] sm:$0xff]  ;;  %v3174_v60 = vadd.f32 %v3156_v24, %v3118_v61  ;;  %v9376_v7 = vld [vmem:[#allocation26_spill] sm:$0xff]  ;;  %v3119_v13 = vsel %vm3100_vm12, %v7794_v6, 0.0 }
 0x3fb   : > { %v2770_v63 = vpop.f32.mrf.mxu2  ;;  %v8173_v46 = vperm.slane %v9374_v45, 7  ;;  %v8180_v4 = vperm.slane %v9376_v7, 7  ;;  %vm2803_vm15 = vcmp.eq.f32.partialorder %v9377_v22, %v7716_v30  ;;  %vm3101_vm0 = vcmp.eq.f32.partialorder %v9377_v22, %v7778_v17 }
 0x3fc   : > { %9373 = vst [vmem:[#allocation22_spill] sm:$0xff] %v8160_v57  ;;  %v2894_v35 = vmul.f32 %v2876_v44, %v2770_v63  ;;  %v3771_v57 = vadd.f32 %v3753_v9, %v3715_v34  ;;  %v2859_v63 = vsel %vm2840_vm3, %v7791_v54, 0.0  ;;  %vm4581_vm12 = vcmp.eq.f32.partialorder %v7573_v55, %v8152_v36 }
 0x3fd   : > { %v3068_v56 = vpop.f32.mrf.mxu3 }
 0x3fe   : > { %v2912_v53 = vadd.f32 %v2894_v35, %v9378_v2  ;;  %v3192_v11 = vmul.f32 %v3174_v60, %v3068_v56  ;;  %v3666_v25 = vpop.f32.mrf.mxu1  ;;  %v9381_v2 = vld [vmem:[#allocation27_spill] sm:$0xff]  ;;  %v3157_v56 = vsel %vm3138_vm5, %v7807_v14, 0.0  ;;  %v3456_v60 = vsel %vm3437_vm9, %v7536_v27, 0.0 }
 0x3ff   : > { %v3383_v24 = vpop.f32.mrf.mxu0  ;;  %v8187_v44 = vmul.f32 %v3771_v57, %v3666_v25  ;;  %vm4579_vm7 = vcmp.eq.f32.partialorder %v9381_v2, %v8152_v36  ;;  %vm4617_vm8 = vcmp.eq.f32.partialorder %v9381_v2, %v8177_v41  ;;  %v2821_v25 = vsel %vm2802_vm4, %v7775_v48, 0.0  ;;  %v6201_v2 = vld [vmem:[#allocation2 + $0x1d8] sm:$0xff] }
 0x400   : > { %v3210_v9 = vadd.f32 %v3192_v11, %v2912_v53  ;;  %v8194_v61 = vmul.f32 %v3479_v16, %v3383_v24  ;;  %v2877_v16 = vadd.f32 %v2859_v63, %v2821_v25  ;;  %v3754_v53 = vsel %vm3735_vm10, %v7759_v10, 0.0  ;;  %v6192_v63 = vld [vmem:[#allocation2 + $0x190] sm:$0xff] }
 0x401   : > { %9379 = vst [vmem:[#allocation36_spill] sm:$0xff] %v8187_v44  ;;  %v4598_v39 = vsel %vm4579_vm7, %v8173_v46, 0.0  ;;  %v4636_v35 = vsel %vm4617_vm8, %v8180_v4, 0.0  ;;  %v3175_v34 = vadd.f32 %v3157_v56, %v3119_v13  ;;  %v3716_v24 = vsel %vm3697_vm13, %v7756_v8, 0.0  ;;  %v6219_v44 = vld [vmem:[#allocation2 + $0x268] sm:$0xff] }
 0x402   : > { %9380 = vst [vmem:[#allocation57_spill] sm:$0xff] %v8194_v61  ;;  %v8207_v11 = vadd.f32 %v7951_v5, %v3210_v9  ;;  %v3418_v9 = vsel %vm3399_vm2, %v7533_v26, 0.0  ;;  %v3772_v33 = vadd.f32 %v3754_v53, %v3716_v24  ;;  %v4654_v45 = vadd.f32 %v4636_v35, %v4598_v39 }
 0x403   : > { %v2772_v57 = vpop.f32.mrf.mxu2  ;;  %v3474_v56 = vadd.f32 %v3456_v60, %v3418_v9  ;;  %v2860_v13 = vsel %vm2841_vm14, %v7791_v54, 0.0  ;;  %v3120_v39 = vsel %vm3101_vm0, %v7794_v6, 0.0  ;;  %vm4619_vm13 = vcmp.eq.f32.partialorder %v7573_v55, %v8177_v41 }
 0x404   : > { %9382 = vst [vmem:[#allocation58_spill] sm:$0xff] %v8207_v11  ;;  %v2895_v5 = vmul.f32 %v2877_v16, %v2772_v57  ;;  %v9383_v11 = vld [vmem:[#allocation38_spill] sm:$0xff]  ;;  %vm3737_vm14 = vcmp.eq.f32.partialorder %v7457_v43, %v7738_v59  ;;  %vm2805_vm0 = vcmp.eq.f32.partialorder %v7457_v43, %v7716_v30 }
 0x405   : > { %v3070_v25 = vpop.f32.mrf.mxu3 }
 0x406   : > { %v2913_v1 = vadd.f32 %v2895_v5, %v9383_v11  ;;  %v3193_v61 = vmul.f32 %v3175_v34, %v3070_v25  ;;  %v3669_v7 = vpop.f32.mrf.mxu1  ;;  %v2822_v11 = vsel %vm2803_vm15, %v7775_v48, 0.0  ;;  %v9386_v34 = vld [vmem:[#allocation29_spill] sm:$0xff] }
 0x407   : > { %v8226_v16 = vmul.f32 %v3772_v33, %v3669_v7  ;;  %v4533_v57 = vpop.f32.mrf.mxu0  ;;  %v3158_v33 = vsel %vm3139_vm6, %v7807_v14, 0.0  ;;  %v2878_v7 = vadd.f32 %v2860_v13, %v2822_v11  ;;  %vm3699_vm6 = vcmp.eq.f32.partialorder %v7457_v43, %v7719_v31 }
 0x408   : > { %v3211_v42 = vadd.f32 %v3193_v61, %v2913_v1  ;;  %v8229_v3 = vmul.f32 %v4654_v45, %v4533_v57  ;;  %5916 = vmatmul.msk.bf16.gmra.mxu2 %vm2316_vm11, %v6192_v63  ;;  %v9384_v1 = vld [vmem:[#allocation17_spill] sm:$0xff]  ;;  %v9385_v61 = vld [vmem:[#allocation28_spill] sm:$0xff] }
 0x409   : > { %6051 = vmatmul.msk.bf16.gmra.mxu1 %vm2316_vm11, %v6219_v44  ;;  %vm3736_vm1 = vcmp.eq.f32.partialorder %v9384_v1, %v7738_v59  ;;  %vm4618_vm2 = vcmp.eq.f32.partialorder %v9385_v61, %v8177_v41  ;;  %vm3400_vm3 = vcmp.eq.f32.partialorder %v9384_v1, %v7513_v20  ;;  %vm3698_vm4 = vcmp.eq.f32.partialorder %v9384_v1, %v7719_v31 }
 0x40a   : > { %v8244_v45 = vadd.f32 %v7986_v18, %v3211_v42  ;;  %5961 = vmatmul.msk.bf16.gmra.mxu3 %vm2316_vm11, %v6201_v2  ;;  %6009 = vmatmul.msk.bf16.gmra.mxu0 %vm2316_vm11, %v6213_v40  ;;  %v3755_v44 = vsel %vm3736_vm1, %v7759_v10, 0.0  ;;  %v4637_v18 = vsel %vm4618_vm2, %v8180_v4, 0.0  ;;  %v3176_v2 = vadd.f32 %v3158_v33, %v3120_v39 }
 0x40b   : > { %v2775_v53 = vpop.f32.mrf.mxu2  ;;  %v3717_v40 = vsel %vm3698_vm4, %v7756_v8, 0.0  ;;  %vm4580_vm5 = vcmp.eq.f32.partialorder %v9385_v61, %v8152_v36  ;;  %vm3438_vm7 = vcmp.eq.f32.partialorder %v9384_v1, %v7516_v21  ;;  %vm2804_vm8 = vcmp.eq.f32.partialorder %v9384_v1, %v7716_v30 }
 0x40c   : > { %v2896_v42 = vmul.f32 %v2878_v7, %v2775_v53  ;;  %v3773_v60 = vadd.f32 %v3755_v44, %v3717_v40  ;;  %v4599_v5 = vsel %vm4580_vm5, %v8173_v46, 0.0  ;;  %vm2842_vm9 = vcmp.eq.f32.partialorder %v9384_v1, %v7735_v58 }
 0x40d   : > { %v3073_v35 = vpop.f32.mrf.mxu3  ;;  %v4655_v25 = vadd.f32 %v4637_v18, %v4599_v5  ;;  %v2861_v11 = vsel %vm2842_vm9, %v7791_v54, 0.0  ;;  %vm3140_vm10 = vcmp.eq.f32.partialorder %v9384_v1, %v7781_v23  ;;  %v3492_v33 = vmul.f32 %v3474_v56, %v8009_v49 }
 0x40e   : > { %v2914_v24 = vadd.f32 %v2896_v42, %v9386_v34  ;;  %v3194_v63 = vmul.f32 %v3176_v2, %v3073_v35  ;;  %v3671_v9 = vpop.f32.mrf.mxu1  ;;  %v3457_v53 = vsel %vm3438_vm7, %v7536_v27, 0.0  ;;  %v2823_v39 = vsel %vm2804_vm8, %v7775_v48, 0.0 }
 0x40f   : > { %v8268_v57 = vmul.f32 %v3773_v60, %v3671_v9  ;;  %v4535_v13 = vpop.f32.mrf.mxu0  ;;  %v3159_v18 = vsel %vm3140_vm10, %v7807_v14, 0.0  ;;  %v2879_v56 = vadd.f32 %v2861_v11, %v2823_v39  ;;  %vm3102_vm15 = vcmp.eq.f32.partialorder %v9384_v1, %v7778_v17  ;;  %v9388_v11 = vld [vmem:[#allocation30_spill] sm:$0xff] }
 0x410   : > { %v3212_v7 = vadd.f32 %v3194_v63, %v2914_v24  ;;  %v8276_v44 = vmul.f32 %v4655_v25, %v4535_v13  ;;  %v3756_v42 = vsel %vm3737_vm14, %v7759_v10, 0.0  ;;  %v3121_v27 = vsel %vm3102_vm15, %v7794_v6, 0.0  ;;  %v6193_v24 = vld [vmem:[#allocation2 + $0x198] sm:$0xff]  ;;  %v6220_v13 = vld [vmem:[#allocation2 + $0x270] sm:$0xff] }
 0x411   : > { %9387 = vst [vmem:[#allocation38_spill] sm:$0xff] %v8268_v57  ;;  %v4600_v2 = vsel %vm4581_vm12, %v8173_v46, 0.0  ;;  %v4638_v40 = vsel %vm4619_vm13, %v8180_v4, 0.0  ;;  %v3419_v35 = vsel %vm3400_vm3, %v7533_v26, 0.0  ;;  %v3177_v5 = vadd.f32 %v3159_v18, %v3121_v27  ;;  %v6202_v57 = vld [vmem:[#allocation2 + $0x1e0] sm:$0xff] }
 0x412   : > { %v8291_v49 = vadd.f32 %v3492_v33, %v3212_v7  ;;  %v3718_v34 = vsel %vm3699_vm6, %v7756_v8, 0.0  ;;  %v3475_v63 = vadd.f32 %v3457_v53, %v3419_v35  ;;  %v4656_v22 = vadd.f32 %v4638_v40, %v4600_v2  ;;  %v9389_v40 = vld [vmem:[#allocation42_spill] sm:$0xff]  ;;  %v9390_v35 = vld [vmem:[#allocation40_spill] sm:$0xff] }
 0x413   : > { %v2777_v21 = vpop.f32.mrf.mxu2  ;;  %v3774_v25 = vadd.f32 %v3756_v42, %v3718_v34  ;;  %vm2843_vm1 = vcmp.eq.f32.partialorder %v7457_v43, %v7735_v58  ;;  %vm3141_vm2 = vcmp.eq.f32.partialorder %v7457_v43, %v7781_v23  ;;  %vm4582_vm3 = vcmp.eq.f32.partialorder %v7482_v0, %v8152_v36 }
 0x414   : > { %v2897_v60 = vmul.f32 %v2879_v56, %v2777_v21  ;;  %v2862_v53 = vsel %vm2843_vm1, %v7791_v54, 0.0  ;;  %v3493_v18 = vmul.f32 %v3475_v63, %v8037_v29  ;;  %vm4620_vm4 = vcmp.eq.f32.partialorder %v7482_v0, %v8177_v41 }
 0x415   : > { %v3075_v9 = vpop.f32.mrf.mxu3  ;;  %v2824_v21 = vsel %vm2805_vm0, %v7775_v48, 0.0  ;;  %vm3103_vm5 = vcmp.eq.f32.partialorder %v7457_v43, %v7778_v17  ;;  %v3160_v29 = vsel %vm3141_vm2, %v7807_v14, 0.0  ;;  %vm3738_vm7 = vcmp.eq.f32.partialorder %v7469_v51, %v7738_v59 }
 0x416   : > { %v2915_v33 = vadd.f32 %v2897_v60, %v9388_v11  ;;  %v3195_v7 = vmul.f32 %v3177_v5, %v3075_v9  ;;  %v3674_v39 = vpop.f32.mrf.mxu1  ;;  %v2880_v27 = vadd.f32 %v2862_v53, %v2824_v21  ;;  %v3757_v2 = vsel %vm3738_vm7, %v7759_v10, 0.0 }
 0x417   : > { %v8314_v20 = vmul.f32 %v3774_v25, %v3674_v39  ;;  %v4538_v26 = vpop.f32.mrf.mxu0  ;;  %v8343_v60 = vadd.f32 %v9390_v35, %v9389_v40  ;;  %v3122_v34 = vsel %vm3103_vm5, %v7794_v6, 0.0  ;;  %vm3700_vm8 = vcmp.eq.f32.partialorder %v7469_v51, %v7719_v31 }
 0x418   : > { %v3213_v56 = vadd.f32 %v3195_v7, %v2915_v33  ;;  %v8322_v42 = vmul.f32 %v4656_v22, %v4538_v26  ;;  %5917 = vmatmul.msk.bf16.gmra.mxu2 %vm2316_vm11, %v6193_v24  ;;  %v4601_v24 = vsel %vm4582_vm3, %v8173_v46, 0.0  ;;  %v3178_v9 = vadd.f32 %v3160_v29, %v3122_v34  ;;  %v9391_v33 = vld [vmem:[#allocation31_spill] sm:$0xff] }
 0x419   : > { %6052 = vmatmul.msk.bf16.gmra.mxu1 %vm2316_vm11, %v6220_v13  ;;  %v3719_v25 = vsel %vm3700_vm8, %v7756_v8, 0.0  ;;  %vm2806_vm9 = vcmp.eq.f32.partialorder %v7469_v51, %v7716_v30  ;;  %vm2844_vm10 = vcmp.eq.f32.partialorder %v7469_v51, %v7735_v58  ;;  %vm3142_vm12 = vcmp.eq.f32.partialorder %v7469_v51, %v7781_v23 }
 0x41a   : > { %v8337_v22 = vadd.f32 %v3493_v18, %v3213_v56  ;;  %5962 = vmatmul.msk.bf16.gmra.mxu3 %vm2316_vm11, %v6202_v57  ;;  %v4639_v57 = vsel %vm4620_vm4, %v8180_v4, 0.0  ;;  %v3775_v11 = vadd.f32 %v3757_v2, %v3719_v25  ;;  %v2863_v18 = vsel %vm2844_vm10, %v7791_v54, 0.0 }
 0x41b   : > { %v2780_v5 = vpop.f32.mrf.mxu2  ;;  %v4657_v53 = vadd.f32 %v4639_v57, %v4601_v24  ;;  %v2825_v29 = vsel %vm2806_vm9, %v7775_v48, 0.0  ;;  %vm3104_vm13 = vcmp.eq.f32.partialorder %v7469_v51, %v7778_v17  ;;  %v3161_v40 = vsel %vm3142_vm12, %v7807_v14, 0.0 }
 0x41c   : > { %v2898_v63 = vmul.f32 %v2880_v27, %v2780_v5  ;;  %v2881_v35 = vadd.f32 %v2863_v18, %v2825_v29  ;;  %v3123_v5 = vsel %vm3104_vm13, %v7794_v6, 0.0  ;;  %vm3739_vm14 = vcmp.eq.f32.partialorder %v9367_v52, %v7738_v59 }
 0x41d   : > { %v3078_v13 = vpop.f32.mrf.mxu3  ;;  %vm4621_vm15 = vcmp.eq.f32.partialorder %v7510_v19, %v8177_v41  ;;  %v3758_v24 = vsel %vm3739_vm14, %v7759_v10, 0.0  ;;  %vm3701_vm6 = vcmp.eq.f32.partialorder %v9367_v52, %v7719_v31  ;;  %vm4583_vm0 = vcmp.eq.f32.partialorder %v7510_v19, %v8152_v36 }
 0x41e   : > { %v2916_v7 = vadd.f32 %v2898_v63, %v9391_v33  ;;  %v3196_v39 = vmul.f32 %v3178_v9, %v3078_v13  ;;  %v3676_v26 = vpop.f32.mrf.mxu1  ;;  %v4640_v57 = vsel %vm4621_vm15, %v8180_v4, 0.0  ;;  %v9392_v63 = vld [vmem:[#allocation41_spill] sm:$0xff]  ;;  %v3179_v13 = vadd.f32 %v3161_v40, %v3123_v5 }
 0x41f   : > { %v8360_v56 = vmul.f32 %v3775_v11, %v3676_v26  ;;  %v4540_v21 = vpop.f32.mrf.mxu0  ;;  %v8382_v9 = vadd.f32 %v9392_v63, %v7902_v15  ;;  %v4602_v33 = vsel %vm4583_vm0, %v8173_v46, 0.0  ;;  %vm2807_vm1 = vcmp.eq.f32.partialorder %v9367_v52, %v7716_v30 }
 0x420   : > { %v3214_v27 = vadd.f32 %v3196_v39, %v2916_v7  ;;  %v8365_v2 = vmul.f32 %v4657_v53, %v4540_v21  ;;  %v6194_v7 = vld [vmem:[#allocation2 + $0x1a0] sm:$0xff]  ;;  %v4658_v26 = vadd.f32 %v4640_v57, %v4602_v33  ;;  %v6221_v53 = vld [vmem:[#allocation2 + $0x278] sm:$0xff]  ;;  %v2826_v18 = vsel %vm2807_vm1, %v7775_v48, 0.0  ;;  %v9393_v21 = vld [vmem:[#allocation34_spill] sm:$0xff] }
 0x421   : > { %vm2845_vm2 = vcmp.eq.f32.partialorder %v9367_v52, %v7735_v58  ;;  %vm3702_vm3 = vcmp.eq.f32.partialorder %v9371_v50, %v7719_v31  ;;  %vm3105_vm4 = vcmp.eq.f32.partialorder %v9367_v52, %v7778_v17  ;;  %vm3143_vm5 = vcmp.eq.f32.partialorder %v9367_v52, %v7781_v23 }
 0x422   : > { %v8376_v34 = vadd.f32 %v8072_v32, %v3214_v27  ;;  %v3720_v32 = vsel %vm3701_vm6, %v7756_v8, 0.0  ;;  %v2864_v5 = vsel %vm2845_vm2, %v7791_v54, 0.0  ;;  %vm3740_vm7 = vcmp.eq.f32.partialorder %v9371_v50, %v7738_v59 }
 0x423   : > { %v2782_v25 = vpop.f32.mrf.mxu2  ;;  %v3776_v15 = vadd.f32 %v3758_v24, %v3720_v32  ;;  %v3162_v31 = vsel %vm3143_vm5, %v7807_v14, 0.0  ;;  %v3721_v32 = vsel %vm3702_vm3, %v7756_v8, 0.0  ;;  %vm4584_vm8 = vcmp.eq.f32.partialorder %v7538_v28, %v8152_v36 }
 0x424   : > { %v2899_v11 = vmul.f32 %v2881_v35, %v2782_v25  ;;  %v6203_v35 = vld [vmem:[#allocation2 + $0x1e8] sm:$0xff]  ;;  %vm4622_vm9 = vcmp.eq.f32.partialorder %v7538_v28, %v8177_v41  ;;  %v3759_v33 = vsel %vm3740_vm7, %v7759_v10, 0.0  ;;  %vm2808_vm10 = vcmp.eq.f32.partialorder %v9371_v50, %v7716_v30 }
 0x425   : > { %v3080_v39 = vpop.f32.mrf.mxu3  ;;  %vm2846_vm12 = vcmp.eq.f32.partialorder %v9371_v50, %v7735_v58  ;;  %vm3106_vm13 = vcmp.eq.f32.partialorder %v9371_v50, %v7778_v17  ;;  %vm3144_vm14 = vcmp.eq.f32.partialorder %v9371_v50, %v7781_v23  ;;  %v2827_v30 = vsel %vm2808_vm10, %v7775_v48, 0.0  ;;  %v9397_v17 = vld [vmem:[#allocation23_spill] sm:$0xff] }
 0x426   : > { %v2917_v29 = vadd.f32 %v2899_v11, %v9393_v21  ;;  %v3197_v27 = vmul.f32 %v3179_v13, %v3080_v39  ;;  %v3679_v40 = vpop.f32.mrf.mxu1  ;;  %v3124_v13 = vsel %vm3105_vm4, %v7794_v6, 0.0  ;;  %v2882_v11 = vadd.f32 %v2864_v5, %v2826_v18  ;;  %v9395_v21 = vld [vmem:[#allocation37_spill] sm:$0xff] }
 0x427   : > { %v8399_v63 = vmul.f32 %v3776_v15, %v3679_v40  ;;  %v4543_v24 = vpop.f32.mrf.mxu0  ;;  %v8426_v39 = vadd.f32 %v7885_v12, %v7932_v38  ;;  %v3180_v15 = vadd.f32 %v3162_v31, %v3124_v13  ;;  %v3777_v18 = vadd.f32 %v3759_v33, %v3721_v32  ;;  %v9399_v32 = vld [vmem:[#allocation45_spill] sm:$0xff]  ;;  %v9400_v33 = vld [vmem:[#allocation43_spill] sm:$0xff] }
 0x428   : > { %v3215_v57 = vadd.f32 %v3197_v27, %v2917_v29  ;;  %v8407_v25 = vmul.f32 %v4658_v26, %v4543_v24  ;;  %5918 = vmatmul.msk.bf16.gmra.mxu2 %vm2316_vm11, %v6194_v7  ;;  %v4641_v7 = vsel %vm4622_vm9, %v8180_v4, 0.0  ;;  %v2865_v58 = vsel %vm2846_vm12, %v7791_v54, 0.0  ;;  %v9398_v54 = vld [vmem:[#allocation56_spill] sm:$0xff] }
 0x429   : > { %9394 = vst [vmem:[#allocation17_spill] sm:$0xff] %v8399_v63  ;;  %6053 = vmatmul.msk.bf16.gmra.mxu1 %vm2316_vm11, %v6221_v53  ;;  %v4603_v53 = vsel %vm4584_vm8, %v8173_v46, 0.0  ;;  %vm4585_vm15 = vcmp.eq.f32.partialorder %v7472_v62, %v8152_v36  ;;  %v3125_v23 = vsel %vm3106_vm13, %v7794_v6, 0.0  ;;  %v3163_v13 = vsel %vm3144_vm14, %v7807_v14, 0.0 }
 0x42a   : > { %v8419_v59 = vadd.f32 %v8108_v37, %v3215_v57  ;;  %5963 = vmatmul.msk.bf16.gmra.mxu3 %vm2316_vm11, %v6203_v35  ;;  %v4659_v10 = vadd.f32 %v4641_v7, %v4603_v53  ;;  %v8443_v35 = vperm.slane %v9372_v47, 5  ;;  %v8450_v57 = vperm.slane %v9397_v17, 5 }
 0x42b   : > { %v2785_v8 = vpop.f32.mrf.mxu2  ;;  %vm4623_vm6 = vcmp.eq.f32.partialorder %v7472_v62, %v8177_v41  ;;  %v2883_v31 = vadd.f32 %v2865_v58, %v2827_v30  ;;  %v8462_v7 = vadd.f32 %v9400_v33, %v9399_v32  ;;  %v8468_v6 = vperm.slane %v9397_v17, 6  ;;  %v9404_v30 = vld [vmem:[#allocation39_spill] sm:$0xff] }
 0x42c   : > { %v2900_v26 = vmul.f32 %v2882_v11, %v2785_v8  ;;  %v4642_v11 = vsel %vm4623_vm6, %v8180_v4, 0.0  ;;  %v8465_v8 = vperm.slane %v9372_v47, 6  ;;  %v3181_v53 = vadd.f32 %v3163_v13, %v3125_v23  ;;  %v9403_v47 = vld [vmem:[#allocation26_spill] sm:$0xff]  ;;  %v6204_v23 = vld [vmem:[#allocation2 + $0x1f0] sm:$0xff] }
 0x42d   : > { %v3083_v37 = vpop.f32.mrf.mxu3  ;;  %vm3984_vm7 = vcmp.eq.f32.partialorder %v9385_v61, %v8443_v35  ;;  %vm4320_vm8 = vcmp.eq.f32.partialorder %v9385_v61, %v8468_v6  ;;  %vm3985_vm13 = vcmp.eq.f32.partialorder %v7573_v55, %v8443_v35  ;;  %vm4023_vm14 = vcmp.eq.f32.partialorder %v7573_v55, %v8450_v57 }
 0x42e   : > { %v2918_v29 = vadd.f32 %v2900_v26, %v9395_v21  ;;  %v3198_v27 = vmul.f32 %v3180_v15, %v3083_v37  ;;  %v3681_v40 = vpop.f32.mrf.mxu1  ;;  %v4604_v15 = vsel %vm4585_vm15, %v8173_v46, 0.0  ;;  %v6195_v37 = vld [vmem:[#allocation2 + $0x1a8] sm:$0xff]  ;;  %vm4282_vm9 = vcmp.eq.f32.partialorder %v9385_v61, %v8465_v8 }
 0x42f   : > { %v8438_v12 = vmul.f32 %v3777_v18, %v3681_v40  ;;  %v4545_v38 = vpop.f32.mrf.mxu0  ;;  %v9401_v18 = vld [vmem:[#allocation27_spill] sm:$0xff]  ;;  %v4660_v40 = vadd.f32 %v4642_v11, %v4604_v15  ;;  %vm4283_vm15 = vcmp.eq.f32.partialorder %v7573_v55, %v8465_v8  ;;  %vm4321_vm6 = vcmp.eq.f32.partialorder %v7573_v55, %v8468_v6 }
 0x430   : > { %v3216_v5 = vadd.f32 %v3198_v27, %v2918_v29  ;;  %v8445_v24 = vmul.f32 %v4659_v10, %v4545_v38  ;;  %vm3983_vm0 = vcmp.eq.f32.partialorder %v9401_v18, %v8443_v35  ;;  %vm4021_vm1 = vcmp.eq.f32.partialorder %v9401_v18, %v8450_v57  ;;  %v9402_v10 = vld [vmem:[#allocation25_spill] sm:$0xff] }
 0x431   : > { %9396 = vst [vmem:[#allocation28_spill] sm:$0xff] %v8438_v12  ;;  %v8476_v21 = vperm.slane %v9402_v10, 5  ;;  %v8479_v29 = vperm.slane %v9403_v47, 5  ;;  %v6222_v38 = vld [vmem:[#allocation2 + $0x280] sm:$0xff]  ;;  %vm4281_vm2 = vcmp.eq.f32.partialorder %v9401_v18, %v8465_v8  ;;  %vm4319_vm3 = vcmp.eq.f32.partialorder %v9401_v18, %v8468_v6 }
 0x432   : > { %v8457_v48 = vadd.f32 %v9398_v54, %v3216_v5  ;;  %v8489_v13 = vperm.slane %v9402_v10, 6  ;;  %v8492_v54 = vperm.slane %v9403_v47, 6 }
 0x433   : > { %v2787_v14 = vpop.f32.mrf.mxu2  ;;  %v4002_v11 = vsel %vm3983_vm0, %v8476_v21, 0.0  ;;  %v4040_v32 = vsel %vm4021_vm1, %v8479_v29, 0.0  ;;  %vm3986_vm0 = vcmp.eq.f32.partialorder %v7482_v0, %v8443_v35  ;;  %vm4024_vm1 = vcmp.eq.f32.partialorder %v7482_v0, %v8450_v57 }
 0x434   : > { %v2901_v26 = vmul.f32 %v2883_v31, %v2787_v14  ;;  %v4300_v15 = vsel %vm4281_vm2, %v8489_v13, 0.0  ;;  %v4058_v47 = vadd.f32 %v4040_v32, %v4002_v11  ;;  %vm4284_vm2 = vcmp.eq.f32.partialorder %v7482_v0, %v8465_v8 }
 0x435   : > { %v3085_v27 = vpop.f32.mrf.mxu3 }
 0x436   : > { %v2919_v58 = vadd.f32 %v2901_v26, %v9404_v30  ;;  %v3199_v5 = vmul.f32 %v3181_v53, %v3085_v27  ;;  %v8482_v17 = vpop.f32.mrf.mxu1  ;;  %v4338_v26 = vsel %vm4319_vm3, %v8492_v54, 0.0  ;;  %v9406_v53 = vld [vmem:[#allocation57_spill] sm:$0xff]  ;;  %v9409_v30 = vld [vmem:[#allocation47_spill] sm:$0xff]  ;;  %vm4322_vm3 = vcmp.eq.f32.partialorder %v7482_v0, %v8468_v6 }
 0x437   : > { %9405 = vst [vmem:[#allocation29_spill] sm:$0xff] %v8482_v17  ;;  %v4548_v31 = vpop.f32.mrf.mxu0  ;;  %v9408_v27 = vld [vmem:[#allocation21_spill] sm:$0xff] }
 0x438   : > { %v3217_v33 = vadd.f32 %v3199_v5, %v2919_v58  ;;  %v8502_v14 = vmul.f32 %v4660_v40, %v4548_v31  ;;  %5919 = vmatmul.msk.bf16.gmra.mxu2 %vm2316_vm11, %v6195_v37  ;;  %vm4624_vm4 = vcmp.eq.f32.partialorder %v9408_v27, %v8177_v41  ;;  %v9410_v40 = vld [vmem:[#allocation44_spill] sm:$0xff]  ;;  %v4356_v31 = vadd.f32 %v4338_v26, %v4300_v15 }
 0x439   : > { %6054 = vmatmul.msk.bf16.gmra.mxu1 %vm2316_vm11, %v6222_v38  ;;  %v8516_v58 = vadd.f32 %v9410_v40, %v9409_v30  ;;  %v4643_v38 = vsel %vm4624_vm4, %v8180_v4, 0.0  ;;  %vm4586_vm5 = vcmp.eq.f32.partialorder %v9408_v27, %v8152_v36  ;;  %vm4025_vm4 = vcmp.eq.f32.partialorder %v7510_v19, %v8450_v57 }
 0x43a   : > { %v8509_v10 = vadd.f32 %v9406_v53, %v3217_v33  ;;  %5964 = vmatmul.msk.bf16.gmra.mxu3 %vm2316_vm11, %v6204_v23  ;;  %v4605_v53 = vsel %vm4586_vm5, %v8173_v46, 0.0  ;;  %vm4022_vm11 = vcmp.eq.f32.partialorder %v9385_v61, %v8450_v57  ;;  %vm3987_vm5 = vcmp.eq.f32.partialorder %v7510_v19, %v8443_v35 }
 0x43b   : > { %v3937_v37 = vpop.f32.mrf.mxu2  ;;  %v4661_v32 = vadd.f32 %v4643_v38, %v4605_v53  ;;  %v4041_v40 = vsel %vm4022_vm11, %v8479_v29, 0.0  ;;  %v9412_v38 = vld [vmem:[#allocation24_spill] sm:$0xff]  ;;  %v9415_v53 = vld [vmem:[#allocation46_spill] sm:$0xff]  ;;  %vm4323_vm11 = vcmp.eq.f32.partialorder %v7510_v19, %v8468_v6 }
 0x43c   : > { %9407 = vst [vmem:[#allocation30_spill] sm:$0xff] %v8509_v10  ;;  %v4076_v5 = vmul.f32 %v4058_v47, %v3937_v37  ;;  %v4003_v47 = vsel %vm3984_vm7, %v8476_v21, 0.0  ;;  %vm4625_vm10 = vcmp.eq.f32.partialorder %v9412_v38, %v8177_v41  ;;  %vm4587_vm12 = vcmp.eq.f32.partialorder %v9412_v38, %v8152_v36 }
 0x43d   : > { %v4235_v33 = vpop.f32.mrf.mxu3  ;;  %v4059_v37 = vadd.f32 %v4041_v40, %v4003_v47  ;;  %v4606_v47 = vsel %vm4587_vm12, %v8173_v46, 0.0  ;;  %vm4285_vm7 = vcmp.eq.f32.partialorder %v7510_v19, %v8465_v8  ;;  %vm4324_vm12 = vcmp.eq.f32.partialorder %v7538_v28, %v8468_v6 }
 0x43e   : > { %v4094_v23 = vadd.f32 %v4076_v5, %v8343_v60  ;;  %v4374_v11 = vmul.f32 %v4356_v31, %v4235_v33  ;;  %v8525_v30 = vpop.f32.mrf.mxu1  ;;  %v4339_v60 = vsel %vm4320_vm8, %v8492_v54, 0.0  ;;  %v4301_v31 = vsel %vm4282_vm9, %v8489_v13, 0.0 }
 0x43f   : > { %9411 = vst [vmem:[#allocation42_spill] sm:$0xff] %v8525_v30  ;;  %v4550_v17 = vpop.f32.mrf.mxu0  ;;  %v4644_v33 = vsel %vm4625_vm10, %v8180_v4, 0.0  ;;  %vm3988_vm8 = vcmp.eq.f32.partialorder %v7538_v28, %v8443_v35  ;;  %vm4026_vm9 = vcmp.eq.f32.partialorder %v7538_v28, %v8450_v57  ;;  %vm4286_vm10 = vcmp.eq.f32.partialorder %v7538_v28, %v8465_v8 }
 0x440   : > { %v4392_v15 = vadd.f32 %v4374_v11, %v4094_v23  ;;  %v8532_v26 = vmul.f32 %v4661_v32, %v4550_v17  ;;  %v9414_v17 = vld [vmem:[#allocation49_spill] sm:$0xff]  ;;  %v4357_v32 = vadd.f32 %v4339_v60, %v4301_v31  ;;  %v4042_v31 = vsel %vm4023_vm14, %v8479_v29, 0.0 }
 0x441   : > { %v8547_v23 = vadd.f32 %v9415_v53, %v9414_v17  ;;  %vm4027_vm14 = vcmp.eq.f32.partialorder %v7472_v62, %v8450_v57 }
 0x442   : > { %v8541_v5 = vadd.f32 %v8229_v3, %v4392_v15  ;;  %v4662_v15 = vadd.f32 %v4644_v33, %v4606_v47  ;;  %v4302_v33 = vsel %vm4283_vm15, %v8489_v13, 0.0  ;;  %v9418_v47 = vld [vmem:[#allocation51_spill] sm:$0xff]  ;;  %vm4287_vm15 = vcmp.eq.f32.partialorder %v7472_v62, %v8465_v8 }
 0x443   : > { %v3939_v11 = vpop.f32.mrf.mxu2 }
 0x444   : > { %9413 = vst [vmem:[#allocation40_spill] sm:$0xff] %v8541_v5  ;;  %v4077_v40 = vmul.f32 %v4059_v37, %v3939_v11  ;;  %v4004_v37 = vsel %vm3985_vm13, %v8476_v21, 0.0  ;;  %vm3989_vm13 = vcmp.eq.f32.partialorder %v7472_v62, %v8443_v35 }
 0x445   : > { %v4237_v3 = vpop.f32.mrf.mxu3 }
 0x446   : > { %v4095_v5 = vadd.f32 %v4077_v40, %v8382_v9  ;;  %v4375_v17 = vmul.f32 %v4357_v32, %v4237_v3  ;;  %v8557_v53 = vpop.f32.mrf.mxu1  ;;  %v4340_v9 = vsel %vm4321_vm6, %v8492_v54, 0.0  ;;  %v4060_v40 = vadd.f32 %v4042_v31, %v4004_v37  ;;  %v9419_v3 = vld [vmem:[#allocation48_spill] sm:$0xff] }
 0x447   : > { %9416 = vst [vmem:[#allocation31_spill] sm:$0xff] %v8557_v53  ;;  %v4553_v60 = vpop.f32.mrf.mxu0  ;;  %v8574_v30 = vadd.f32 %v9419_v3, %v9418_v47  ;;  %v4358_v10 = vadd.f32 %v4340_v9, %v4302_v33  ;;  %v4303_v31 = vsel %vm4284_vm2, %v8489_v13, 0.0  ;;  %v9423_v33 = vld [vmem:[#allocation50_spill] sm:$0xff]  ;;  %vm4325_vm6 = vcmp.eq.f32.partialorder %v7472_v62, %v8468_v6 }
 0x448   : > { %v4393_v11 = vadd.f32 %v4375_v17, %v4095_v5  ;;  %v8565_v50 = vmul.f32 %v4662_v15, %v4553_v60  ;;  %v4043_v60 = vsel %vm4024_vm1, %v8479_v29, 0.0  ;;  %vm3990_vm1 = vcmp.eq.f32.partialorder %v9408_v27, %v8443_v35 }
 0x449   : > { %vm4326_vm2 = vcmp.eq.f32.partialorder %v9408_v27, %v8468_v6 }
 0x44a   : > { %v8570_v32 = vadd.f32 %v8276_v44, %v4393_v11  ;;  %v4341_v11 = vsel %vm4322_vm3, %v8492_v54, 0.0  ;;  %vm4288_vm3 = vcmp.eq.f32.partialorder %v9408_v27, %v8465_v8 }
 0x44b   : > { %v3942_v53 = vpop.f32.mrf.mxu2  ;;  %v4359_v3 = vadd.f32 %v4341_v11, %v4303_v31  ;;  %v4006_v31 = vsel %vm3987_vm5, %v8476_v21, 0.0 }
 0x44c   : > { %9417 = vst [vmem:[#allocation41_spill] sm:$0xff] %v8570_v32  ;;  %v4078_v12 = vmul.f32 %v4060_v40, %v3942_v53  ;;  %v4005_v53 = vsel %vm3986_vm0, %v8476_v21, 0.0  ;;  %v2167_v32 = vld [vmem:[%s480_s25 + $0x8] sm:$0xff]  ;;  %vm4028_vm0 = vcmp.eq.f32.partialorder %v9408_v27, %v8450_v57  ;;  %s5080_s25 = scalar_lea.sflag [#allocation7], %s6626_s29 }
 0x44d   : > { %v4240_v5 = vpop.f32.mrf.mxu3 }
 0x44e   : > { %v4096_v15 = vadd.f32 %v4078_v12, %v8426_v39  ;;  %v4376_v17 = vmul.f32 %v4358_v10, %v4240_v5  ;;  %v8581_v44 = vpop.f32.mrf.mxu1  ;;  %v4061_v12 = vadd.f32 %v4043_v60, %v4005_v53  ;;  %v9422_v10 = vld [vmem:[#allocation53_spill] sm:$0xff]  ;;  %v9425_v60 = vld [vmem:[#allocation14_spill] sm:$0xff] }
 0x44f   : > { %9420 = vst [vmem:[#allocation34_spill] sm:$0xff] %v8581_v44  ;;  %v8596_v9 = vadd.f32 %v9423_v33, %v9422_v10  ;;  %v9427_v10 = vld [vmem:[#allocation55_spill] sm:$0xff]  ;;  %v9428_v33 = vld [vmem:[#allocation52_spill] sm:$0xff] }
 0x450   : > { %v4394_v37 = vadd.f32 %v4376_v17, %v4096_v15 }
 0x452   : > { %v8592_v39 = vadd.f32 %v8322_v42, %v4394_v37  ;;  %v4044_v42 = vsel %vm4025_vm4, %v8479_v29, 0.0  ;;  %v4708_v37 = vadd.f32 %v2167_v32, %v9425_v60 }
 0x453   : > { %v3944_v40 = vpop.f32.mrf.mxu2 }
 0x454   : > { %9421 = vst [vmem:[#allocation37_spill] sm:$0xff] %v8592_v39  ;;  %v4079_v47 = vmul.f32 %v4061_v12, %v3944_v40  ;;  %v4062_v12 = vadd.f32 %v4044_v42, %v4006_v31  ;;  %v8620_v40 = vadd.f32 %v9428_v33, %v9427_v10  ;;  %v4045_v42 = vsel %vm4026_vm9, %v8479_v29, 0.0  ;;  %v9431_v33 = vld [vmem:[#allocation22_spill] sm:$0xff] }
 0x455   : > { %v4242_v5 = vpop.f32.mrf.mxu3  ;;  %vm4327_vm9 = vcmp.eq.f32.partialorder %v9412_v38, %v8468_v6 }
 0x456   : > { %v4097_v15 = vadd.f32 %v4079_v47, %v8462_v7  ;;  %v4377_v17 = vmul.f32 %v4359_v3, %v4242_v5  ;;  %v8601_v44 = vpop.f32.mrf.mxu1  ;;  %v4342_v7 = vsel %vm4323_vm11, %v8492_v54, 0.0  ;;  %v4304_v3 = vsel %vm4285_vm7, %v8489_v13, 0.0 }
 0x457   : > { %9424 = vst [vmem:[#allocation23_spill] sm:$0xff] %v8601_v44  ;;  %v4360_v32 = vadd.f32 %v4342_v7, %v4304_v3  ;;  %v4343_v7 = vsel %vm4324_vm12, %v8492_v54, 0.0  ;;  %v4722_v44 = vmax.f32 %v4708_v37, 0.0  ;;  %vm4029_vm11 = vcmp.eq.f32.partialorder %v9412_v38, %v8450_v57 }
 0x458   : > { %v4395_v53 = vadd.f32 %v4377_v17, %v4097_v15  ;;  %v4710_v15 = vfloor.f32 %v4708_v37  ;;  %v4008_v37 = vsel %vm3989_vm13, %v8476_v21, 0.0  ;;  %vm4289_vm12 = vcmp.eq.f32.partialorder %v9412_v38, %v8465_v8 }
 0x45a   : > { %v8614_v11 = vadd.f32 %v8365_v2, %v4395_v53  ;;  %v4714_v31 = vadd.f32 1.0, %v4710_v15 }
 0x45b   : > { %v3947_v47 = vpop.f32.mrf.mxu2 }
 0x45c   : > { %9426 = vst [vmem:[#allocation56_spill] sm:$0xff] %v8614_v11  ;;  %v4080_v5 = vmul.f32 %v4062_v12, %v3947_v47  ;;  %v9432_v47 = vld [vmem:[#allocation54_spill] sm:$0xff]  ;;  %v4715_v11 = vmax.f32 %v4714_v31, 0.0 }
 0x45d   : > { %v4245_v17 = vpop.f32.mrf.mxu3  ;;  %v8642_v3 = vadd.f32 %v9432_v47, %v9431_v33 }
 0x45e   : > { %v4098_v60 = vadd.f32 %v4080_v5, %v8516_v58  ;;  %v4378_v39 = vmul.f32 %v4360_v32, %v4245_v17  ;;  %v8624_v2 = vpop.f32.mrf.mxu1  ;;  %v4007_v58 = vsel %vm3988_vm8, %v8476_v21, 0.0  ;;  %v4305_v5 = vsel %vm4286_vm10, %v8489_v13, 0.0 }
 0x45f   : > { %9429 = vst [vmem:[#allocation45_spill] sm:$0xff] %v8624_v2  ;;  %v4063_v10 = vadd.f32 %v4045_v42, %v4007_v58  ;;  %v4712_v32 = vmax.f32 %v4710_v15, 0.0  ;;  %vm3991_vm8 = vcmp.eq.f32.partialorder %v9412_v38, %v8443_v35 }
 0x460   : > { %v4396_v53 = vadd.f32 %v4378_v39, %v4098_v60  ;;  %v4361_v60 = vadd.f32 %v4343_v7, %v4305_v5  ;;  %v9433_v7 = vld [vmem:[#allocation58_spill] sm:$0xff] }
 0x461   : > { %v4713_v42 = vmin.f32 %v4712_v32, 17.0 }
 0x462   : > { %v8638_v12 = vadd.f32 %v8407_v25, %v4396_v53  ;;  %v4046_v25 = vsel %vm4027_vm14, %v8479_v29, 0.0  ;;  %v4723_v53 = vmin.f32 %v4722_v44, 17.0 }
 0x463   : > { %v3949_v39 = vpop.f32.mrf.mxu2  ;;  %v4064_v58 = vadd.f32 %v4046_v25, %v4008_v37  ;;  %v4047_v25 = vsel %vm4028_vm0, %v8479_v29, 0.0 }
 0x464   : > { %9430 = vst [vmem:[#allocation43_spill] sm:$0xff] %v8638_v12  ;;  %v4081_v17 = vmul.f32 %v4063_v10, %v3949_v39  ;;  %v9434_v10 = vld [vmem:[#allocation32_spill] sm:$0xff]  ;;  %v4726_v47 = vsub.f32 %v4713_v42, %v4723_v53 }
 0x465   : > { %v4247_v2 = vpop.f32.mrf.mxu3  ;;  %v8664_v33 = vadd.f32 %v9434_v10, %v9433_v7  ;;  %v9435_v10 = vld [vmem:[#allocation36_spill] sm:$0xff] }
 0x466   : > { %v4099_v52 = vadd.f32 %v4081_v17, %v8547_v23  ;;  %v4379_v51 = vmul.f32 %v4361_v60, %v4247_v2  ;;  %v8646_v63 = vpop.f32.mrf.mxu1  ;;  %v4716_v23 = vmin.f32 %v4715_v11, 17.0  ;;  %v4344_v2 = vsel %vm4325_vm6, %v8492_v54, 0.0 }
 0x468   : > { %v4397_v15 = vadd.f32 %v4379_v51, %v4099_v52  ;;  %v4306_v52 = vsel %vm4287_vm15, %v8489_v13, 0.0  ;;  %v4728_v11 = vsub.f32 %v4716_v23, %v4723_v53  ;;  %v4009_v53 = vsel %vm3990_vm1, %v8476_v21, 0.0 }
 0x469   : > { %v4362_v5 = vadd.f32 %v4344_v2, %v4306_v52  ;;  %v4065_v7 = vadd.f32 %v4047_v25, %v4009_v53  ;;  %v4346_v53 = vsel %vm4327_vm9, %v8492_v54, 0.0 }
 0x46a   : > { %v8660_v31 = vadd.f32 %v8445_v24, %v4397_v15  ;;  %v8672_v24 = vperm.slane %v4713_v42, 0  ;;  %v4727_v15 = vadd.f32 1.0, %v4726_v47  ;;  %v4729_v2 = vsub.f32 1.0, %v4728_v11  ;;  %v8701_v11 = vpop.f32.mrf.mxu0 }
 0x46b   : > { %v3952_v51 = vpop.f32.mrf.mxu2  ;;  %v4307_v47 = vsel %vm4288_vm3, %v8489_v13, 0.0 }
 0x46c   : > { %v4082_v39 = vmul.f32 %v4064_v58, %v3952_v51  ;;  %v4345_v58 = vsel %vm4326_vm2, %v8492_v54, 0.0  ;;  %v8690_v51 = vadd.f32 %v9435_v10, %v8244_v45  ;;  %vm4903_vm4 = vcmp.eq.f32.partialorder %v9401_v18, %v8672_v24 }
 0x46d   : > { %v4250_v32 = vpop.f32.mrf.mxu3  ;;  %vm4905_vm10 = vcmp.eq.f32.partialorder %v7573_v55, %v8672_v24  ;;  %v8729_v10 = vadd.f32 %v8226_v16, %v8291_v49  ;;  %vm4904_vm13 = vcmp.eq.f32.partialorder %v9385_v61, %v8672_v24  ;;  %vm4906_vm1 = vcmp.eq.f32.partialorder %v7482_v0, %v8672_v24 }
 0x46e   : > { %v4100_v17 = vadd.f32 %v4082_v39, %v8574_v30  ;;  %v4380_v60 = vmul.f32 %v4362_v5, %v4250_v32  ;;  %v8668_v44 = vpop.f32.mrf.mxu1  ;;  %v8679_v30 = vperm.slane %v4716_v23, 0  ;;  %v8697_v39 = vperm.slane %v4727_v15, 0 }
 0x46f   : > { %v8699_v5 = vperm.slane %v4729_v2, 0  ;;  %v4048_v15 = vsel %vm4029_vm11, %v8479_v29, 0.0  ;;  %v4010_v2 = vsel %vm3991_vm8, %v8476_v21, 0.0  ;;  %vm4907_vm8 = vcmp.eq.f32.partialorder %v7510_v19, %v8672_v24 }
 0x470   : > { %v4398_v37 = vadd.f32 %v4380_v60, %v4100_v17  ;;  %vm4941_vm5 = vcmp.eq.f32.partialorder %v9401_v18, %v8679_v30  ;;  %v4922_v25 = vsel %vm4903_vm4, %v8697_v39, 0.0  ;;  %vm4942_vm7 = vcmp.eq.f32.partialorder %v9385_v61, %v8679_v30 }
 0x471   : > { %9436 = vst [vmem:[#allocation27_spill] sm:$0xff] %v8699_v5  ;;  %v4960_v18 = vsel %vm4941_vm5, %v8699_v5, 0.0  ;;  %vm4943_vm14 = vcmp.eq.f32.partialorder %v7573_v55, %v8679_v30  ;;  %v4924_v16 = vsel %vm4905_vm10, %v8697_v39, 0.0  ;;  %vm4944_vm2 = vcmp.eq.f32.partialorder %v7482_v0, %v8679_v30 }
 0x472   : > { %v8684_v42 = vadd.f32 %v8502_v14, %v4398_v37  ;;  %v4363_v14 = vadd.f32 %v4345_v58, %v4307_v47  ;;  %v4308_v47 = vsel %vm4289_vm12, %v8489_v13, 0.0  ;;  %v4962_v61 = vsel %vm4943_vm14, %v8699_v5, 0.0 }
 0x473   : > { %v3954_v52 = vpop.f32.mrf.mxu2  ;;  %vm4945_vm9 = vcmp.eq.f32.partialorder %v7510_v19, %v8679_v30 }
 0x474   : > { %v4083_v23 = vmul.f32 %v4065_v7, %v3954_v52  ;;  %v4066_v7 = vadd.f32 %v4048_v15, %v4010_v2 }
 0x475   : > { %v4252_v32 = vpop.f32.mrf.mxu3 }
 0x476   : > { %v4101_v45 = vadd.f32 %v4083_v23, %v8596_v9  ;;  %v4381_v17 = vmul.f32 %v4363_v14, %v4252_v32  ;;  %v8704_v60 = vpop.f32.mrf.mxu1  ;;  %v4961_v9 = vsel %vm4942_vm7, %v8699_v5, 0.0  ;;  %v4923_v23 = vsel %vm4904_vm13, %v8697_v39, 0.0 }
 0x477   : > { %v4364_v14 = vadd.f32 %v4346_v53, %v4308_v47  ;;  %v8737_v32 = vadd.f32 %v4960_v18, %v4922_v25  ;;  %v8758_v25 = vpop.f32.mrf.mxu0  ;;  %v4963_v53 = vsel %vm4944_vm2, %v8699_v5, 0.0 }
 0x478   : > { %v4399_v37 = vadd.f32 %v4381_v17, %v4101_v45  ;;  %v8739_v45 = vadd.f32 %v4961_v9, %v4923_v23  ;;  %v9439_v17 = vld [vmem:[#allocation16_spill] sm:$0xff] }
 0x479   : > { %9437 = vst [vmem:[#allocation25_spill] sm:$0xff] %v8737_v32  ;;  %vm4626_vm15 = vcmp.eq.f32.partialorder %v9439_v17, %v8177_v41  ;;  %vm4030_vm6 = vcmp.eq.f32.partialorder %v9439_v17, %v8450_v57  ;;  %vm4588_vm0 = vcmp.eq.f32.partialorder %v9439_v17, %v8152_v36  ;;  %vm3992_vm3 = vcmp.eq.f32.partialorder %v9439_v17, %v8443_v35 }
 0x47a   : > { %v8723_v58 = vadd.f32 %v8532_v26, %v4399_v37  ;;  %9438 = vst [vmem:[#allocation26_spill] sm:$0xff] %v8739_v45  ;;  %v4645_v55 = vsel %vm4626_vm15, %v8180_v4, 0.0  ;;  %v4049_v18 = vsel %vm4030_vm6, %v8479_v29, 0.0  ;;  %vm4328_vm4 = vcmp.eq.f32.partialorder %v9439_v17, %v8468_v6 }
 0x47b   : > { %v3957_v52 = vpop.f32.mrf.mxu2  ;;  %v4607_v9 = vsel %vm4588_vm0, %v8173_v46, 0.0  ;;  %vm4290_vm5 = vcmp.eq.f32.partialorder %v9439_v17, %v8465_v8  ;;  %vm4908_vm0 = vcmp.eq.f32.partialorder %v7538_v28, %v8672_v24 }
 0x47c   : > { %v4084_v26 = vmul.f32 %v4066_v7, %v3957_v52  ;;  %v4011_v7 = vsel %vm3992_vm3, %v8476_v21, 0.0  ;;  %v4347_v52 = vsel %vm4328_vm4, %v8492_v54, 0.0 }
 0x47d   : > { %v4255_v49 = vpop.f32.mrf.mxu3  ;;  %v4067_v23 = vadd.f32 %v4049_v18, %v4011_v7  ;;  %v9443_v18 = vld [vmem:[#allocation19_spill] sm:$0xff] }
 0x47e   : > { %v4102_v15 = vadd.f32 %v4084_v26, %v8620_v40  ;;  %v4382_v37 = vmul.f32 %v4364_v14, %v4255_v49  ;;  %v8749_v2 = vpop.f32.mrf.mxu1  ;;  %v9441_v26 = vld [vmem:[#allocation38_spill] sm:$0xff]  ;;  %v8780_v49 = vadd.f32 %v4962_v61, %v4924_v16  ;;  %vm4589_vm11 = vcmp.eq.f32.partialorder %v9443_v18, %v8152_v36 }
 0x47f   : > { %9440 = vst [vmem:[#allocation39_spill] sm:$0xff] %v8749_v2  ;;  %v8778_v14 = vadd.f32 %v9441_v26, %v8337_v22  ;;  %vm4627_vm7 = vcmp.eq.f32.partialorder %v9443_v18, %v8177_v41  ;;  %v4608_v16 = vsel %vm4589_vm11, %v8173_v46, 0.0  ;;  %vm4031_vm10 = vcmp.eq.f32.partialorder %v9443_v18, %v8450_v57 }
 0x480   : > { %v4400_v40 = vadd.f32 %v4382_v37, %v4102_v15  ;;  %9442 = vst [vmem:[#allocation57_spill] sm:$0xff] %v8780_v49  ;;  %v4663_v15 = vadd.f32 %v4645_v55, %v4607_v9  ;;  %v4925_v37 = vsel %vm4906_vm1, %v8697_v39, 0.0  ;;  %v4646_v61 = vsel %vm4627_vm7, %v8180_v4, 0.0 }
 0x481   : > { %v8791_v7 = vadd.f32 %v4963_v53, %v4925_v37  ;;  %v4964_v53 = vsel %vm4945_vm9, %v8699_v5, 0.0  ;;  %vm3993_vm13 = vcmp.eq.f32.partialorder %v9443_v18, %v8443_v35  ;;  %vm4329_vm14 = vcmp.eq.f32.partialorder %v9443_v18, %v8468_v6 }
 0x482   : > { %v8772_v47 = vadd.f32 %v8565_v50, %v4400_v40  ;;  %v4309_v50 = vsel %vm4290_vm5, %v8489_v13, 0.0  ;;  %v4681_v37 = vmul.f32 %v4663_v15, %v8701_v11  ;;  %vm4291_vm6 = vcmp.eq.f32.partialorder %v9443_v18, %v8465_v8 }
 0x483   : > { %v3959_v2 = vpop.f32.mrf.mxu2  ;;  %v4365_v22 = vadd.f32 %v4347_v52, %v4309_v50  ;;  %v9445_v52 = vld [vmem:[#allocation20_spill] sm:$0xff]  ;;  %v8827_v15 = vadd.f32 %v8314_v20, %v8376_v34  ;;  %v4310_v45 = vsel %vm4291_vm6, %v8489_v13, 0.0  ;;  %vm4946_vm1 = vcmp.eq.f32.partialorder %v7538_v28, %v8679_v30 }
 0x484   : > { %v4085_v40 = vmul.f32 %v4067_v23, %v3959_v2  ;;  %v4926_v2 = vsel %vm4907_vm8, %v8697_v39, 0.0  ;;  %vm4628_vm12 = vcmp.eq.f32.partialorder %v9445_v52, %v8177_v41  ;;  %v4050_v23 = vsel %vm4031_vm10, %v8479_v29, 0.0 }
 0x485   : > { %v4257_v0 = vpop.f32.mrf.mxu3  ;;  %vm4590_vm15 = vcmp.eq.f32.partialorder %v9445_v52, %v8152_v36  ;;  %v4647_v50 = vsel %vm4628_vm12, %v8180_v4, 0.0  ;;  %v4927_v20 = vsel %vm4908_vm0, %v8697_v39, 0.0  ;;  %v4965_v34 = vsel %vm4946_vm1, %v8699_v5, 0.0 }
 0x486   : > { %v4103_v55 = vadd.f32 %v4085_v40, %v8642_v3  ;;  %v4383_v9 = vmul.f32 %v4365_v22, %v4257_v0  ;;  %v8800_v26 = vpop.f32.mrf.mxu1  ;;  %v8814_v3 = vpop.f32.mrf.mxu0  ;;  %v4012_v40 = vsel %vm3993_vm13, %v8476_v21, 0.0  ;;  %v4348_v22 = vsel %vm4329_vm14, %v8492_v54, 0.0 }
 0x487   : > { %9444 = vst [vmem:[#allocation21_spill] sm:$0xff] %v8800_v26  ;;  %v4068_v11 = vadd.f32 %v4050_v23, %v4012_v40  ;;  %v4609_v26 = vsel %vm4590_vm15, %v8173_v46, 0.0  ;;  %vm4032_vm4 = vcmp.eq.f32.partialorder %v9445_v52, %v8450_v57  ;;  %vm4947_vm5 = vcmp.eq.f32.partialorder %v7472_v62, %v8679_v30 }
 0x488   : > { %v4401_v19 = vadd.f32 %v4383_v9, %v4103_v55  ;;  %v4664_v55 = vadd.f32 %v4646_v61, %v4608_v16  ;;  %v8829_v9 = vadd.f32 %v4964_v53, %v4926_v2  ;;  %v9447_v16 = vld [vmem:[#allocation15_spill] sm:$0xff]  ;;  %vm3994_vm11 = vcmp.eq.f32.partialorder %v9445_v52, %v8443_v35 }
 0x489   : > { %vm4591_vm2 = vcmp.eq.f32.partialorder %v9447_v16, %v8152_v36  ;;  %vm4629_vm3 = vcmp.eq.f32.partialorder %v9447_v16, %v8177_v41  ;;  %vm4330_vm7 = vcmp.eq.f32.partialorder %v9445_v52, %v8468_v6  ;;  %vm4909_vm8 = vcmp.eq.f32.partialorder %v7472_v62, %v8672_v24 }
 0x48a   : > { %v8821_v0 = vadd.f32 %v4681_v37, %v4401_v19  ;;  %v4366_v37 = vadd.f32 %v4348_v22, %v4310_v45  ;;  %v4665_v19 = vadd.f32 %v4647_v50, %v4609_v26  ;;  %v4610_v28 = vsel %vm4591_vm2, %v8173_v46, 0.0 }
 0x48b   : > { %v3962_v32 = vpop.f32.mrf.mxu2  ;;  %v4051_v26 = vsel %vm4032_vm4, %v8479_v29, 0.0  ;;  %v4682_v50 = vmul.f32 %v4664_v55, %v8758_v25  ;;  %v4013_v22 = vsel %vm3994_vm11, %v8476_v21, 0.0  ;;  %vm4292_vm9 = vcmp.eq.f32.partialorder %v9445_v52, %v8465_v8 }
 0x48c   : > { %9446 = vst [vmem:[#allocation47_spill] sm:$0xff] %v8821_v0  ;;  %v4086_v23 = vmul.f32 %v4068_v11, %v3962_v32  ;;  %v4648_v32 = vsel %vm4629_vm3, %v8180_v4, 0.0  ;;  %v4349_v11 = vsel %vm4330_vm7, %v8492_v54, 0.0  ;;  %v8869_v25 = vadd.f32 %v8360_v56, %v8419_v59 }
 0x48d   : > { %v4260_v61 = vpop.f32.mrf.mxu3  ;;  %v8871_v55 = vadd.f32 %v4965_v34, %v4927_v20  ;;  %v4666_v62 = vadd.f32 %v4648_v32, %v4610_v28  ;;  %v4311_v0 = vsel %vm4292_vm9, %v8489_v13, 0.0  ;;  %vm4592_vm10 = vcmp.eq.f32.partialorder %v9384_v1, %v8152_v36 }
 0x48e   : > { %v4104_v2 = vadd.f32 %v4086_v23, %v8664_v33  ;;  %v4384_v53 = vmul.f32 %v4366_v37, %v4260_v61  ;;  %v8850_v45 = vpop.f32.mrf.mxu1  ;;  %v4966_v33 = vsel %vm4947_vm5, %v8699_v5, 0.0  ;;  %v4069_v37 = vadd.f32 %v4051_v26, %v4013_v22  ;;  %9450 = vst [vmem:[#allocation49_spill] sm:$0xff] %v8869_v25  ;;  %v4563_v61 = vpop.f32.mrf.mxu0 }
 0x48f   : > { %9448 = vst [vmem:[#allocation44_spill] sm:$0xff] %v8850_v45  ;;  %vm4630_vm12 = vcmp.eq.f32.partialorder %v9384_v1, %v8177_v41  ;;  %v4611_v56 = vsel %vm4592_vm10, %v8173_v46, 0.0  ;;  %vm4910_vm13 = vcmp.eq.f32.partialorder %v9408_v27, %v8672_v24  ;;  %vm4948_vm14 = vcmp.eq.f32.partialorder %v9408_v27, %v8679_v30 }
 0x490   : > { %v4402_v40 = vadd.f32 %v4384_v53, %v4104_v2  ;;  %v4928_v2 = vsel %vm4909_vm8, %v8697_v39, 0.0  ;;  %v4649_v59 = vsel %vm4630_vm12, %v8180_v4, 0.0  ;;  %vm4033_vm15 = vcmp.eq.f32.partialorder %v9447_v16, %v8450_v57 }
 0x491   : > { %vm4593_vm6 = vcmp.eq.f32.partialorder %v7457_v43, %v8152_v36  ;;  %vm4631_vm0 = vcmp.eq.f32.partialorder %v7457_v43, %v8177_v41  ;;  %v4052_v32 = vsel %vm4033_vm15, %v8479_v29, 0.0  ;;  %vm3995_vm1 = vcmp.eq.f32.partialorder %v9447_v16, %v8443_v35 }
 0x492   : > { %v8863_v23 = vadd.f32 %v4682_v50, %v4402_v40  ;;  %v4367_v50 = vadd.f32 %v4349_v11, %v4311_v0  ;;  %v8879_v40 = vadd.f32 %v4966_v33, %v4928_v2  ;;  %v4967_v0 = vsel %vm4948_vm14, %v8699_v5, 0.0 }
 0x493   : > { %v3964_v53 = vpop.f32.mrf.mxu2  ;;  %v4683_v33 = vmul.f32 %v4665_v19, %v8814_v3  ;;  %vm4331_vm2 = vcmp.eq.f32.partialorder %v9447_v16, %v8468_v6  ;;  %vm4949_vm3 = vcmp.eq.f32.partialorder %v9412_v38, %v8679_v30  ;;  %vm4293_vm4 = vcmp.eq.f32.partialorder %v9447_v16, %v8465_v8 }
 0x494   : > { %9449 = vst [vmem:[#allocation24_spill] sm:$0xff] %v8863_v23  ;;  %v4087_v26 = vmul.f32 %v4069_v37, %v3964_v53  ;;  %v4014_v37 = vsel %vm3995_vm1, %v8476_v21, 0.0  ;;  %v4350_v2 = vsel %vm4331_vm2, %v8492_v54, 0.0  ;;  %v4968_v3 = vsel %vm4949_vm3, %v8699_v5, 0.0 }
 0x495   : > { %v4262_v20 = vpop.f32.mrf.mxu3  ;;  %v4070_v53 = vadd.f32 %v4052_v32, %v4014_v37  ;;  %vm4911_vm5 = vcmp.eq.f32.partialorder %v9412_v38, %v8672_v24  ;;  %v4667_v23 = vadd.f32 %v4649_v59, %v4611_v56  ;;  %v9454_v38 = vld [vmem:[#allocation18_spill] sm:$0xff]  ;;  %vm4034_vm7 = vcmp.eq.f32.partialorder %v9384_v1, %v8450_v57  ;;  %v9455_v56 = vld [vmem:[#allocation33_spill] sm:$0xff] }
 0x496   : > { %v4105_v34 = vadd.f32 %v4087_v26, %v8690_v51  ;;  %v4385_v28 = vmul.f32 %v4367_v50, %v4262_v20  ;;  %v4650_v51 = vsel %vm4631_vm0, %v8180_v4, 0.0  ;;  %v8904_v11 = vpop.f32.mrf.mxu1  ;;  %v4929_v26 = vsel %vm4910_vm13, %v8697_v39, 0.0  ;;  %v4565_v27 = vpop.f32.mrf.mxu0 }
 0x497   : > { %9451 = vst [vmem:[#allocation46_spill] sm:$0xff] %v8904_v11  ;;  %v4612_v50 = vsel %vm4593_vm6, %v8173_v46, 0.0  ;;  %vm4632_vm11 = vcmp.eq.f32.partialorder %v9454_v38, %v8177_v41  ;;  %vm4594_vm8 = vcmp.eq.f32.partialorder %v9454_v38, %v8152_v36  ;;  %vm4633_vm9 = vcmp.eq.f32.partialorder %v9455_v56, %v8177_v41 }
 0x498   : > { %v4403_v22 = vadd.f32 %v4385_v28, %v4105_v34  ;;  %v4312_v34 = vsel %vm4293_vm4, %v8489_v13, 0.0  ;;  %v4930_v28 = vsel %vm4911_vm5, %v8697_v39, 0.0  ;;  %v8929_v45 = vadd.f32 %v4650_v51, %v4612_v50 }
 0x499   : > { %v4986_v11 = vadd.f32 %v4968_v3, %v4930_v28  ;;  %v4053_v59 = vsel %vm4034_vm7, %v8479_v29, 0.0  ;;  %vm3996_vm10 = vcmp.eq.f32.partialorder %v9384_v1, %v8443_v35  ;;  %vm4332_vm12 = vcmp.eq.f32.partialorder %v9384_v1, %v8468_v6 }
 0x49a   : > { %v8909_v19 = vadd.f32 %v4683_v33, %v4403_v22  ;;  %v4368_v33 = vadd.f32 %v4350_v2, %v4312_v34  ;;  %v9453_v22 = vld [vmem:[#allocation17_spill] sm:$0xff]  ;;  %v4015_v2 = vsel %vm3996_vm10, %v8476_v21, 0.0  ;;  %v4351_v3 = vsel %vm4332_vm12, %v8492_v54, 0.0 }
 0x49b   : > { %v3967_v20 = vpop.f32.mrf.mxu2  ;;  %v8927_v37 = vadd.f32 %v9453_v22, %v8457_v48  ;;  %v4651_v48 = vsel %vm4632_vm11, %v8180_v4, 0.0  ;;  %vm4294_vm13 = vcmp.eq.f32.partialorder %v9384_v1, %v8465_v8  ;;  %vm4912_vm14 = vcmp.eq.f32.partialorder %v9439_v17, %v8672_v24 }
 0x49c   : > { %9452 = vst [vmem:[#allocation51_spill] sm:$0xff] %v8909_v19  ;;  %v4088_v32 = vmul.f32 %v4070_v53, %v3967_v20  ;;  %v4985_v19 = vadd.f32 %v4967_v0, %v4929_v26  ;;  %v4684_v0 = vmul.f32 %v4666_v62, %v4563_v61  ;;  %v4071_v26 = vadd.f32 %v4053_v59, %v4015_v2 }
 0x49d   : > { %v4265_v25 = vpop.f32.mrf.mxu3  ;;  %vm4595_vm15 = vcmp.eq.f32.partialorder %v9455_v56, %v8152_v36  ;;  %v4313_v34 = vsel %vm4294_vm13, %v8489_v13, 0.0  ;;  %vm4950_vm6 = vcmp.eq.f32.partialorder %v9439_v17, %v8679_v30  ;;  %v8971_v22 = vsel %vm4912_vm14, %v8697_v39, 0.0 }
 0x49e   : > { %v4106_v49 = vadd.f32 %v4088_v32, %v8729_v10  ;;  %v4386_v12 = vmul.f32 %v4368_v33, %v4265_v25  ;;  %v4613_v10 = vsel %vm4594_vm8, %v8173_v46, 0.0  ;;  %v4652_v25 = vsel %vm4633_vm9, %v8180_v4, 0.0  ;;  %v8964_v50 = vpop.f32.mrf.mxu1 }
 0x49f   : > { %v8958_v62 = vadd.f32 %v4651_v48, %v4613_v10  ;;  %v4614_v28 = vsel %vm4595_vm15, %v8173_v46, 0.0  ;;  %v4369_v33 = vadd.f32 %v4351_v3, %v4313_v34  ;;  %v8974_v48 = vsel %vm4950_vm6, %v8699_v5, 0.0  ;;  %v4568_v10 = vpop.f32.mrf.mxu0 }
 0x4a0   : > { %v4404_v51 = vadd.f32 %v4386_v12, %v4106_v49  ;;  %v9456_v12 = vld [vmem:[#allocation30_spill] sm:$0xff]  ;;  %v9457_v49 = vld [vmem:[#allocation28_spill] sm:$0xff]  ;;  %v8976_v59 = vadd.f32 %v4652_v25, %v4614_v28  ;;  %vm4913_vm0 = vcmp.eq.f32.partialorder %v9443_v18, %v8672_v24  ;;  %vm4951_vm1 = vcmp.eq.f32.partialorder %v9443_v18, %v8679_v30 }
 0x4a1   : > { %v8956_v61 = vadd.f32 %v9457_v49, %v9456_v12  ;;  %vm4035_vm2 = vcmp.eq.f32.partialorder %v7457_v43, %v8450_v57  ;;  %v8986_v2 = vsel %vm4913_vm0, %v8697_v39, 0.0  ;;  %v8989_v25 = vsel %vm4951_vm1, %v8699_v5, 0.0 }
 0x4a2   : > { %v8950_v53 = vadd.f32 %v4684_v0, %v4404_v51  ;;  %vm4952_vm3 = vcmp.eq.f32.partialorder %v9445_v52, %v8679_v30  ;;  %v4054_v3 = vsel %vm4035_vm2, %v8479_v29, 0.0  ;;  %vm3997_vm4 = vcmp.eq.f32.partialorder %v7457_v43, %v8443_v35 }
 0x4a3   : > { %v3969_v20 = vpop.f32.mrf.mxu2  ;;  %vm4333_vm5 = vcmp.eq.f32.partialorder %v7457_v43, %v8468_v6  ;;  %vm4953_vm11 = vcmp.eq.f32.partialorder %v9447_v16, %v8679_v30  ;;  %v4016_v12 = vsel %vm3997_vm4, %v8476_v21, 0.0  ;;  %vm4295_vm7 = vcmp.eq.f32.partialorder %v7457_v43, %v8465_v8 }
 0x4a4   : > { %v4089_v32 = vmul.f32 %v4071_v26, %v3969_v20  ;;  %v4685_v26 = vmul.f32 %v4667_v23, %v4565_v27  ;;  %v4352_v49 = vsel %vm4333_vm5, %v8492_v54, 0.0  ;;  %v9006_v20 = vsel %vm4953_vm11, %v8699_v5, 0.0 }
 0x4a5   : > { %v4267_v0 = vpop.f32.mrf.mxu3  ;;  %v4072_v27 = vadd.f32 %v4054_v3, %v4016_v12  ;;  %v5003_v34 = vmul.f32 %v4985_v19, %v8668_v44  ;;  %v5004_v28 = vmul.f32 %v4986_v11, %v8704_v60  ;;  %vm4954_vm8 = vcmp.eq.f32.partialorder %v9384_v1, %v8679_v30 }
 0x4a6   : > { %v4107_v17 = vadd.f32 %v4089_v32, %v8778_v14  ;;  %v4387_v51 = vmul.f32 %v4369_v33, %v4267_v0  ;;  %v8999_v14 = vsel %vm4952_vm3, %v8699_v5, 0.0  ;;  %v4314_v33 = vsel %vm4295_vm7, %v8489_v13, 0.0 }
 0x4a7   : > { %v5002_v0 = vmul.f32 %v8879_v40, %v8646_v63  ;;  %v4370_v3 = vadd.f32 %v4352_v49, %v4314_v33  ;;  %vm4036_vm9 = vcmp.eq.f32.partialorder %v9454_v38, %v8450_v57  ;;  %vm4334_vm10 = vcmp.eq.f32.partialorder %v9454_v38, %v8468_v6  ;;  %v9458_v63 = vld [vmem:[#allocation45_spill] sm:$0xff]  ;;  %v9461_v33 = vld [vmem:[#allocation43_spill] sm:$0xff] }
 0x4a8   : > { %v4405_v18 = vadd.f32 %v4387_v51, %v4107_v17  ;;  %v9020_v17 = vsel %vm4954_vm8, %v8699_v5, 0.0  ;;  %v9029_v44 = vadd.f32 %v5004_v28, %v8772_v47  ;;  %v9032_v60 = vadd.f32 %v5003_v34, %v8723_v58  ;;  %v4570_v34 = vpop.f32.mrf.mxu0 }
 0x4a9   : > { %v5001_v40 = vmul.f32 %v8871_v55, %v9458_v63  ;;  %vm4917_vm12 = vcmp.eq.f32.partialorder %v7457_v43, %v8672_v24  ;;  %v9040_v12 = vadd.f32 %v5002_v0, %v8684_v42  ;;  %vm3998_vm13 = vcmp.eq.f32.partialorder %v9454_v38, %v8443_v35  ;;  %v9459_v55 = vld [vmem:[#allocation23_spill] sm:$0xff] }
 0x4aa   : > { %v9008_v23 = vadd.f32 %v4685_v26, %v4405_v18  ;;  %v9022_v26 = vpop.f32.mrf.mxu1  ;;  %v4055_v47 = vsel %vm4036_vm9, %v8479_v29, 0.0  ;;  %vm4296_vm14 = vcmp.eq.f32.partialorder %v9454_v38, %v8465_v8  ;;  %v4353_v58 = vsel %vm4334_vm10, %v8492_v54, 0.0 }
 0x4ab   : > { %v3972_v32 = vpop.f32.mrf.mxu2  ;;  %v5000_v49 = vmul.f32 %v8829_v9, %v9459_v55  ;;  %vm4916_vm15 = vcmp.eq.f32.partialorder %v9384_v1, %v8672_v24  ;;  %vm4955_vm6 = vcmp.eq.f32.partialorder %v7457_v43, %v8679_v30  ;;  %vm4956_vm0 = vcmp.eq.f32.partialorder %v9454_v38, %v8679_v30 }
 0x4ac   : > { %v4090_v51 = vmul.f32 %v4072_v27, %v3972_v32  ;;  %v4686_v27 = vmul.f32 %v8929_v45, %v4568_v10  ;;  %v4017_v28 = vsel %vm3998_vm13, %v8476_v21, 0.0  ;;  %v4315_v9 = vsel %vm4296_vm14, %v8489_v13, 0.0  ;;  %v9460_v32 = vld [vmem:[#allocation34_spill] sm:$0xff] }
 0x4ad   : > { %v4270_v18 = vpop.f32.mrf.mxu3  ;;  %v4999_v45 = vmul.f32 %v8791_v7, %v9460_v32  ;;  %vm4915_vm1 = vcmp.eq.f32.partialorder %v9447_v16, %v8672_v24  ;;  %v9067_v0 = vadd.f32 %v5000_v49, %v9461_v33  ;;  %vm4918_vm2 = vcmp.eq.f32.partialorder %v9454_v38, %v8672_v24  ;;  %v9470_v32 = vld [vmem:[#allocation49_spill] sm:$0xff] }
 0x4ae   : > { %v4108_v11 = vadd.f32 %v4090_v51, %v8827_v15  ;;  %v4388_v19 = vmul.f32 %v4370_v3, %v4270_v18  ;;  %v9054_v15 = vadd.f32 %v5001_v40, %v8660_v31  ;;  %v4073_v31 = vadd.f32 %v4055_v47, %v4017_v28  ;;  %v9463_v40 = vld [vmem:[#allocation31_spill] sm:$0xff]  ;;  %v9465_v47 = vld [vmem:[#allocation56_spill] sm:$0xff]  ;;  %v9471_v33 = vld [vmem:[#allocation37_spill] sm:$0xff] }
 0x4af   : > { %9462 = vst [vmem:[#allocation48_spill] sm:$0xff] %v9067_v0  ;;  %v4974_v51 = vsel %vm4955_vm6, %v8699_v5, 0.0  ;;  %v4975_v3 = vsel %vm4956_vm0, %v8699_v5, 0.0  ;;  %v4371_v63 = vadd.f32 %v4353_v58, %v4315_v9  ;;  %vm4914_vm3 = vcmp.eq.f32.partialorder %v9445_v52, %v8672_v24  ;;  %v9469_v9 = vld [vmem:[#allocation35_spill] sm:$0xff]  ;;  %v9473_v0 = vld [vmem:[#allocation25_spill] sm:$0xff] }
 0x4b0   : > { %v4406_v42 = vadd.f32 %v4388_v19, %v4108_v11  ;;  %v9464_v11 = vld [vmem:[#allocation57_spill] sm:$0xff]  ;;  %vm4037_vm4 = vcmp.eq.f32.partialorder %v9455_v56, %v8450_v57  ;;  %v9080_v55 = vadd.f32 %v4999_v45, %v9465_v47  ;;  %v4937_v49 = vsel %vm4918_vm2, %v8697_v39, 0.0 }
 0x4b1   : > { %v4998_v7 = vmul.f32 %v9464_v11, %v9463_v40  ;;  %vm3999_vm5 = vcmp.eq.f32.partialorder %v9455_v56, %v8443_v35  ;;  %v4056_v58 = vsel %vm4037_vm4, %v8479_v29, 0.0  ;;  %vm4335_vm11 = vcmp.eq.f32.partialorder %v9455_v56, %v8468_v6 }
 0x4b2   : > { %v4704_v10 = vadd.f32 %v4686_v27, %v4406_v42  ;;  %9466 = vst [vmem:[#allocation53_spill] sm:$0xff] %v9080_v55  ;;  %v9467_v27 = vld [vmem:[#allocation42_spill] sm:$0xff]  ;;  %vm4596_vm7 = vcmp.eq.f32.partialorder %v9469_v9, %v8152_v36  ;;  %vm4634_vm8 = vcmp.eq.f32.partialorder %v9469_v9, %v8177_v41  ;;  %v4936_v40 = vsel %vm4917_vm12, %v8697_v39, 0.0  ;;  %v4894_v11 = vpop.f32.mrf.mxu1  ;;  %v9472_v55 = vld [vmem:[#allocation29_spill] sm:$0xff] }
 0x4b3   : > { %v3974_v18 = vpop.f32.mrf.mxu2  ;;  %v9468_v42 = vld [vmem:[#allocation26_spill] sm:$0xff]  ;;  %v4993_v47 = vadd.f32 %v4975_v3, %v4937_v49  ;;  %v4996_v5 = vmul.f32 %v9473_v0, %v9472_v55  ;;  %v4935_v43 = vsel %vm4916_vm15, %v8697_v39, 0.0  ;;  %vm4297_vm9 = vcmp.eq.f32.partialorder %v9455_v56, %v8465_v8  ;;  %v9475_v55 = vld [vmem:[#allocation40_spill] sm:$0xff] }
 0x4b4   : > { %v4091_v19 = vmul.f32 %v4073_v31, %v3974_v18  ;;  %v4997_v28 = vmul.f32 %v9468_v42, %v9467_v27  ;;  %v9096_v18 = vadd.f32 %v4998_v7, %v9471_v33  ;;  %v4018_v27 = vsel %vm3999_vm5, %v8476_v21, 0.0 }
 0x4b5   : > { %v4272_v38 = vpop.f32.mrf.mxu3  ;;  %v4354_v42 = vsel %vm4335_vm11, %v8492_v54, 0.0  ;;  %v4074_v3 = vadd.f32 %v4056_v58, %v4018_v27  ;;  %v5011_v49 = vmul.f32 %v4993_v47, %v4894_v11  ;;  %v4316_v0 = vsel %vm4297_vm9, %v8489_v13, 0.0 }
 0x4b6   : > { %v4109_v45 = vadd.f32 %v4091_v19, %v9470_v32  ;;  %v4389_v31 = vmul.f32 %v4371_v63, %v4272_v38  ;;  %v4687_v19 = vmul.f32 %v8958_v62, %v4570_v34  ;;  %v9474_v38 = vld [vmem:[#allocation41_spill] sm:$0xff]  ;;  %v4992_v32 = vadd.f32 %v4974_v51, %v4936_v40  ;;  %v4573_v34 = vpop.f32.mrf.mxu0 }
 0x4b7   : > { %v9108_v7 = vadd.f32 %v4997_v28, %v9474_v38  ;;  %v9118_v62 = vadd.f32 %v4996_v5, %v9475_v55  ;;  %v4934_v28 = vsel %vm4915_vm1, %v8697_v39, 0.0  ;;  %v4991_v1 = vadd.f32 %v9020_v17, %v4935_v43  ;;  %v9479_v43 = vld [vmem:[#allocation51_spill] sm:$0xff] }
 0x4b8   : > { %v4407_v63 = vadd.f32 %v4389_v31, %v4109_v45  ;;  %v4372_v58 = vadd.f32 %v4354_v42, %v4316_v0  ;;  %vm4000_vm10 = vcmp.eq.f32.partialorder %v9469_v9, %v8443_v35  ;;  %v5010_v45 = vmul.f32 %v4992_v32, %v9022_v26 }
 0x4b9   : > { %vm4038_vm12 = vcmp.eq.f32.partialorder %v9469_v9, %v8450_v57  ;;  %v4933_v5 = vsel %vm4914_vm3, %v8697_v39, 0.0  ;;  %v4990_v16 = vadd.f32 %v9006_v20, %v4934_v28  ;;  %vm4298_vm13 = vcmp.eq.f32.partialorder %v9469_v9, %v8465_v8  ;;  %v9482_v28 = vld [vmem:[#allocation47_spill] sm:$0xff] }
 0x4ba   : > { %v4705_v33 = vadd.f32 %v4687_v19, %v4407_v63  ;;  %vm4336_vm14 = vcmp.eq.f32.partialorder %v9469_v9, %v8468_v6  ;;  %v5009_v26 = vmul.f32 %v4991_v1, %v8964_v50  ;;  %v5028_v57 = vadd.f32 %v5010_v45, %v4704_v10  ;;  %v9476_v50 = vld [vmem:[#allocation46_spill] sm:$0xff]  ;;  %v9483_v45 = vld [vmem:[#allocation27_spill] sm:$0xff] }
 0x4bb   : > { %v3977_v51 = vpop.f32.mrf.mxu2  ;;  %v4988_v52 = vadd.f32 %v8989_v25, %v8986_v2  ;;  %v4989_v27 = vadd.f32 %v8999_v14, %v4933_v5  ;;  %v4019_v20 = vsel %vm4000_vm10, %v8476_v21, 0.0  ;;  %v4057_v42 = vsel %vm4038_vm12, %v8479_v29, 0.0 }
 0x4bc   : > { %v5029_v31 = vadd.f32 %v5011_v49, %v4705_v33  ;;  %v4092_v40 = vmul.f32 %v4074_v3, %v3977_v51  ;;  %v4688_v19 = vmul.f32 %v8976_v59, %v4573_v34  ;;  %v5008_v63 = vmul.f32 %v4990_v16, %v9476_v50  ;;  %v9477_v59 = vld [vmem:[#allocation44_spill] sm:$0xff]  ;;  %v9480_v49 = vld [vmem:[#allocation39_spill] sm:$0xff] }
 0x4bd   : > { %v4275_v17 = vpop.f32.mrf.mxu3  ;;  %v5027_v10 = vadd.f32 %v5009_v26, %v9008_v23  ;;  %v4615_v2 = vsel %vm4596_vm7, %v8173_v46, 0.0  ;;  %v4653_v35 = vsel %vm4634_vm8, %v8180_v4, 0.0  ;;  %v4317_v21 = vsel %vm4298_vm13, %v8489_v13, 0.0  ;;  %v9478_v23 = vld [vmem:[#allocation21_spill] sm:$0xff] }
 0x4be   : > { %v4110_v11 = vadd.f32 %v4092_v40, %v8927_v37  ;;  %v4390_v47 = vmul.f32 %v4372_v58, %v4275_v17  ;;  %5038 = vmatpush.msrb.mxu0 %v5029_v31  ;;  %v4355_v29 = vsel %vm4336_vm14, %v8492_v54, 0.0  ;;  %v5007_v25 = vmul.f32 %v4989_v27, %v9477_v59  ;;  %v4575_v6 = vpop.f32.mrf.mxu0  ;;  %v4897_v58 = vpop.f32.mrf.mxu1  ;;  %v9484_v40 = vld [vmem:[#allocation48_spill] sm:$0xff]  ;;  %v5032_v26 = vld [vmem:[%s9486_s22] sm:$0xff] }
 0x4bf   : > { %v4075_v36 = vadd.f32 %v4057_v42, %v4019_v20  ;;  %v5026_v46 = vadd.f32 %v5008_v63, %v8950_v53  ;;  %v4987_v41 = vadd.f32 %v8974_v48, %v8971_v22  ;;  %v5006_v38 = vmul.f32 %v4988_v52, %v9478_v23  ;;  %v9481_v53 = vld [vmem:[#allocation24_spill] sm:$0xff] }
 0x4c0   : > { %v4408_v37 = vadd.f32 %v4390_v47, %v4110_v11  ;;  %5039 = vmatpush.msrb.mxu0 %v5028_v57  ;;  %v4373_v13 = vadd.f32 %v4355_v29, %v4317_v21  ;;  %v5025_v32 = vadd.f32 %v5007_v25, %v9479_v43  ;;  %v4671_v54 = vadd.f32 %v4653_v35, %v4615_v2 }
 0x4c1   : > { %v5005_v33 = vmul.f32 %v4987_v41, %v9480_v49  ;;  %v5024_v34 = vadd.f32 %v5006_v38, %v9481_v53  ;;  %vm4920_vm15 = vcmp.eq.f32.partialorder %v9469_v9, %v8672_v24  ;;  %vm4958_vm6 = vcmp.eq.f32.partialorder %v9469_v9, %v8679_v30 }
 0x4c2   : > { %v4706_v14 = vadd.f32 %v4688_v19, %v4408_v37  ;;  %5040 = vmatpush.msrb.mxu0 %v5027_v10  ;;  %v4689_v22 = vmul.f32 %v4671_v54, %v4575_v6  ;;  %v4977_v31 = vsel %vm4958_vm6, %v9483_v45, 0.0  ;;  %vm4957_vm0 = vcmp.eq.f32.partialorder %v9455_v56, %v8679_v30 }
 0x4c3   : > { %v3979_v4 = vpop.f32.mrf.mxu2  ;;  %v5023_v1 = vadd.f32 %v5005_v33, %v9482_v28  ;;  %vm4919_vm1 = vcmp.eq.f32.partialorder %v9455_v56, %v8672_v24  ;;  %vm5034_vm2 = vcmask 130048  }
 0x4c4   : > { %v4093_v8 = vmul.f32 %v4075_v36, %v3979_v4  ;;  %5041 = vmatpush.msrb.mxu0 %v5026_v46 }
 0x4c5   : > { %v4277_v3 = vpop.f32.mrf.mxu3 }
 0x4c6   : > { %v4111_v0 = vadd.f32 %v4093_v8, %v8956_v61  ;;  %v4391_v55 = vmul.f32 %v4373_v13, %v4277_v3  ;;  %5042 = vmatpush.msrb.mxu0 %v5025_v32  ;;  %v4939_v61 = vsel %vm4920_vm15, %v8697_v39, 0.0 }
 0x4c7   : > { %v4995_v9 = vadd.f32 %v4977_v31, %v4939_v61 }
 0x4c8   : > { %v4409_v48 = vadd.f32 %v4391_v55, %v4111_v0  ;;  %5043 = vmatpush.msrb.mxu0 %v5024_v34 }
 0x4ca   : > { %v4707_v51 = vadd.f32 %v4689_v22, %v4409_v48  ;;  %5044 = vmatpush.msrb.mxu0 %v5023_v1 }
 0x4cc   : > { %5045 = vmatpush.msrb.mxu0 %v9029_v44  ;;  %v4976_v44 = vsel %vm4957_vm0, %v9483_v45, 0.0 }
 0x4ce   : > { %5046 = vmatpush.msrb.mxu0 %v9032_v60  ;;  %v4899_v60 = vpop.f32.mrf.mxu1 }
 0x4cf   : > { %v5013_v16 = vmul.f32 %v4995_v9, %v4899_v60 }
 0x4d0   : > { %5047 = vmatpush.msrb.mxu0 %v9040_v12  ;;  %v9485_v12 = vld [vmem:[#allocation53_spill] sm:$0xff] }
 0x4d1   : > { %v5031_v17 = vadd.f32 %v5013_v16, %v4707_v51 }
 0x4d2   : > { %5048 = vmatpush.msrb.mxu0 %v9054_v15  ;;  %v4938_v15 = vsel %vm4919_vm1, %v8697_v39, 0.0  ;;  %v5033_v39 = vld [vmem:[%s9486_s22 + $0x8] sm:$0xff] }
 0x4d3   : > { %v4994_v5 = vadd.f32 %v4976_v44, %v4938_v15 }
 0x4d4   : > { %5049 = vmatpush.msrb.mxu0 %v9484_v40 }
 0x4d5   : > { %v5012_v30 = vmul.f32 %v4994_v5, %v4897_v58 }
 0x4d6   : > { %5050 = vmatpush.msrb.mxu0 %v9485_v12 }
 0x4d7   : > { %v5030_v24 = vadd.f32 %v5012_v30, %v4706_v14 }
 0x4d8   : > { %5051 = vmatpush.msrb.mxu0 %v9096_v18 }
 0x4da   : > { %5052 = vmatpush.msrb.mxu0 %v9108_v7 }
 0x4dc   : > { %5053 = vmatpush.msrb.mxu0 %v9118_v62 }
 0x4dd   : > { %5054 = vmatmul.f32.vlgmr.msrb.gmra.mxu0 %v5032_v26 }
 0x4de   : > { %5072 = vmatpush.msra.mxu0 %v5031_v17 }
 0x4e0   : > { %5073 = vmatpush.msra.mxu0 %v5030_v24 }
 0x4e5   : > { %6055 = vmatmul.msk.f32.vlgmr.msra.gmra.mxu0 %vm5034_vm2, %v5033_v39 }
 0x55a   : > { %v5055_v56 = vpop.f32.mrf.mxu0 }
 0x562   : > { %v5075_v18 = vpop.f32.mrf.mxu0 }
 0x563   : > { %v5076_v7 = vadd.f32 %v5075_v18, %v5055_v56 }
 0x565   : > { %5078 = vst [vmem:[%s6644_s2] sm:$0xff] %v5076_v7 }
 0x566   : > { %6364 = shalt.err (!%p6361_p0)
}
 0x567   : > { %6246 = dma.vmem_to_hbm [thread:$0]  (%p6589_p11), %s5095_s10, 128, %s5097_s19, %s5080_s25  }
 0x568 PF: > { %p6252_p1 = scmp.ge.s32.totalorder %s6447_s18, 2  ;;  %s5108_s2 = sand.u32 1, %s6411_s30  }
 0x569   : > { %s5109_s29 = scalar_lea.sflag [#allocation7], %s5108_s2 }
 0x56a   : > { %p6249_p2 = pnand %p6252_p1, %p6596_p13 }
 0x56c   : > { %p6250_p3 = pneg %p6249_p2 }
 0x56e   : > { %6406 = dma.done.wait (%p6250_p3), %s5109_s29, 128  }
 0x56f   : > { %6408 = vsyncadd (%p6250_p3), %s5109_s29, 4294967168  ;;  %s22_s18 = sadd.s32 1, %s6447_s18   ;;  %s9488_s24 = sld [smem:[#allocation12_spill]] }
 0x570   : > { %p19_p4 = scmp.ge.s32.totalorder %s22_s18, 10   ;;  %s9489_s9 = sld [smem:[#allocation13_spill]] }
 0x571   : > { %s9490_s15 = sld [smem:[#allocation9_spill]]  ;;  %s9493_s30 = smov %s6423_s12 }
 0x572   : > { %s9491_s20 = sld [smem:[#allocation10_spill]]  ;;  %s9494_s10 = smov %s6419_s11 }
 0x573   : > { %s9492_s17 = sld [smem:[#allocation11_spill]]  ;;  %s9496_s12 = smov %s6427_s13 }
 0x574   : > { %s9498_s14 = smov %s6439_s16  ;;  %21 = sbr.rel (!%p19_p4) target bundleno = 11 (0xb), region = 233 }
 0x575   : > { %s9495_s11 = smov %s9488_s24 }
 0x576   : > { %s9497_s13 = smov %s9489_s9 }
 0x578   : > { %s9499_s16 = smov %s9491_s20 }
 0x579   :  { %5115 = vsyncpa [#allocation7], 1 }
 0x57a   :  { %5117 = vsyncpa [#allocation7 + $0x1], 1 }

</bundles_post_ra>
